<compile_context>
chip_gen: v6e
topology: v6e:2x2x1
jax: 0.10.0
libtpu: 0.0.40
codegen_flags: <defaults>
</compile_context>

<pallas_src>
import functools

import jax
import jax.numpy as jnp
import numpy as np
from jax import lax
from jax.experimental import pallas as pl
from jax.experimental.pallas import tpu as pltpu

BN_EPS = 1e-5
LANE = 128                       # channel axis padded to a multiple of this
VMEM_LIMIT = 48 * 1024 * 1024    # below v7x 64 MiB physical, above 32 MiB default


def _round_up(x, m):
    return (x + m - 1) // m * m


def _silu(z):
    return z * (1.0 / (1.0 + jnp.exp(-z)))


# ----------------------------- Pallas kernels -----------------------------

def matmul_stats_kernel(x_ref, w_ref, y_ref, st_ref):
    """1x1 conv: y = x @ w (bf16 MXU operands, f32 acc) + per-image BN stats."""
    y = jnp.dot(x_ref[...].astype(jnp.bfloat16), w_ref[...],
                preferred_element_type=jnp.float32)
    y_ref[...] = y
    st_ref[...] = jnp.zeros(st_ref.shape, st_ref.dtype)
    st_ref[0:1, :] = jnp.sum(y, axis=0, keepdims=True)
    st_ref[1:2, :] = jnp.sum(y * y, axis=0, keepdims=True)


def bnsilu_matmul_stats_kernel(p_ref, s_ref, t_ref, w_ref, y_ref, st_ref):
    """Fused: a = SiLU(p*scale+shift)  (previous 3x3 BN+SiLU), y = a @ w + stats."""
    a = _silu(p_ref[...] * s_ref[...] + t_ref[...])
    y = jnp.dot(a.astype(jnp.bfloat16), w_ref[...],
                preferred_element_type=jnp.float32)
    y_ref[...] = y
    st_ref[...] = jnp.zeros(st_ref.shape, st_ref.dtype)
    st_ref[0:1, :] = jnp.sum(y, axis=0, keepdims=True)
    st_ref[1:2, :] = jnp.sum(y * y, axis=0, keepdims=True)


def conv3x3_fused_kernel(y1_ref, s_ref, t_ref, w2_ref, y2_ref, st_ref, pad_ref):
    """Fused: a1 = SiLU(y1*scale+shift); y2 = conv3x3(a1, padding=1) via nine
    accumulating MXU matmuls over in-VMEM shifted taps; per-image BN stats.

    y1_ref : (1, H, W, Cm)  raw 1x1-conv output for one image
    s_ref/t_ref : (1, Cm)   folded BN scale/shift of the 1x1 layer
    w2_ref : (3, 3, Cm, Co) bf16 weights
    y2_ref : (H*W, Co)      raw 3x3-conv output rows for this image
    st_ref : (8, Co)        rows 0/1 = sum / sum of squares
    pad_ref: (H+2, W+2, Cm) f32 scratch holding the zero-padded activation
    """
    _, h, w, cm = y1_ref.shape
    co = w2_ref.shape[-1]
    a1 = _silu(y1_ref[0] * s_ref[...] + t_ref[...])          # (H, W, Cm) f32
    pad_ref[...] = jnp.zeros(pad_ref.shape, pad_ref.dtype)    # zero halo
    pad_ref[1:h + 1, 1:w + 1, :] = a1                          # interior
    acc = jnp.zeros((h * w, co), jnp.float32)
    for dh in range(3):
        for dw in range(3):
            tap = pad_ref[dh:dh + h, dw:dw + w, :]
            tap = tap.reshape(h * w, cm).astype(jnp.bfloat16)
            acc = acc + jnp.dot(tap, w2_ref[dh, dw],
                                preferred_element_type=jnp.float32)
    y2_ref[...] = acc
    st_ref[...] = jnp.zeros(st_ref.shape, st_ref.dtype)
    st_ref[0:1, :] = jnp.sum(acc, axis=0, keepdims=True)
    st_ref[1:2, :] = jnp.sum(acc * acc, axis=0, keepdims=True)


def bnsilu_kernel(y_ref, s_ref, t_ref, o_ref):
    o_ref[...] = _silu(y_ref[...] * s_ref[...] + t_ref[...])


def bnsilu_res_kernel(y_ref, s_ref, t_ref, r_ref, o_ref):
    o_ref[...] = _silu(y_ref[...] * s_ref[...] + t_ref[...]) + r_ref[...]


# ----------------------------- pallas_call wrappers -----------------------------

def _cparams():
    return pltpu.CompilerParams(dimension_semantics=("parallel",),
                                vmem_limit_bytes=VMEM_LIMIT)


def conv1x1_with_stats(x_flat, w_bf16, n_img, rows, scale=None, shift=None):
    """x_flat: (N*rows, Ci) f32; w_bf16: (Ci, Cm) bf16.  Optional fused
    BN+SiLU prologue (scale/shift of the previous 3x3 layer)."""
    ci = x_flat.shape[1]
    cm = w_bf16.shape[1]
    row_spec = pl.BlockSpec((rows, ci), lambda i: (i, 0))
    w_spec = pl.BlockSpec((ci, cm), lambda i: (0, 0))
    vec_spec = pl.BlockSpec((1, ci), lambda i: (0, 0))
    if scale is None:
        kernel = matmul_stats_kernel
        in_specs = [row_spec, w_spec]
        args = (x_flat, w_bf16)
    else:
        kernel = bnsilu_matmul_stats_kernel
        in_specs = [row_spec, vec_spec, vec_spec, w_spec]
        args = (x_flat, scale, shift, w_bf16)
    return pl.pallas_call(
        kernel,
        out_shape=(jax.ShapeDtypeStruct((n_img * rows, cm), jnp.float32),
                   jax.ShapeDtypeStruct((n_img * 8, cm), jnp.float32)),
        grid=(n_img,),
        in_specs=in_specs,
        out_specs=(pl.BlockSpec((rows, cm), lambda i: (i, 0)),
                   pl.BlockSpec((8, cm), lambda i: (i, 0))),
        compiler_params=_cparams(),
    )(*args)


def conv3x3_with_stats(y1_flat, scale, shift, w2_bf16, n_img, h, w):
    """y1_flat: (N*H*W, Cm) raw 1x1 output; fused BN+SiLU + 3x3 conv + stats."""
    cm = y1_flat.shape[1]
    co = w2_bf16.shape[-1]
    rows = h * w
    y1_img = y1_flat.reshape(n_img, h, w, cm)      # free, contiguous reshape
    return pl.pallas_call(
        conv3x3_fused_kernel,
        out_shape=(jax.ShapeDtypeStruct((n_img * rows, co), jnp.float32),
                   jax.ShapeDtypeStruct((n_img * 8, co), jnp.float32)),
        grid=(n_img,),
        in_specs=[pl.BlockSpec((1, h, w, cm), lambda i: (i, 0, 0, 0)),
                  pl.BlockSpec((1, cm), lambda i: (0, 0)),
                  pl.BlockSpec((1, cm), lambda i: (0, 0)),
                  pl.BlockSpec((3, 3, cm, co), lambda i: (0, 0, 0, 0))],
        out_specs=(pl.BlockSpec((rows, co), lambda i: (i, 0)),
                   pl.BlockSpec((8, co), lambda i: (i, 0))),
        scratch_shapes=[pltpu.VMEM((h + 2, w + 2, cm), jnp.float32)],
        compiler_params=_cparams(),
    )(y1_img, scale, shift, w2_bf16)


def bn_silu_out(y_flat, scale, shift, residual, n_img, rows):
    """Final BN+SiLU epilogue; residual add fused in when provided."""
    c = y_flat.shape[1]
    row_spec = pl.BlockSpec((rows, c), lambda i: (i, 0))
    vec_spec = pl.BlockSpec((1, c), lambda i: (0, 0))
    if residual is None:
        kernel = bnsilu_kernel
        in_specs = [row_spec, vec_spec, vec_spec]
        args = (y_flat, scale, shift)
    else:
        kernel = bnsilu_res_kernel
        in_specs = [row_spec, vec_spec, vec_spec, row_spec]
        args = (y_flat, scale, shift, residual)
    return pl.pallas_call(
        kernel,
        out_shape=jax.ShapeDtypeStruct((n_img * rows, c), jnp.float32),
        grid=(n_img,),
        in_specs=in_specs,
        out_specs=row_spec,
        compiler_params=_cparams(),
    )(*args)


def bn_scale_shift(stats, count, gamma_p, beta_p):
    """Tiny per-channel fold of BN sufficient stats + affine into scale/shift."""
    st = stats.reshape(-1, 8, stats.shape[-1])
    total = st[:, 0, :].sum(axis=0)
    total_sq = st[:, 1, :].sum(axis=0)
    mean = total / count
    var = jnp.maximum(total_sq / count - mean * mean, 0.0)   # biased (train mode)
    scale = gamma_p * lax.rsqrt(var + BN_EPS)
    shift = beta_p - mean * scale
    return scale.reshape(1, -1), shift.reshape(1, -1)


def _pad_channels_1d(v, cp):
    return jnp.zeros((cp,), jnp.float32).at[: v.shape[0]].set(v)


# ----------------------------- forward -----------------------------

@functools.partial(jax.jit, static_argnames=("n",))
def res_unit_n_forward(x_nchw, params, n):
    """x_nchw: (N, C, H, W) float32. Matches Res_unit_n(input_c, output_c, n)."""
    w1, w2 = params["w1"], params["w2"]
    input_c, mid_c = w1.shape
    output_c = w2.shape[-1]
    shortcut = input_c == output_c

    nb, _, hh, ww = x_nchw.shape
    rows = hh * ww
    assert rows % 8 == 0, "per-image row block must be sublane aligned"
    # TODO(synk): very large H*W would need row-block tiling with a 1-row halo
    # instead of one image per grid step.
    cp_in = _round_up(input_c, LANE)
    cp_mid = _round_up(mid_c, LANE)
    cp_out = _round_up(output_c, LANE)
    m = nb * rows

    # One-time weight / affine prep (lane-padded, bf16 weights for the MXU).
    w1p = (jnp.zeros((cp_in, cp_mid), jnp.float32)
           .at[:input_c, :mid_c].set(w1).astype(jnp.bfloat16))
    w2p = (jnp.zeros((3, 3, cp_mid, cp_out), jnp.float32)
           .at[:, :, :mid_c, :output_c].set(w2).astype(jnp.bfloat16))
    g1 = _pad_channels_1d(params["g1"], cp_mid)
    b1 = _pad_channels_1d(params["b1"], cp_mid)
    g2 = _pad_channels_1d(params["g2"], cp_out)
    b2 = _pad_channels_1d(params["b2"], cp_out)

    # NCHW -> NHWC, lane-pad channels, flatten spatial to per-image row blocks.
    x_nhwc = jnp.transpose(x_nchw, (0, 2, 3, 1))
    x_flat = jnp.pad(x_nhwc, ((0, 0), (0, 0), (0, 0), (0, cp_in - input_c)))
    x_flat = x_flat.reshape(m, cp_in)

    a = x_flat               # raw input to the first 1x1 conv
    s_prev = t_prev = None   # pending BN scale/shift of the previous 3x3 output
    for k in range(n):       # shared weights applied n times
        # CBL 1x1: (fused prev-layer BN+SiLU prologue for k>0) + matmul + stats.
        y1, st1 = conv1x1_with_stats(a, w1p, nb, rows, s_prev, t_prev)
        s1, t1 = bn_scale_shift(st1, m, g1, b1)
        # CBL 3x3: fused BN+SiLU prologue + in-VMEM halo + 9-tap MXU conv + stats.
        y2, st2 = conv3x3_with_stats(y1, s1, t1, w2p, nb, hh, ww)
        s2, t2 = bn_scale_shift(st2, m, g2, b2)
        a, s_prev, t_prev = y2, s2, t2
    # Final BN+SiLU epilogue; residual add fused when input_c == output_c.
    resid = x_flat if shortcut else None
    out_flat = bn_silu_out(a, s_prev, t_prev, resid, nb, rows)
    out = out_flat.reshape(nb, hh, ww, cp_out)[..., :output_c]
    return jnp.transpose(out, (0, 3, 1, 2))


# ----------------------------- pure-JAX references -----------------------------

def _ref_bn_silu(y, gamma, beta):
    mu = jnp.mean(y, axis=(0, 1, 2), keepdims=True)
    var = jnp.mean((y - mu) ** 2, axis=(0, 1, 2), keepdims=True)
    z = (y - mu) / jnp.sqrt(var + BN_EPS) * gamma + beta
    return z * (1.0 / (1.0 + jnp.exp(-z)))


def res_unit_n_reference(x_nchw, params, n, mxu_bf16):
    """mxu_bf16=True mirrors the kernel's bf16 MXU operands (f32 accumulation);
    mxu_bf16=False is the faithful full-f32 computation."""
    def cast(a):
        return a.astype(jnp.bfloat16) if mxu_bf16 else a
    prec = None if mxu_bf16 else lax.Precision.HIGHEST

    x = jnp.transpose(x_nchw, (0, 2, 3, 1))
    y = x
    for _ in range(n):
        y = jnp.einsum("nhwc,cd->nhwd", cast(y), cast(params["w1"]),
                       preferred_element_type=jnp.float32, precision=prec)
        y = _ref_bn_silu(y, params["g1"], params["b1"])
        y = lax.conv_general_dilated(
            cast(y), cast(params["w2"]), window_strides=(1, 1), padding="SAME",
            dimension_numbers=("NHWC", "HWIO", "NHWC"),
            preferred_element_type=jnp.float32, precision=prec)
        y = _ref_bn_silu(y, params["g2"], params["b2"])
    if params["w1"].shape[0] == params["w2"].shape[-1]:
        y = x + y
    return jnp.transpose(y, (0, 3, 1, 2))


# ----------------------------- params & main -----------------------------

def make_params(input_c, output_c, key):
    k1, k2 = jax.random.split(key)
    # Channels-last layouts: 1x1 weight (Cin, Cout); 3x3 weight HWIO.
    w1 = 0.3 * jax.random.normal(k1, (input_c, input_c), jnp.float32)
    w2 = 0.3 * jax.random.normal(k2, (3, 3, input_c, output_c), jnp.float32)
    g1 = 1.0 + 0.1 * jnp.arange(input_c, dtype=jnp.float32)
    b1 = 0.05 * jnp.arange(input_c, dtype=jnp.float32)
    g2 = 1.0 - 0.05 * jnp.arange(output_c, dtype=jnp.float32)
    b2 = -0.03 * jnp.arange(output_c, dtype=jnp.float32)
    return {"w1": w1, "g1": g1, "b1": b1, "w2": w2, "g2": g2, "b2": b2}


if __name__ == "__main__":
    key = jax.random.PRNGKey(0)
    kx, kp = jax.random.split(key)

    N, C, H, W = 2, 4, 16, 16          # input_c == output_c == 4 -> shortcut path
    n_repeat = 2

    x = jax.random.normal(kx, (N, C, H, W), jnp.float32)
    params = make_params(C, C, kp)

    out = jax.block_until_ready(res_unit_n_forward(x, params, n_repeat))
    assert out.shape == (N, C, H, W)

    # Primary check: reference with matching MXU numerics (bf16 operands,
    # f32 accumulation) -- catches any structural / indexing / BN bug.
    ref_bf16 = jax.block_until_ready(
        res_unit_n_reference(x, params, n_repeat, mxu_bf16=True))
    np.testing.assert_allclose(np.asarray(out), np.asarray(ref_bf16),
                               rtol=1e-2, atol=1e-2)

    # Secondary check: faithful f32 reference; looser tolerance covers the
    # bf16 MXU operand rounding used for throughput.
    ref_f32 = jax.block_until_ready(
        res_unit_n_reference(x, params, n_repeat, mxu_bf16=False))
    np.testing.assert_allclose(np.asarray(out), np.asarray(ref_f32),
                               rtol=1e-1, atol=1e-1)

    print("KERNEL_OK")
</pallas_src>

<mosaic_0001>
module attributes {stable_mosaic.version = 11 : i64} {
  func.func @matmul_stats_kernel(%arg0: i32, %arg1: memref<256x128xf32, #tpu.memory_space<vmem>>, %arg2: memref<128x128xbf16, #tpu.memory_space<vmem>>, %arg3: memref<256x128xf32, #tpu.memory_space<vmem>>, %arg4: memref<8x128xf32, #tpu.memory_space<vmem>>) attributes {dimension_semantics = [#tpu.dimension_semantics<parallel>], iteration_bounds = array<i64: 2>, scalar_prefetch = 0 : i64, scratch_operands = 0 : i64, tpu.core_type = #tpu.core_type<tc>, window_params = [{transform_indices = @transform_0, window_bounds = array<i64: 256, 128>}, {pipeline_mode = #tpu.pipeline_mode<synchronous>, transform_indices = @transform_1, window_bounds = array<i64: 128, 128>}, {transform_indices = @transform_2, window_bounds = array<i64: 256, 128>}, {transform_indices = @transform_3, window_bounds = array<i64: 8, 128>}]} {
    %c0 = arith.constant 0 : index
    %c0_0 = arith.constant 0 : index
    %0 = vector.load %arg1[%c0, %c0_0] : memref<256x128xf32, #tpu.memory_space<vmem>>, vector<256x128xf32>
    %1 = arith.truncf %0 : vector<256x128xf32> to vector<256x128xbf16>
    %c0_1 = arith.constant 0 : index
    %c0_2 = arith.constant 0 : index
    %2 = vector.load %arg2[%c0_1, %c0_2] : memref<128x128xbf16, #tpu.memory_space<vmem>>, vector<128x128xbf16>
    %cst = arith.constant dense<0.000000e+00> : vector<256x128xf32>
    %3 = tpu.matmul %1, %2, %cst {dimension_numbers = #tpu.dot_dimension_numbers<[1], [0], [0], [1], [0, 0, 1, 1], [], []>} : vector<256x128xbf16>, vector<128x128xbf16>, vector<256x128xf32> -> vector<256x128xf32>
    %c0_3 = arith.constant 0 : index
    %c0_4 = arith.constant 0 : index
    %4 = vector.load %arg3[%c0_3, %c0_4] : memref<256x128xf32, #tpu.memory_space<vmem>>, vector<256x128xf32>
    tpu.vector_store %arg3[%c0_3, %c0_4], %3 {strides = array<i32>} : memref<256x128xf32, #tpu.memory_space<vmem>>, vector<256x128xf32>,
    %cst_5 = arith.constant 0.000000e+00 : f32
    %5 = vector.broadcast %cst_5 : f32 to vector<8x128xf32>
    %c0_6 = arith.constant 0 : index
    %c0_7 = arith.constant 0 : index
    %6 = vector.load %arg4[%c0_6, %c0_7] : memref<8x128xf32, #tpu.memory_space<vmem>>, vector<8x128xf32>
    tpu.vector_store %arg4[%c0_6, %c0_7], %5 {strides = array<i32>} : memref<8x128xf32, #tpu.memory_space<vmem>>, vector<8x128xf32>,
    %cst_8 = arith.constant dense<0.000000e+00> : vector<128xf32>
    %7 = vector.multi_reduction <add>, %3, %cst_8 [0] : vector<256x128xf32> to vector<128xf32>
    %8 = vector.shape_cast %7 : vector<128xf32> to vector<1x128xf32>
    %c0_9 = arith.constant 0 : index
    %c0_10 = arith.constant 0 : index
    %9 = vector.load %arg4[%c0_9, %c0_10] : memref<8x128xf32, #tpu.memory_space<vmem>>, vector<1x128xf32>
    tpu.vector_store %arg4[%c0_9, %c0_10], %8 {strides = array<i32>} : memref<8x128xf32, #tpu.memory_space<vmem>>, vector<1x128xf32>,
    %10 = arith.mulf %3, %3 : vector<256x128xf32>
    %cst_11 = arith.constant dense<0.000000e+00> : vector<128xf32>
    %11 = vector.multi_reduction <add>, %10, %cst_11 [0] : vector<256x128xf32> to vector<128xf32>
    %12 = vector.shape_cast %11 : vector<128xf32> to vector<1x128xf32>
    %c1 = arith.constant 1 : index
    %c0_12 = arith.constant 0 : index
    %13 = vector.load %arg4[%c1, %c0_12] : memref<8x128xf32, #tpu.memory_space<vmem>>, vector<1x128xf32>
    tpu.vector_store %arg4[%c1, %c0_12], %12 {strides = array<i32>} : memref<8x128xf32, #tpu.memory_space<vmem>>, vector<1x128xf32>,
    return
  }
  func.func @transform_0(%arg0: i32) -> (i32, i32) {
    %c0_i32 = arith.constant 0 : i32
    %c0_i32_0 = arith.constant 0 : i32
    return %arg0, %c0_i32 : i32, i32
  }
  func.func @transform_1(%arg0: i32) -> (i32, i32) {
    %c0_i32 = arith.constant 0 : i32
    %c0_i32_0 = arith.constant 0 : i32
    %c0_i32_1 = arith.constant 0 : i32
    return %c0_i32, %c0_i32_0 : i32, i32
  }
  func.func @transform_2(%arg0: i32) -> (i32, i32) {
    %c0_i32 = arith.constant 0 : i32
    %c0_i32_0 = arith.constant 0 : i32
    return %arg0, %c0_i32 : i32, i32
  }
  func.func @transform_3(%arg0: i32) -> (i32, i32) {
    %c0_i32 = arith.constant 0 : i32
    %c0_i32_0 = arith.constant 0 : i32
    return %arg0, %c0_i32 : i32, i32
  }
}

module attributes {stable_mosaic.version = 11 : i64} {
  func.func @conv3x3_fused_kernel(%arg0: i32, %arg1: memref<1x16x16x128xf32, #tpu.memory_space<vmem>>, %arg2: memref<1x128xf32, #tpu.memory_space<vmem>>, %arg3: memref<1x128xf32, #tpu.memory_space<vmem>>, %arg4: memref<3x3x128x128xbf16, #tpu.memory_space<vmem>>, %arg5: memref<256x128xf32, #tpu.memory_space<vmem>>, %arg6: memref<8x128xf32, #tpu.memory_space<vmem>>, %arg7: memref<18x18x128xf32, #tpu.memory_space<vmem>>) attributes {dimension_semantics = [#tpu.dimension_semantics<parallel>], iteration_bounds = array<i64: 2>, scalar_prefetch = 0 : i64, scratch_operands = 1 : i64, tpu.core_type = #tpu.core_type<tc>, window_params = [{transform_indices = @transform_0, window_bounds = array<i64: 1, 16, 16, 128>}, {pipeline_mode = #tpu.pipeline_mode<synchronous>, transform_indices = @transform_1, window_bounds = array<i64: 1, 128>}, {pipeline_mode = #tpu.pipeline_mode<synchronous>, transform_indices = @transform_2, window_bounds = array<i64: 1, 128>}, {pipeline_mode = #tpu.pipeline_mode<synchronous>, transform_indices = @transform_3, window_bounds = array<i64: 3, 3, 128, 128>}, {transform_indices = @transform_4, window_bounds = array<i64: 256, 128>}, {transform_indices = @transform_5, window_bounds = array<i64: 8, 128>}]} {
    %c0 = arith.constant 0 : index
    %c0_0 = arith.constant 0 : index
    %c0_1 = arith.constant 0 : index
    %c0_2 = arith.constant 0 : index
    %0 = vector.load %arg1[%c0, %c0_0, %c0_1, %c0_2] : memref<1x16x16x128xf32, #tpu.memory_space<vmem>>, vector<1x16x16x128xf32>
    %1 = vector.shape_cast %0 : vector<1x16x16x128xf32> to vector<16x16x128xf32>
    %c0_3 = arith.constant 0 : index
    %c0_4 = arith.constant 0 : index
    %2 = vector.load %arg2[%c0_3, %c0_4] : memref<1x128xf32, #tpu.memory_space<vmem>>, vector<1x128xf32>
    %3 = vector.shape_cast %2 : vector<1x128xf32> to vector<1x1x128xf32>
    %4 = vector.broadcast %3 : vector<1x1x128xf32> to vector<16x16x128xf32>
    %5 = arith.mulf %1, %4 : vector<16x16x128xf32>
    %c0_5 = arith.constant 0 : index
    %c0_6 = arith.constant 0 : index
    %6 = vector.load %arg3[%c0_5, %c0_6] : memref<1x128xf32, #tpu.memory_space<vmem>>, vector<1x128xf32>
    %7 = vector.shape_cast %6 : vector<1x128xf32> to vector<1x1x128xf32>
    %8 = vector.broadcast %7 : vector<1x1x128xf32> to vector<16x16x128xf32>
    %9 = arith.addf %5, %8 : vector<16x16x128xf32>
    %cst = arith.constant 0.000000e+00 : f32
    %10 = vector.broadcast %cst : f32 to vector<16x16x128xf32>
    %11 = arith.subf %10, %9 : vector<16x16x128xf32>
    %12 = math.exp %11 : vector<16x16x128xf32>
    %cst_7 = arith.constant 1.000000e+00 : f32
    %13 = vector.broadcast %cst_7 : f32 to vector<16x16x128xf32>
    %14 = arith.addf %13, %12 : vector<16x16x128xf32>
    %cst_8 = arith.constant 1.000000e+00 : f32
    %15 = vector.broadcast %cst_8 : f32 to vector<16x16x128xf32>
    %16 = arith.divf %15, %14 : vector<16x16x128xf32>
    %17 = arith.mulf %9, %16 : vector<16x16x128xf32>
    %cst_9 = arith.constant 0.000000e+00 : f32
    %18 = vector.broadcast %cst_9 : f32 to vector<18x18x128xf32>
    %c0_10 = arith.constant 0 : index
    %c0_11 = arith.constant 0 : index
    %c0_12 = arith.constant 0 : index
    %19 = vector.load %arg7[%c0_10, %c0_11, %c0_12] : memref<18x18x128xf32, #tpu.memory_space<vmem>>, vector<18x18x128xf32>
    tpu.vector_store %arg7[%c0_10, %c0_11, %c0_12], %18 {strides = array<i32>} : memref<18x18x128xf32, #tpu.memory_space<vmem>>, vector<18x18x128xf32>,
    %c1 = arith.constant 1 : index
    %c1_13 = arith.constant 1 : index
    %c0_14 = arith.constant 0 : index
    %20 = vector.load %arg7[%c1, %c1_13, %c0_14] : memref<18x18x128xf32, #tpu.memory_space<vmem>>, vector<16x16x128xf32>
    tpu.vector_store %arg7[%c1, %c1_13, %c0_14], %17 {strides = array<i32>} : memref<18x18x128xf32, #tpu.memory_space<vmem>>, vector<16x16x128xf32>,
    %cst_15 = arith.constant 0.000000e+00 : f32
    %21 = vector.broadcast %cst_15 : f32 to vector<256x128xf32>
    %c0_16 = arith.constant 0 : index
    %c0_17 = arith.constant 0 : index
    %c0_18 = arith.constant 0 : index
    %22 = vector.load %arg7[%c0_16, %c0_17, %c0_18] : memref<18x18x128xf32, #tpu.memory_space<vmem>>, vector<16x16x128xf32>
    %23 = vector.shape_cast %22 : vector<16x16x128xf32> to vector<256x128xf32>
    %24 = arith.truncf %23 : vector<256x128xf32> to vector<256x128xbf16>
    %c0_19 = arith.constant 0 : index
    %c0_20 = arith.constant 0 : index
    %c0_21 = arith.constant 0 : index
    %c0_22 = arith.constant 0 : index
    %25 = vector.load %arg4[%c0_19, %c0_20, %c0_21, %c0_22] : memref<3x3x128x128xbf16, #tpu.memory_space<vmem>>, vector<1x1x128x128xbf16>
    %26 = vector.shape_cast %25 : vector<1x1x128x128xbf16> to vector<128x128xbf16>
    %cst_23 = arith.constant dense<0.000000e+00> : vector<256x128xf32>
    %27 = tpu.matmul %24, %26, %cst_23 {dimension_numbers = #tpu.dot_dimension_numbers<[1], [0], [0], [1], [0, 0, 1, 1], [], []>} : vector<256x128xbf16>, vector<128x128xbf16>, vector<256x128xf32> -> vector<256x128xf32>
    %28 = arith.addf %21, %27 : vector<256x128xf32>
    %c0_24 = arith.constant 0 : index
    %c1_25 = arith.constant 1 : index
    %c0_26 = arith.constant 0 : index
    %29 = vector.load %arg7[%c0_24, %c1_25, %c0_26] : memref<18x18x128xf32, #tpu.memory_space<vmem>>, vector<16x16x128xf32>
    %30 = vector.shape_cast %29 : vector<16x16x128xf32> to vector<256x128xf32>
    %31 = arith.truncf %30 : vector<256x128xf32> to vector<256x128xbf16>
    %c0_27 = arith.constant 0 : index
    %c1_28 = arith.constant 1 : index
    %c0_29 = arith.constant 0 : index
    %c0_30 = arith.constant 0 : index
    %32 = vector.load %arg4[%c0_27, %c1_28, %c0_29, %c0_30] : memref<3x3x128x128xbf16, #tpu.memory_space<vmem>>, vector<1x1x128x128xbf16>
    %33 = vector.shape_cast %32 : vector<1x1x128x128xbf16> to vector<128x128xbf16>
    %cst_31 = arith.constant dense<0.000000e+00> : vector<256x128xf32>
    %34 = tpu.matmul %31, %33, %cst_31 {dimension_numbers = #tpu.dot_dimension_numbers<[1], [0], [0], [1], [0, 0, 1, 1], [], []>} : vector<256x128xbf16>, vector<128x128xbf16>, vector<256x128xf32> -> vector<256x128xf32>
    %35 = arith.addf %28, %34 : vector<256x128xf32>
    %c0_32 = arith.constant 0 : index
    %c2 = arith.constant 2 : index
    %c0_33 = arith.constant 0 : index
    %36 = vector.load %arg7[%c0_32, %c2, %c0_33] : memref<18x18x128xf32, #tpu.memory_space<vmem>>, vector<16x16x128xf32>
    %37 = vector.shape_cast %36 : vector<16x16x128xf32> to vector<256x128xf32>
    %38 = arith.truncf %37 : vector<256x128xf32> to vector<256x128xbf16>
    %c0_34 = arith.constant 0 : index
    %c2_35 = arith.constant 2 : index
    %c0_36 = arith.constant 0 : index
    %c0_37 = arith.constant 0 : index
    %39 = vector.load %arg4[%c0_34, %c2_35, %c0_36, %c0_37] : memref<3x3x128x128xbf16, #tpu.memory_space<vmem>>, vector<1x1x128x128xbf16>
    %40 = vector.shape_cast %39 : vector<1x1x128x128xbf16> to vector<128x128xbf16>
    %cst_38 = arith.constant dense<0.000000e+00> : vector<256x128xf32>
    %41 = tpu.matmul %38, %40, %cst_38 {dimension_numbers = #tpu.dot_dimension_numbers<[1], [0], [0], [1], [0, 0, 1, 1], [], []>} : vector<256x128xbf16>, vector<128x128xbf16>, vector<256x128xf32> -> vector<256x128xf32>
    %42 = arith.addf %35, %41 : vector<256x128xf32>
    %c1_39 = arith.constant 1 : index
    %c0_40 = arith.constant 0 : index
    %c0_41 = arith.constant 0 : index
    %43 = vector.load %arg7[%c1_39, %c0_40, %c0_41] : memref<18x18x128xf32, #tpu.memory_space<vmem>>, vector<16x16x128xf32>
    %44 = vector.shape_cast %43 : vector<16x16x128xf32> to vector<256x128xf32>
    %45 = arith.truncf %44 : vector<256x128xf32> to vector<256x128xbf16>
    %c1_42 = arith.constant 1 : index
    %c0_43 = arith.constant 0 : index
    %c0_44 = arith.constant 0 : index
    %c0_45 = arith.constant 0 : index
    %46 = vector.load %arg4[%c1_42, %c0_43, %c0_44, %c0_45] : memref<3x3x128x128xbf16, #tpu.memory_space<vmem>>, vector<1x1x128x128xbf16>
    %47 = vector.shape_cast %46 : vector<1x1x128x128xbf16> to vector<128x128xbf16>
    %cst_46 = arith.constant dense<0.000000e+00> : vector<256x128xf32>
    %48 = tpu.matmul %45, %47, %cst_46 {dimension_numbers = #tpu.dot_dimension_numbers<[1], [0], [0], [1], [0, 0, 1, 1], [], []>} : vector<256x128xbf16>, vector<128x128xbf16>, vector<256x128xf32> -> vector<256x128xf32>
    %49 = arith.addf %42, %48 : vector<256x128xf32>
    %c1_47 = arith.constant 1 : index
    %c1_48 = arith.constant 1 : index
    %c0_49 = arith.constant 0 : index
    %50 = vector.load %arg7[%c1_47, %c1_48, %c0_49] : memref<18x18x128xf32, #tpu.memory_space<vmem>>, vector<16x16x128xf32>
    %51 = vector.shape_cast %50 : vector<16x16x128xf32> to vector<256x128xf32>
    %52 = arith.truncf %51 : vector<256x128xf32> to vector<256x128xbf16>
    %c1_50 = arith.constant 1 : index
    %c1_51 = arith.constant 1 : index
    %c0_52 = arith.constant 0 : index
    %c0_53 = arith.constant 0 : index
    %53 = vector.load %arg4[%c1_50, %c1_51, %c0_52, %c0_53] : memref<3x3x128x128xbf16, #tpu.memory_space<vmem>>, vector<1x1x128x128xbf16>
    %54 = vector.shape_cast %53 : vector<1x1x128x128xbf16> to vector<128x128xbf16>
    %cst_54 = arith.constant dense<0.000000e+00> : vector<256x128xf32>
    %55 = tpu.matmul %52, %54, %cst_54 {dimension_numbers = #tpu.dot_dimension_numbers<[1], [0], [0], [1], [0, 0, 1, 1], [], []>} : vector<256x128xbf16>, vector<128x128xbf16>, vector<256x128xf32> -> vector<256x128xf32>
    %56 = arith.addf %49, %55 : vector<256x128xf32>
    %c1_55 = arith.constant 1 : index
    %c2_56 = arith.constant 2 : index
    %c0_57 = arith.constant 0 : index
    %57 = vector.load %arg7[%c1_55, %c2_56, %c0_57] : memref<18x18x128xf32, #tpu.memory_space<vmem>>, vector<16x16x128xf32>
    %58 = vector.shape_cast %57 : vector<16x16x128xf32> to vector<256x128xf32>
    %59 = arith.truncf %58 : vector<256x128xf32> to vector<256x128xbf16>
    %c1_58 = arith.constant 1 : index
    %c2_59 = arith.constant 2 : index
    %c0_60 = arith.constant 0 : index
    %c0_61 = arith.constant 0 : index
    %60 = vector.load %arg4[%c1_58, %c2_59, %c0_60, %c0_61] : memref<3x3x128x128xbf16, #tpu.memory_space<vmem>>, vector<1x1x128x128xbf16>
    %61 = vector.shape_cast %60 : vector<1x1x128x128xbf16> to vector<128x128xbf16>
    %cst_62 = arith.constant dense<0.000000e+00> : vector<256x128xf32>
    %62 = tpu.matmul %59, %61, %cst_62 {dimension_numbers = #tpu.dot_dimension_numbers<[1], [0], [0], [1], [0, 0, 1, 1], [], []>} : vector<256x128xbf16>, vector<128x128xbf16>, vector<256x128xf32> -> vector<256x128xf32>
    %63 = arith.addf %56, %62 : vector<256x128xf32>
    %c2_63 = arith.constant 2 : index
    %c0_64 = arith.constant 0 : index
    %c0_65 = arith.constant 0 : index
    %64 = vector.load %arg7[%c2_63, %c0_64, %c0_65] : memref<18x18x128xf32, #tpu.memory_space<vmem>>, vector<16x16x128xf32>
    %65 = vector.shape_cast %64 : vector<16x16x128xf32> to vector<256x128xf32>
    %66 = arith.truncf %65 : vector<256x128xf32> to vector<256x128xbf16>
    %c2_66 = arith.constant 2 : index
    %c0_67 = arith.constant 0 : index
    %c0_68 = arith.constant 0 : index
    %c0_69 = arith.constant 0 : index
    %67 = vector.load %arg4[%c2_66, %c0_67, %c0_68, %c0_69] : memref<3x3x128x128xbf16, #tpu.memory_space<vmem>>, vector<1x1x128x128xbf16>
    %68 = vector.shape_cast %67 : vector<1x1x128x128xbf16> to vector<128x128xbf16>
    %cst_70 = arith.constant dense<0.000000e+00> : vector<256x128xf32>
    %69 = tpu.matmul %66, %68, %cst_70 {dimension_numbers = #tpu.dot_dimension_numbers<[1], [0], [0], [1], [0, 0, 1, 1], [], []>} : vector<256x128xbf16>, vector<128x128xbf16>, vector<256x128xf32> -> vector<256x128xf32>
    %70 = arith.addf %63, %69 : vector<256x128xf32>
    %c2_71 = arith.constant 2 : index
    %c1_72 = arith.constant 1 : index
    %c0_73 = arith.constant 0 : index
    %71 = vector.load %arg7[%c2_71, %c1_72, %c0_73] : memref<18x18x128xf32, #tpu.memory_space<vmem>>, vector<16x16x128xf32>
    %72 = vector.shape_cast %71 : vector<16x16x128xf32> to vector<256x128xf32>
    %73 = arith.truncf %72 : vector<256x128xf32> to vector<256x128xbf16>
    %c2_74 = arith.constant 2 : index
    %c1_75 = arith.constant 1 : index
    %c0_76 = arith.constant 0 : index
    %c0_77 = arith.constant 0 : index
    %74 = vector.load %arg4[%c2_74, %c1_75, %c0_76, %c0_77] : memref<3x3x128x128xbf16, #tpu.memory_space<vmem>>, vector<1x1x128x128xbf16>
    %75 = vector.shape_cast %74 : vector<1x1x128x128xbf16> to vector<128x128xbf16>
    %cst_78 = arith.constant dense<0.000000e+00> : vector<256x128xf32>
    %76 = tpu.matmul %73, %75, %cst_78 {dimension_numbers = #tpu.dot_dimension_numbers<[1], [0], [0], [1], [0, 0, 1, 1], [], []>} : vector<256x128xbf16>, vector<128x128xbf16>, vector<256x128xf32> -> vector<256x128xf32>
    %77 = arith.addf %70, %76 : vector<256x128xf32>
    %c2_79 = arith.constant 2 : index
    %c2_80 = arith.constant 2 : index
    %c0_81 = arith.constant 0 : index
    %78 = vector.load %arg7[%c2_79, %c2_80, %c0_81] : memref<18x18x128xf32, #tpu.memory_space<vmem>>, vector<16x16x128xf32>
    %79 = vector.shape_cast %78 : vector<16x16x128xf32> to vector<256x128xf32>
    %80 = arith.truncf %79 : vector<256x128xf32> to vector<256x128xbf16>
    %c2_82 = arith.constant 2 : index
    %c2_83 = arith.constant 2 : index
    %c0_84 = arith.constant 0 : index
    %c0_85 = arith.constant 0 : index
    %81 = vector.load %arg4[%c2_82, %c2_83, %c0_84, %c0_85] : memref<3x3x128x128xbf16, #tpu.memory_space<vmem>>, vector<1x1x128x128xbf16>
    %82 = vector.shape_cast %81 : vector<1x1x128x128xbf16> to vector<128x128xbf16>
    %cst_86 = arith.constant dense<0.000000e+00> : vector<256x128xf32>
    %83 = tpu.matmul %80, %82, %cst_86 {dimension_numbers = #tpu.dot_dimension_numbers<[1], [0], [0], [1], [0, 0, 1, 1], [], []>} : vector<256x128xbf16>, vector<128x128xbf16>, vector<256x128xf32> -> vector<256x128xf32>
    %84 = arith.addf %77, %83 : vector<256x128xf32>
    %c0_87 = arith.constant 0 : index
    %c0_88 = arith.constant 0 : index
    %85 = vector.load %arg5[%c0_87, %c0_88] : memref<256x128xf32, #tpu.memory_space<vmem>>, vector<256x128xf32>
    tpu.vector_store %arg5[%c0_87, %c0_88], %84 {strides = array<i32>} : memref<256x128xf32, #tpu.memory_space<vmem>>, vector<256x128xf32>,
    %cst_89 = arith.constant 0.000000e+00 : f32
    %86 = vector.broadcast %cst_89 : f32 to vector<8x128xf32>
    %c0_90 = arith.constant 0 : index
    %c0_91 = arith.constant 0 : index
    %87 = vector.load %arg6[%c0_90, %c0_91] : memref<8x128xf32, #tpu.memory_space<vmem>>, vector<8x128xf32>
    tpu.vector_store %arg6[%c0_90, %c0_91], %86 {strides = array<i32>} : memref<8x128xf32, #tpu.memory_space<vmem>>, vector<8x128xf32>,
    %cst_92 = arith.constant dense<0.000000e+00> : vector<128xf32>
    %88 = vector.multi_reduction <add>, %84, %cst_92 [0] : vector<256x128xf32> to vector<128xf32>
    %89 = vector.shape_cast %88 : vector<128xf32> to vector<1x128xf32>
    %c0_93 = arith.constant 0 : index
    %c0_94 = arith.constant 0 : index
    %90 = vector.load %arg6[%c0_93, %c0_94] : memref<8x128xf32, #tpu.memory_space<vmem>>, vector<1x128xf32>
    tpu.vector_store %arg6[%c0_93, %c0_94], %89 {strides = array<i32>} : memref<8x128xf32, #tpu.memory_space<vmem>>, vector<1x128xf32>,
    %91 = arith.mulf %84, %84 : vector<256x128xf32>
    %cst_95 = arith.constant dense<0.000000e+00> : vector<128xf32>
    %92 = vector.multi_reduction <add>, %91, %cst_95 [0] : vector<256x128xf32> to vector<128xf32>
    %93 = vector.shape_cast %92 : vector<128xf32> to vector<1x128xf32>
    %c1_96 = arith.constant 1 : index
    %c0_97 = arith.constant 0 : index
    %94 = vector.load %arg6[%c1_96, %c0_97] : memref<8x128xf32, #tpu.memory_space<vmem>>, vector<1x128xf32>
    tpu.vector_store %arg6[%c1_96, %c0_97], %93 {strides = array<i32>} : memref<8x128xf32, #tpu.memory_space<vmem>>, vector<1x128xf32>,
    return
  }
  func.func @transform_0(%arg0: i32) -> (i32, i32, i32, i32) {
    %c0_i32 = arith.constant 0 : i32
    %c0_i32_0 = arith.constant 0 : i32
    %c0_i32_1 = arith.constant 0 : i32
    %c0_i32_2 = arith.constant 0 : i32
    return %arg0, %c0_i32, %c0_i32_0, %c0_i32_1 : i32, i32, i32, i32
  }
  func.func @transform_1(%arg0: i32) -> (i32, i32) {
    %c0_i32 = arith.constant 0 : i32
    %c0_i32_0 = arith.constant 0 : i32
    %c0_i32_1 = arith.constant 0 : i32
    return %c0_i32, %c0_i32_0 : i32, i32
  }
  func.func @transform_2(%arg0: i32) -> (i32, i32) {
    %c0_i32 = arith.constant 0 : i32
    %c0_i32_0 = arith.constant 0 : i32
    %c0_i32_1 = arith.constant 0 : i32
    return %c0_i32, %c0_i32_0 : i32, i32
  }
  func.func @transform_3(%arg0: i32) -> (i32, i32, i32, i32) {
    %c0_i32 = arith.constant 0 : i32
    %c0_i32_0 = arith.constant 0 : i32
    %c0_i32_1 = arith.constant 0 : i32
    %c0_i32_2 = arith.constant 0 : i32
    %c0_i32_3 = arith.constant 0 : i32
    return %c0_i32, %c0_i32_0, %c0_i32_1, %c0_i32_2 : i32, i32, i32, i32
  }
  func.func @transform_4(%arg0: i32) -> (i32, i32) {
    %c0_i32 = arith.constant 0 : i32
    %c0_i32_0 = arith.constant 0 : i32
    return %arg0, %c0_i32 : i32, i32
  }
  func.func @transform_5(%arg0: i32) -> (i32, i32) {
    %c0_i32 = arith.constant 0 : i32
    %c0_i32_0 = arith.constant 0 : i32
    return %arg0, %c0_i32 : i32, i32
  }
}

module attributes {stable_mosaic.version = 11 : i64} {
  func.func @bnsilu_matmul_stats_kernel(%arg0: i32, %arg1: memref<256x128xf32, #tpu.memory_space<vmem>>, %arg2: memref<1x128xf32, #tpu.memory_space<vmem>>, %arg3: memref<1x128xf32, #tpu.memory_space<vmem>>, %arg4: memref<128x128xbf16, #tpu.memory_space<vmem>>, %arg5: memref<256x128xf32, #tpu.memory_space<vmem>>, %arg6: memref<8x128xf32, #tpu.memory_space<vmem>>) attributes {dimension_semantics = [#tpu.dimension_semantics<parallel>], iteration_bounds = array<i64: 2>, scalar_prefetch = 0 : i64, scratch_operands = 0 : i64, tpu.core_type = #tpu.core_type<tc>, window_params = [{transform_indices = @transform_0, window_bounds = array<i64: 256, 128>}, {pipeline_mode = #tpu.pipeline_mode<synchronous>, transform_indices = @transform_1, window_bounds = array<i64: 1, 128>}, {pipeline_mode = #tpu.pipeline_mode<synchronous>, transform_indices = @transform_2, window_bounds = array<i64: 1, 128>}, {pipeline_mode = #tpu.pipeline_mode<synchronous>, transform_indices = @transform_3, window_bounds = array<i64: 128, 128>}, {transform_indices = @transform_4, window_bounds = array<i64: 256, 128>}, {transform_indices = @transform_5, window_bounds = array<i64: 8, 128>}]} {
    %c0 = arith.constant 0 : index
    %c0_0 = arith.constant 0 : index
    %0 = vector.load %arg1[%c0, %c0_0] : memref<256x128xf32, #tpu.memory_space<vmem>>, vector<256x128xf32>
    %c0_1 = arith.constant 0 : index
    %c0_2 = arith.constant 0 : index
    %1 = vector.load %arg2[%c0_1, %c0_2] : memref<1x128xf32, #tpu.memory_space<vmem>>, vector<1x128xf32>
    %2 = vector.broadcast %1 : vector<1x128xf32> to vector<256x128xf32>
    %3 = arith.mulf %0, %2 : vector<256x128xf32>
    %c0_3 = arith.constant 0 : index
    %c0_4 = arith.constant 0 : index
    %4 = vector.load %arg3[%c0_3, %c0_4] : memref<1x128xf32, #tpu.memory_space<vmem>>, vector<1x128xf32>
    %5 = vector.broadcast %4 : vector<1x128xf32> to vector<256x128xf32>
    %6 = arith.addf %3, %5 : vector<256x128xf32>
    %cst = arith.constant 0.000000e+00 : f32
    %7 = vector.broadcast %cst : f32 to vector<256x128xf32>
    %8 = arith.subf %7, %6 : vector<256x128xf32>
    %9 = math.exp %8 : vector<256x128xf32>
    %cst_5 = arith.constant 1.000000e+00 : f32
    %10 = vector.broadcast %cst_5 : f32 to vector<256x128xf32>
    %11 = arith.addf %10, %9 : vector<256x128xf32>
    %cst_6 = arith.constant 1.000000e+00 : f32
    %12 = vector.broadcast %cst_6 : f32 to vector<256x128xf32>
    %13 = arith.divf %12, %11 : vector<256x128xf32>
    %14 = arith.mulf %6, %13 : vector<256x128xf32>
    %15 = arith.truncf %14 : vector<256x128xf32> to vector<256x128xbf16>
    %c0_7 = arith.constant 0 : index
    %c0_8 = arith.constant 0 : index
    %16 = vector.load %arg4[%c0_7, %c0_8] : memref<128x128xbf16, #tpu.memory_space<vmem>>, vector<128x128xbf16>
    %cst_9 = arith.constant dense<0.000000e+00> : vector<256x128xf32>
    %17 = tpu.matmul %15, %16, %cst_9 {dimension_numbers = #tpu.dot_dimension_numbers<[1], [0], [0], [1], [0, 0, 1, 1], [], []>} : vector<256x128xbf16>, vector<128x128xbf16>, vector<256x128xf32> -> vector<256x128xf32>
    %c0_10 = arith.constant 0 : index
    %c0_11 = arith.constant 0 : index
    %18 = vector.load %arg5[%c0_10, %c0_11] : memref<256x128xf32, #tpu.memory_space<vmem>>, vector<256x128xf32>
    tpu.vector_store %arg5[%c0_10, %c0_11], %17 {strides = array<i32>} : memref<256x128xf32, #tpu.memory_space<vmem>>, vector<256x128xf32>,
    %cst_12 = arith.constant 0.000000e+00 : f32
    %19 = vector.broadcast %cst_12 : f32 to vector<8x128xf32>
    %c0_13 = arith.constant 0 : index
    %c0_14 = arith.constant 0 : index
    %20 = vector.load %arg6[%c0_13, %c0_14] : memref<8x128xf32, #tpu.memory_space<vmem>>, vector<8x128xf32>
    tpu.vector_store %arg6[%c0_13, %c0_14], %19 {strides = array<i32>} : memref<8x128xf32, #tpu.memory_space<vmem>>, vector<8x128xf32>,
    %cst_15 = arith.constant dense<0.000000e+00> : vector<128xf32>
    %21 = vector.multi_reduction <add>, %17, %cst_15 [0] : vector<256x128xf32> to vector<128xf32>
    %22 = vector.shape_cast %21 : vector<128xf32> to vector<1x128xf32>
    %c0_16 = arith.constant 0 : index
    %c0_17 = arith.constant 0 : index
    %23 = vector.load %arg6[%c0_16, %c0_17] : memref<8x128xf32, #tpu.memory_space<vmem>>, vector<1x128xf32>
    tpu.vector_store %arg6[%c0_16, %c0_17], %22 {strides = array<i32>} : memref<8x128xf32, #tpu.memory_space<vmem>>, vector<1x128xf32>,
    %24 = arith.mulf %17, %17 : vector<256x128xf32>
    %cst_18 = arith.constant dense<0.000000e+00> : vector<128xf32>
    %25 = vector.multi_reduction <add>, %24, %cst_18 [0] : vector<256x128xf32> to vector<128xf32>
    %26 = vector.shape_cast %25 : vector<128xf32> to vector<1x128xf32>
    %c1 = arith.constant 1 : index
    %c0_19 = arith.constant 0 : index
    %27 = vector.load %arg6[%c1, %c0_19] : memref<8x128xf32, #tpu.memory_space<vmem>>, vector<1x128xf32>
    tpu.vector_store %arg6[%c1, %c0_19], %26 {strides = array<i32>} : memref<8x128xf32, #tpu.memory_space<vmem>>, vector<1x128xf32>,
    return
  }
  func.func @transform_0(%arg0: i32) -> (i32, i32) {
    %c0_i32 = arith.constant 0 : i32
    %c0_i32_0 = arith.constant 0 : i32
    return %arg0, %c0_i32 : i32, i32
  }
  func.func @transform_1(%arg0: i32) -> (i32, i32) {
    %c0_i32 = arith.constant 0 : i32
    %c0_i32_0 = arith.constant 0 : i32
    %c0_i32_1 = arith.constant 0 : i32
    return %c0_i32, %c0_i32_0 : i32, i32
  }
  func.func @transform_2(%arg0: i32) -> (i32, i32) {
    %c0_i32 = arith.constant 0 : i32
    %c0_i32_0 = arith.constant 0 : i32
    %c0_i32_1 = arith.constant 0 : i32
    return %c0_i32, %c0_i32_0 : i32, i32
  }
  func.func @transform_3(%arg0: i32) -> (i32, i32) {
    %c0_i32 = arith.constant 0 : i32
    %c0_i32_0 = arith.constant 0 : i32
    %c0_i32_1 = arith.constant 0 : i32
    return %c0_i32, %c0_i32_0 : i32, i32
  }
  func.func @transform_4(%arg0: i32) -> (i32, i32) {
    %c0_i32 = arith.constant 0 : i32
    %c0_i32_0 = arith.constant 0 : i32
    return %arg0, %c0_i32 : i32, i32
  }
  func.func @transform_5(%arg0: i32) -> (i32, i32) {
    %c0_i32 = arith.constant 0 : i32
    %c0_i32_0 = arith.constant 0 : i32
    return %arg0, %c0_i32 : i32, i32
  }
}

module attributes {stable_mosaic.version = 11 : i64} {
  func.func @bnsilu_res_kernel(%arg0: i32, %arg1: memref<256x128xf32, #tpu.memory_space<vmem>>, %arg2: memref<1x128xf32, #tpu.memory_space<vmem>>, %arg3: memref<1x128xf32, #tpu.memory_space<vmem>>, %arg4: memref<256x128xf32, #tpu.memory_space<vmem>>, %arg5: memref<256x128xf32, #tpu.memory_space<vmem>>) attributes {dimension_semantics = [#tpu.dimension_semantics<parallel>], iteration_bounds = array<i64: 2>, scalar_prefetch = 0 : i64, scratch_operands = 0 : i64, tpu.core_type = #tpu.core_type<tc>, window_params = [{transform_indices = @transform_0, window_bounds = array<i64: 256, 128>}, {pipeline_mode = #tpu.pipeline_mode<synchronous>, transform_indices = @transform_1, window_bounds = array<i64: 1, 128>}, {pipeline_mode = #tpu.pipeline_mode<synchronous>, transform_indices = @transform_2, window_bounds = array<i64: 1, 128>}, {transform_indices = @transform_3, window_bounds = array<i64: 256, 128>}, {transform_indices = @transform_4, window_bounds = array<i64: 256, 128>}]} {
    %c0 = arith.constant 0 : index
    %c0_0 = arith.constant 0 : index
    %0 = vector.load %arg1[%c0, %c0_0] : memref<256x128xf32, #tpu.memory_space<vmem>>, vector<256x128xf32>
    %c0_1 = arith.constant 0 : index
    %c0_2 = arith.constant 0 : index
    %1 = vector.load %arg2[%c0_1, %c0_2] : memref<1x128xf32, #tpu.memory_space<vmem>>, vector<1x128xf32>
    %2 = vector.broadcast %1 : vector<1x128xf32> to vector<256x128xf32>
    %3 = arith.mulf %0, %2 : vector<256x128xf32>
    %c0_3 = arith.constant 0 : index
    %c0_4 = arith.constant 0 : index
    %4 = vector.load %arg3[%c0_3, %c0_4] : memref<1x128xf32, #tpu.memory_space<vmem>>, vector<1x128xf32>
    %5 = vector.broadcast %4 : vector<1x128xf32> to vector<256x128xf32>
    %6 = arith.addf %3, %5 : vector<256x128xf32>
    %cst = arith.constant 0.000000e+00 : f32
    %7 = vector.broadcast %cst : f32 to vector<256x128xf32>
    %8 = arith.subf %7, %6 : vector<256x128xf32>
    %9 = math.exp %8 : vector<256x128xf32>
    %cst_5 = arith.constant 1.000000e+00 : f32
    %10 = vector.broadcast %cst_5 : f32 to vector<256x128xf32>
    %11 = arith.addf %10, %9 : vector<256x128xf32>
    %cst_6 = arith.constant 1.000000e+00 : f32
    %12 = vector.broadcast %cst_6 : f32 to vector<256x128xf32>
    %13 = arith.divf %12, %11 : vector<256x128xf32>
    %14 = arith.mulf %6, %13 : vector<256x128xf32>
    %c0_7 = arith.constant 0 : index
    %c0_8 = arith.constant 0 : index
    %15 = vector.load %arg4[%c0_7, %c0_8] : memref<256x128xf32, #tpu.memory_space<vmem>>, vector<256x128xf32>
    %16 = arith.addf %14, %15 : vector<256x128xf32>
    %c0_9 = arith.constant 0 : index
    %c0_10 = arith.constant 0 : index
    %17 = vector.load %arg5[%c0_9, %c0_10] : memref<256x128xf32, #tpu.memory_space<vmem>>, vector<256x128xf32>
    tpu.vector_store %arg5[%c0_9, %c0_10], %16 {strides = array<i32>} : memref<256x128xf32, #tpu.memory_space<vmem>>, vector<256x128xf32>,
    return
  }
  func.func @transform_0(%arg0: i32) -> (i32, i32) {
    %c0_i32 = arith.constant 0 : i32
    %c0_i32_0 = arith.constant 0 : i32
    return %arg0, %c0_i32 : i32, i32
  }
  func.func @transform_1(%arg0: i32) -> (i32, i32) {
    %c0_i32 = arith.constant 0 : i32
    %c0_i32_0 = arith.constant 0 : i32
    %c0_i32_1 = arith.constant 0 : i32
    return %c0_i32, %c0_i32_0 : i32, i32
  }
  func.func @transform_2(%arg0: i32) -> (i32, i32) {
    %c0_i32 = arith.constant 0 : i32
    %c0_i32_0 = arith.constant 0 : i32
    %c0_i32_1 = arith.constant 0 : i32
    return %c0_i32, %c0_i32_0 : i32, i32
  }
  func.func @transform_3(%arg0: i32) -> (i32, i32) {
    %c0_i32 = arith.constant 0 : i32
    %c0_i32_0 = arith.constant 0 : i32
    return %arg0, %c0_i32 : i32, i32
  }
  func.func @transform_4(%arg0: i32) -> (i32, i32) {
    %c0_i32 = arith.constant 0 : i32
    %c0_i32_0 = arith.constant 0 : i32
    return %arg0, %c0_i32 : i32, i32
  }
}

</mosaic_0001>

<bundles_post_ra>
// kernel: res_unit_n_forward.5
= control target key start
LH: loop header
LB: loop body
LE: loop exit
PB: predicated region body
PF: predicated region fallthrough
CT: control target
= control target key end

     0   :  { %s841_s12 = smov 0   ;;  %s1048_s0 = inlined_call_operand.vmem [shape: f32[512,128], index: 0, kind: input, shape index: {}]   ;;  %s1049_s1 = inlined_call_operand.vmem [shape: bf16[128,128], index: 1, kind: input, shape index: {}]   ;;  %s1050_s2 = inlined_call_operand.vmem [shape: f32[512,128], index: 2, kind: output, shape index: {0}]   ;;  %s1051_s3 = inlined_call_operand.vmem [shape: f32[16,128], index: 3, kind: output, shape index: {1}]  }
   0x1 LB: > { %s847_s13 = sadd.s32 4294967295, %s818_s12   ;;  %p691_p0 = scmp.ge.s32.totalorder %s818_s12, 1  ;;  %s818_s12 = sphi %s841_s12, %s14_s12  }
   0x2   : > { %p141_p1 = scmp.lt.s32.totalorder %s818_s12, 3 }
   0x4   : > { %p142_p2 = pnand %p691_p0, %p141_p1 }
   0x5   : > { %s692_s16 = sshll.u32 (!%p142_p2), %s847_s13, 5  ;;  %p181_p4 = scmp.lt.s32.totalorder (!%p142_p2), %s847_s13, 1 }
   0x6   : > { %145 = sbr.rel (%p142_p2) target bundleno = 320 (0x140), region = 28  ;;  %p170_p3 = scmp.lt.s32.totalorder (!%p142_p2), %s692_s16, 63 }
   0xb   : > { %v804_v0 = vld [vmem:[%s1049_s1 + $0x38] sm:$0xff]   ;;  %v805_v1 = vld [vmem:[%s1049_s1 + $0x30] sm:$0xff]   ;;  %s1053_s16 = smov (!%p170_p3, %s692_s16), 63  ;;  %v806_v2 = vld [vmem:[%s1049_s1 + $0x28] sm:$0xff]   ;;  %s1055_s13 = smov (!%p181_p4, %s847_s13), 1  ;;  %v820_v56 = vmov 0.0  }
   0xc   : > { %731 = vmatprep.subr.bf16.mxu0 %v804_v0  ;;  %779 = vmatprep.subr.bf16.mxu1 %v804_v0  ;;  %s693_s21 = sshll.u32 %s1053_s16, 3  ;;  %v807_v3 = vld [vmem:[%s1049_s1 + $0x20] sm:$0xff]   ;;  %v808_v7 = vld [vmem:[%s1049_s1 + $0x18] sm:$0xff]   ;;  %v809_v11 = vld [vmem:[%s1049_s1 + $0x10] sm:$0xff]   ;;  %s696_s8 = sshll.u32 %s1055_s13, 3 }
   0xd   : > { %732 = vmatpush3.bf16.msra.mxu0 %v804_v0  ;;  %787 = vmatpush3.bf16.msra.mxu1 %v804_v0  ;;  %s869_s24 = scalar_lea.vmem %s1048_s0, %s693_s21  ;;  %v810_v12 = vld [vmem:[%s1049_s1 + $0x8] sm:$0xff]   ;;  %v811_v13 = vld [vmem:[%s1049_s1] sm:$0xff]   ;;  %s923_s11 = scalar_lea.vmem %s1051_s3, %s696_s8 }
   0xe   : > { %733 = vmatprep.subr.bf16.mxu0 %v805_v1  ;;  %780 = vmatprep.subr.bf16.mxu1 %v805_v1  ;;  %v186_v4 = vld [vmem:[%s869_s24] sm:$0xff]  ;;  %v187_v5 = vld [vmem:[%s869_s24 + $0x8] sm:$0xff]  ;;  %v188_v14 = vld [vmem:[%s869_s24 + $0x10] sm:$0xff]  ;;  %491 = vst [vmem:[%s923_s11] sm:$0xff] %v820_v56  ;;  %s931_s17 = scalar_lea.vmem %s1050_s2, %s693_s21 }
   0xf   : > { %v218_v6 = vpack.c.bf16 %v187_v5, %v186_v4  ;;  %v202_v8 = vld [vmem:[%s869_s24 + $0x80] sm:$0xff]  ;;  %v203_v9 = vld [vmem:[%s869_s24 + $0x88] sm:$0xff]  ;;  %v189_v15 = vld [vmem:[%s869_s24 + $0x18] sm:$0xff] }
  0x10   : > { %v226_v10 = vpack.c.bf16 %v203_v9, %v202_v8  ;;  %v190_v16 = vld [vmem:[%s869_s24 + $0x20] sm:$0xff]  ;;  %v191_v17 = vld [vmem:[%s869_s24 + $0x28] sm:$0xff]  ;;  %v204_v18 = vld [vmem:[%s869_s24 + $0x90] sm:$0xff]  ;;  %v219_v22 = vpack.c.bf16 %v189_v15, %v188_v14 }
  0x11   : > { %734 = vmatpush3.bf16.msra.mxu0 %v805_v1  ;;  %788 = vmatpush3.bf16.msra.mxu1 %v805_v1  ;;  %v205_v19 = vld [vmem:[%s869_s24 + $0x98] sm:$0xff]  ;;  %v206_v20 = vld [vmem:[%s869_s24 + $0xa0] sm:$0xff]  ;;  %v207_v21 = vld [vmem:[%s869_s24 + $0xa8] sm:$0xff]  ;;  %v220_v23 = vpack.c.bf16 %v191_v17, %v190_v16 }
  0x12   : > { %735 = vmatprep.subr.bf16.mxu0 %v806_v2  ;;  %781 = vmatprep.subr.bf16.mxu1 %v806_v2  ;;  %v227_v24 = vpack.c.bf16 %v205_v19, %v204_v18  ;;  %v228_v25 = vpack.c.bf16 %v207_v21, %v206_v20  ;;  %v192_v26 = vld [vmem:[%s869_s24 + $0x30] sm:$0xff]  ;;  %v193_v27 = vld [vmem:[%s869_s24 + $0x38] sm:$0xff]  ;;  %v194_v28 = vld [vmem:[%s869_s24 + $0x40] sm:$0xff] }
  0x13   : > { %747 = vmatprep.mubr.bf16.mxu0 %v218_v6  ;;  %763 = vmatprep.mubr.bf16.mxu1 %v226_v10  ;;  %v195_v29 = vld [vmem:[%s869_s24 + $0x48] sm:$0xff]  ;;  %v208_v30 = vld [vmem:[%s869_s24 + $0xb0] sm:$0xff]  ;;  %v209_v31 = vld [vmem:[%s869_s24 + $0xb8] sm:$0xff]  ;;  %v221_v34 = vpack.c.bf16 %v193_v27, %v192_v26 }
  0x14   : > { %v210_v32 = vld [vmem:[%s869_s24 + $0xc0] sm:$0xff]  ;;  %v211_v33 = vld [vmem:[%s869_s24 + $0xc8] sm:$0xff]  ;;  %v222_v35 = vpack.c.bf16 %v195_v29, %v194_v28  ;;  %v229_v36 = vpack.c.bf16 %v209_v31, %v208_v30  ;;  %v196_v38 = vld [vmem:[%s869_s24 + $0x50] sm:$0xff] }
  0x15   : > { %736 = vmatpush3.bf16.msra.mxu0 %v806_v2  ;;  %789 = vmatpush3.bf16.msra.mxu1 %v806_v2  ;;  %v230_v37 = vpack.c.bf16 %v211_v33, %v210_v32  ;;  %v197_v39 = vld [vmem:[%s869_s24 + $0x58] sm:$0xff]  ;;  %v198_v40 = vld [vmem:[%s869_s24 + $0x60] sm:$0xff]  ;;  %v199_v41 = vld [vmem:[%s869_s24 + $0x68] sm:$0xff] }
  0x16   : > { %737 = vmatprep.subr.bf16.mxu0 %v807_v3  ;;  %782 = vmatprep.subr.bf16.mxu1 %v807_v3  ;;  %v212_v42 = vld [vmem:[%s869_s24 + $0xd0] sm:$0xff]  ;;  %v213_v43 = vld [vmem:[%s869_s24 + $0xd8] sm:$0xff]  ;;  %v214_v44 = vld [vmem:[%s869_s24 + $0xe0] sm:$0xff]  ;;  %v223_v46 = vpack.c.bf16 %v197_v39, %v196_v38  ;;  %v224_v47 = vpack.c.bf16 %v199_v41, %v198_v40 }
  0x17   : > { %v215_v45 = vld [vmem:[%s869_s24 + $0xe8] sm:$0xff]  ;;  %v231_v48 = vpack.c.bf16 %v213_v43, %v212_v42  ;;  %v200_v50 = vld [vmem:[%s869_s24 + $0x70] sm:$0xff]  ;;  %v201_v51 = vld [vmem:[%s869_s24 + $0x78] sm:$0xff] }
  0x18   : > { %v232_v49 = vpack.c.bf16 %v215_v45, %v214_v44  ;;  %v216_v52 = vld [vmem:[%s869_s24 + $0xf0] sm:$0xff]  ;;  %v217_v53 = vld [vmem:[%s869_s24 + $0xf8] sm:$0xff]  ;;  %v225_v54 = vpack.c.bf16 %v201_v51, %v200_v50 }
  0x19   : > { %738 = vmatpush3.bf16.msra.mxu0 %v807_v3  ;;  %790 = vmatpush3.bf16.msra.mxu1 %v807_v3  ;;  %v233_v55 = vpack.c.bf16 %v217_v53, %v216_v52 }
  0x1a   : > { %739 = vmatprep.subr.bf16.mxu0 %v808_v7  ;;  %783 = vmatprep.subr.bf16.mxu1 %v808_v7 }
  0x1d   : > { %740 = vmatpush3.bf16.msra.mxu0 %v808_v7  ;;  %791 = vmatpush3.bf16.msra.mxu1 %v808_v7 }
  0x1e   : > { %741 = vmatprep.subr.bf16.mxu0 %v809_v11  ;;  %784 = vmatprep.subr.bf16.mxu1 %v809_v11 }
  0x21   : > { %742 = vmatpush3.bf16.msra.mxu0 %v809_v11  ;;  %792 = vmatpush3.bf16.msra.mxu1 %v809_v11 }
  0x22   : > { %743 = vmatprep.subr.bf16.mxu0 %v810_v12  ;;  %785 = vmatprep.subr.bf16.mxu1 %v810_v12 }
  0x25   : > { %744 = vmatpush3.bf16.msra.mxu0 %v810_v12  ;;  %793 = vmatpush3.bf16.msra.mxu1 %v810_v12 }
  0x26   : > { %745 = vmatprep.subr.bf16.mxu0 %v811_v13  ;;  %786 = vmatprep.subr.bf16.mxu1 %v811_v13 }
  0x29   : > { %746 = vmatpush3.bf16.msra.mxu0 %v811_v13  ;;  %794 = vmatpush3.bf16.msra.mxu1 %v811_v13 }
  0x2c   : > { %748 = vmatmul.mubr.bf16.vlgmr.msra.gmra.mxu0 %v219_v22  ;;  %764 = vmatmul.mubr.bf16.vlgmr.msra.gmra.mxu1 %v227_v24 }
  0x2d   : > { %751 = vmatprep.mubr.bf16.mxu0 %v220_v23  ;;  %767 = vmatprep.mubr.bf16.mxu1 %v228_v25 }
  0x34   : > { %752 = vmatmul.mubr.bf16.gmra.mxu0 %v221_v34  ;;  %768 = vmatmul.mubr.bf16.gmra.mxu1 %v229_v36 }
  0x35   : > { %755 = vmatprep.mubr.bf16.mxu0 %v222_v35  ;;  %771 = vmatprep.mubr.bf16.mxu1 %v230_v37 }
  0x3c   : > { %756 = vmatmul.mubr.bf16.gmra.mxu0 %v223_v46  ;;  %772 = vmatmul.mubr.bf16.gmra.mxu1 %v231_v48 }
  0x3d   : > { %759 = vmatprep.mubr.bf16.mxu0 %v224_v47  ;;  %775 = vmatprep.mubr.bf16.mxu1 %v232_v49 }
  0x44   : > { %760 = vmatmul.mubr.bf16.gmra.mxu0 %v225_v54  ;;  %776 = vmatmul.mubr.bf16.gmra.mxu1 %v233_v55 }
  0xec   : > { %v749_v57 = vpop.f32.mrf.mxu0  ;;  %v934_v58 = vpop.f32.mrf.mxu1 }
  0xed   : > { %461 = vst [vmem:[%s931_s17 + $0x10] sm:$0xff] %v749_v57  ;;  %477 = vst [vmem:[%s931_s17 + $0x90] sm:$0xff] %v934_v58  ;;  %v532_v5 = vmul.f32 %v749_v57, %v749_v57 }
  0xee   : > { %v332_v59 = vpop.f32.mrf.mxu0  ;;  %v939_v60 = vpop.f32.mrf.mxu1 }
  0xef   : > { %459 = vst [vmem:[%s931_s17] sm:$0xff] %v332_v59  ;;  %475 = vst [vmem:[%s931_s17 + $0x80] sm:$0xff] %v939_v60  ;;  %v530_v0 = vmul.f32 %v332_v59, %v332_v59 }
  0xf0   : > { %v750_v61 = vpop.f32.mrf.mxu0  ;;  %v944_v62 = vpop.f32.mrf.mxu1 }
  0xf1   : > { %462 = vst [vmem:[%s931_s17 + $0x18] sm:$0xff] %v750_v61  ;;  %478 = vst [vmem:[%s931_s17 + $0x98] sm:$0xff] %v944_v62  ;;  %v533_v10 = vmul.f32 %v750_v61, %v750_v61 }
  0xf2   : > { %v335_v63 = vpop.f32.mrf.mxu0  ;;  %v949_v3 = vpop.f32.mrf.mxu1 }
  0xf3   : > { %460 = vst [vmem:[%s931_s17 + $0x8] sm:$0xff] %v335_v63  ;;  %v492_v1 = vadd.f32 %v335_v63, %v332_v59  ;;  %v531_v2 = vmul.f32 %v335_v63, %v335_v63  ;;  %476 = vst [vmem:[%s931_s17 + $0x88] sm:$0xff] %v949_v3 }
  0xf4   : > { %v753_v4 = vpop.f32.mrf.mxu0  ;;  %v954_v8 = vpop.f32.mrf.mxu1 }
  0xf5   : > { %v493_v6 = vadd.f32 %v749_v57, %v492_v1  ;;  %v562_v7 = vadd.f32 %v531_v2, %v530_v0  ;;  %465 = vst [vmem:[%s931_s17 + $0x30] sm:$0xff] %v753_v4  ;;  %481 = vst [vmem:[%s931_s17 + $0xb0] sm:$0xff] %v954_v8  ;;  %v536_v25 = vmul.f32 %v753_v4, %v753_v4 }
  0xf6   : > { %v348_v9 = vpop.f32.mrf.mxu0  ;;  %v959_v13 = vpop.f32.mrf.mxu1 }
  0xf7   : > { %v563_v11 = vadd.f32 %v562_v7, %v532_v5  ;;  %463 = vst [vmem:[%s931_s17 + $0x20] sm:$0xff] %v348_v9  ;;  %v494_v12 = vadd.f32 %v750_v61, %v493_v6  ;;  %479 = vst [vmem:[%s931_s17 + $0xa0] sm:$0xff] %v959_v13  ;;  %v534_v16 = vmul.f32 %v348_v9, %v348_v9 }
  0xf8   : > { %v754_v14 = vpop.f32.mrf.mxu0  ;;  %v964_v18 = vpop.f32.mrf.mxu1 }
  0xf9   : > { %v495_v15 = vadd.f32 %v494_v12, %v348_v9  ;;  %v564_v17 = vadd.f32 %v563_v11, %v533_v10  ;;  %466 = vst [vmem:[%s931_s17 + $0x38] sm:$0xff] %v754_v14  ;;  %482 = vst [vmem:[%s931_s17 + $0xb8] sm:$0xff] %v964_v18  ;;  %v537_v30 = vmul.f32 %v754_v14, %v754_v14 }
  0xfa   : > { %v351_v19 = vpop.f32.mrf.mxu0  ;;  %v969_v23 = vpop.f32.mrf.mxu1  ;;  %v546_v11 = vmul.f32 %v939_v60, %v939_v60 }
  0xfb   : > { %v565_v20 = vadd.f32 %v564_v17, %v534_v16  ;;  %464 = vst [vmem:[%s931_s17 + $0x28] sm:$0xff] %v351_v19  ;;  %v496_v21 = vadd.f32 %v495_v15, %v351_v19  ;;  %v535_v22 = vmul.f32 %v351_v19, %v351_v19  ;;  %480 = vst [vmem:[%s931_s17 + $0xa8] sm:$0xff] %v969_v23 }
  0xfc   : > { %v757_v24 = vpop.f32.mrf.mxu0  ;;  %v974_v28 = vpop.f32.mrf.mxu1  ;;  %v547_v16 = vmul.f32 %v949_v3, %v949_v3  ;;  %v548_v19 = vmul.f32 %v934_v58, %v934_v58 }
  0xfd   : > { %v497_v26 = vadd.f32 %v753_v4, %v496_v21  ;;  %v566_v27 = vadd.f32 %v565_v20, %v535_v22  ;;  %469 = vst [vmem:[%s931_s17 + $0x50] sm:$0xff] %v757_v24  ;;  %485 = vst [vmem:[%s931_s17 + $0xd0] sm:$0xff] %v974_v28  ;;  %v540_v45 = vmul.f32 %v757_v24, %v757_v24 }
  0xfe   : > { %v364_v29 = vpop.f32.mrf.mxu0  ;;  %v979_v33 = vpop.f32.mrf.mxu1  ;;  %v549_v22 = vmul.f32 %v944_v62, %v944_v62 }
  0xff   : > { %v567_v31 = vadd.f32 %v566_v27, %v536_v25  ;;  %467 = vst [vmem:[%s931_s17 + $0x40] sm:$0xff] %v364_v29  ;;  %v498_v32 = vadd.f32 %v754_v14, %v497_v26  ;;  %483 = vst [vmem:[%s931_s17 + $0xc0] sm:$0xff] %v979_v33  ;;  %v538_v36 = vmul.f32 %v364_v29, %v364_v29 }
 0x100   : > { %v758_v34 = vpop.f32.mrf.mxu0  ;;  %v984_v38 = vpop.f32.mrf.mxu1  ;;  %v550_v26 = vmul.f32 %v959_v13, %v959_v13 }
 0x101   : > { %v499_v35 = vadd.f32 %v498_v32, %v364_v29  ;;  %v568_v37 = vadd.f32 %v567_v31, %v537_v30  ;;  %470 = vst [vmem:[%s931_s17 + $0x58] sm:$0xff] %v758_v34  ;;  %486 = vst [vmem:[%s931_s17 + $0xd8] sm:$0xff] %v984_v38  ;;  %v541_v50 = vmul.f32 %v758_v34, %v758_v34 }
 0x102   : > { %v367_v39 = vpop.f32.mrf.mxu0  ;;  %v989_v43 = vpop.f32.mrf.mxu1  ;;  %v551_v30 = vmul.f32 %v969_v23, %v969_v23 }
 0x103   : > { %v569_v40 = vadd.f32 %v568_v37, %v538_v36  ;;  %468 = vst [vmem:[%s931_s17 + $0x48] sm:$0xff] %v367_v39  ;;  %v500_v41 = vadd.f32 %v499_v35, %v367_v39  ;;  %v539_v42 = vmul.f32 %v367_v39, %v367_v39  ;;  %484 = vst [vmem:[%s931_s17 + $0xc8] sm:$0xff] %v989_v43 }
 0x104   : > { %v761_v44 = vpop.f32.mrf.mxu0  ;;  %v994_v48 = vpop.f32.mrf.mxu1  ;;  %v554_v36 = vmul.f32 %v979_v33, %v979_v33 }
 0x105   : > { %v501_v46 = vadd.f32 %v757_v24, %v500_v41  ;;  %v570_v47 = vadd.f32 %v569_v40, %v539_v42  ;;  %473 = vst [vmem:[%s931_s17 + $0x70] sm:$0xff] %v761_v44  ;;  %489 = vst [vmem:[%s931_s17 + $0xf0] sm:$0xff] %v994_v48  ;;  %v544_v4 = vmul.f32 %v761_v44, %v761_v44 }
 0x106   : > { %v380_v49 = vpop.f32.mrf.mxu0  ;;  %v444_v53 = vpop.f32.mrf.mxu1  ;;  %v555_v40 = vmul.f32 %v989_v43, %v989_v43 }
 0x107   : > { %v571_v51 = vadd.f32 %v570_v47, %v540_v45  ;;  %471 = vst [vmem:[%s931_s17 + $0x60] sm:$0xff] %v380_v49  ;;  %v502_v52 = vadd.f32 %v758_v34, %v501_v46  ;;  %487 = vst [vmem:[%s931_s17 + $0xe0] sm:$0xff] %v444_v53  ;;  %v542_v56 = vmul.f32 %v380_v49, %v380_v49 }
 0x108   : > { %v762_v54 = vpop.f32.mrf.mxu0  ;;  %v778_v59 = vpop.f32.mrf.mxu1  ;;  %v558_v46 = vmul.f32 %v444_v53, %v444_v53 }
 0x109   : > { %v503_v55 = vadd.f32 %v502_v52, %v380_v49  ;;  %v572_v57 = vadd.f32 %v571_v51, %v541_v50  ;;  %474 = vst [vmem:[%s931_s17 + $0x78] sm:$0xff] %v762_v54  ;;  %490 = vst [vmem:[%s931_s17 + $0xf8] sm:$0xff] %v778_v59  ;;  %v545_v7 = vmul.f32 %v762_v54, %v762_v54 }
 0x10a   : > { %v383_v61 = vpop.f32.mrf.mxu0  ;;  %v447_v2 = vpop.f32.mrf.mxu1 }
 0x10b   : > { %v573_v63 = vadd.f32 %v572_v57, %v542_v56  ;;  %472 = vst [vmem:[%s931_s17 + $0x68] sm:$0xff] %v383_v61  ;;  %v504_v0 = vadd.f32 %v503_v55, %v383_v61  ;;  %v543_v1 = vmul.f32 %v383_v61, %v383_v61  ;;  %488 = vst [vmem:[%s931_s17 + $0xe8] sm:$0xff] %v447_v2 }
 0x10c   : > { %v559_v51 = vmul.f32 %v447_v2, %v447_v2 }
 0x10d   : > { %v505_v5 = vadd.f32 %v761_v44, %v504_v0  ;;  %v574_v6 = vadd.f32 %v573_v63, %v543_v1 }
 0x10f   : > { %v506_v9 = vadd.f32 %v762_v54, %v505_v5  ;;  %v575_v10 = vadd.f32 %v574_v6, %v544_v4 }
 0x111   : > { %v576_v12 = vadd.f32 %v575_v10, %v545_v7  ;;  %v507_v14 = vadd.f32 %v506_v9, %v939_v60 }
 0x113   : > { %v508_v15 = vadd.f32 %v507_v14, %v949_v3  ;;  %v577_v17 = vadd.f32 %v576_v12, %v546_v11 }
 0x115   : > { %v509_v20 = vadd.f32 %v934_v58, %v508_v15  ;;  %v578_v21 = vadd.f32 %v577_v17, %v547_v16  ;;  %v552_v58 = vmul.f32 %v954_v8, %v954_v8 }
 0x117   : > { %v579_v24 = vadd.f32 %v578_v21, %v548_v19  ;;  %v510_v25 = vadd.f32 %v944_v62, %v509_v20  ;;  %v553_v62 = vmul.f32 %v964_v18, %v964_v18 }
 0x119   : > { %v511_v60 = vadd.f32 %v510_v25, %v959_v13  ;;  %v580_v27 = vadd.f32 %v579_v24, %v549_v22 }
 0x11b   : > { %v581_v3 = vadd.f32 %v580_v27, %v550_v26  ;;  %v512_v29 = vadd.f32 %v511_v60, %v969_v23 }
 0x11d   : > { %v513_v31 = vadd.f32 %v954_v8, %v512_v29  ;;  %v582_v32 = vadd.f32 %v581_v3, %v551_v30  ;;  %v556_v8 = vmul.f32 %v974_v28, %v974_v28 }
 0x11f   : > { %v583_v34 = vadd.f32 %v582_v32, %v552_v58  ;;  %v514_v35 = vadd.f32 %v964_v18, %v513_v31  ;;  %v557_v18 = vmul.f32 %v984_v38, %v984_v38 }
 0x121   : > { %v515_v13 = vadd.f32 %v514_v35, %v979_v33  ;;  %v584_v37 = vadd.f32 %v583_v34, %v553_v62 }
 0x123   : > { %v585_v39 = vadd.f32 %v584_v37, %v554_v36  ;;  %v516_v23 = vadd.f32 %v515_v13, %v989_v43  ;;  %v560_v43 = vmul.f32 %v994_v48, %v994_v48 }
 0x125   : > { %v517_v41 = vadd.f32 %v974_v28, %v516_v23  ;;  %v586_v42 = vadd.f32 %v585_v39, %v555_v40  ;;  %v561_v28 = vmul.f32 %v778_v59, %v778_v59 }
 0x127   : > { %v587_v44 = vadd.f32 %v586_v42, %v556_v8  ;;  %v518_v45 = vadd.f32 %v984_v38, %v517_v41 }
 0x129   : > { %v519_v33 = vadd.f32 %v518_v45, %v444_v53  ;;  %v588_v47 = vadd.f32 %v587_v44, %v557_v18 }
 0x12b   : > { %v589_v49 = vadd.f32 %v588_v47, %v558_v46  ;;  %v520_v50 = vadd.f32 %v519_v33, %v447_v2 }
 0x12d   : > { %v521_v52 = vadd.f32 %v994_v48, %v520_v50  ;;  %v590_v54 = vadd.f32 %v589_v49, %v559_v51 }
 0x12f   : > { %v522_v55 = vadd.f32 %v778_v59, %v521_v52  ;;  %v591_v56 = vadd.f32 %v590_v54, %v560_v43 }
 0x131   : > { %v523_v57 = vrot.slane %v522_v55, 4  ;;  %v592_v61 = vadd.f32 %v591_v56, %v561_v28 }
 0x133   : > { %v524_v38 = vadd.f32 %v523_v57, %v522_v55  ;;  %v593_v63 = vrot.slane %v592_v61, 4 }
 0x135   : > { %v525_v53 = vrot.slane %v524_v38, 2  ;;  %v594_v0 = vadd.f32 %v593_v63, %v592_v61 }
 0x137   : > { %v526_v1 = vadd.f32 %v525_v53, %v524_v38  ;;  %v595_v4 = vrot.slane %v594_v0, 2 }
 0x139   : > { %v527_v2 = vrot.slane %v526_v1, 1  ;;  %v596_v5 = vadd.f32 %v595_v4, %v594_v0 }
 0x13b   : > { %v528_v6 = vadd.f32 %v527_v2, %v526_v1  ;;  %v597_v7 = vrot.slane %v596_v5, 1 }
 0x13d   : > { %529 = vst [vmem:[%s923_s11] sm:$0x1] %v528_v6  ;;  %v598_v48 = vadd.f32 %v597_v7, %v596_v5 }
 0x13f   : > { %599 = vst [vmem:[%s923_s11 + $0x1] sm:$0x1] %v598_v48 }
 0x140 PF: > { %s14_s12 = sadd.s32 1, %s818_s12  }
 0x141   : > { %p11_p5 = scmp.ge.s32.totalorder %s14_s12, 4  }
 0x143   :  { %13 = sbr.rel (!%p11_p5) target bundleno = 1 (0x1), region = 70 }

// kernel: res_unit_n_forward.7
= control target key start
LH: loop header
LB: loop body
LE: loop exit
PB: predicated region body
PF: predicated region fallthrough
CT: control target
= control target key end

     0   :  { %s1337_s18 = smov 0   ;;  %s1680_s0 = inlined_call_operand.vmem [shape: f32[512,128], index: 0, kind: input, shape index: {}]   ;;  %s1681_s1 = inlined_call_operand.vmem [shape: f32[1,128], index: 1, kind: input, shape index: {}]   ;;  %s1682_s2 = inlined_call_operand.vmem [shape: f32[1,128], index: 2, kind: input, shape index: {}]   ;;  %s1683_s3 = inlined_call_operand.vmem [shape: bf16[128,128], index: 3, kind: input, shape index: {}]   ;;  %s1684_s4 = inlined_call_operand.vmem [shape: f32[512,128], index: 4, kind: output, shape index: {0}]   ;;  %s1685_s5 = inlined_call_operand.vmem [shape: f32[16,128], index: 5, kind: output, shape index: {1}]  }
   0x1 LB: > { %s1343_s19 = sadd.s32 4294967295, %s1304_s18   ;;  %p1047_p0 = scmp.ge.s32.totalorder %s1304_s18, 1  ;;  %s1304_s18 = sphi %s1337_s18, %s16_s18  }
   0x2   : > { %p191_p1 = scmp.lt.s32.totalorder %s1304_s18, 3 }
   0x4   : > { %p192_p2 = pnand %p1047_p0, %p191_p1 }
   0x5   : > { %s1048_s22 = sshll.u32 (!%p192_p2), %s1343_s19, 5  ;;  %p235_p4 = scmp.lt.s32.totalorder (!%p192_p2), %s1343_s19, 1 }
   0x6   : > { %195 = sbr.rel (%p192_p2) target bundleno = 340 (0x154), region = 36  ;;  %p224_p3 = scmp.lt.s32.totalorder (!%p192_p2), %s1048_s22, 63 }
   0xb   : > { %v1162_v0 = vld [vmem:[%s1683_s3 + $0x38] sm:$0xff]   ;;  %v1163_v1 = vld [vmem:[%s1683_s3 + $0x30] sm:$0xff]   ;;  %s1687_s22 = smov (!%p224_p3, %s1048_s22), 63  ;;  %v1164_v2 = vld [vmem:[%s1683_s3 + $0x28] sm:$0xff]   ;;  %s1689_s19 = smov (!%p235_p4, %s1343_s19), 1 }
   0xc   : > { %1089 = vmatprep.subr.bf16.mxu0 %v1162_v0  ;;  %1137 = vmatprep.subr.bf16.mxu1 %v1162_v0  ;;  %s1049_s27 = sshll.u32 %s1687_s22, 3  ;;  %v1165_v3 = vld [vmem:[%s1683_s3 + $0x20] sm:$0xff]   ;;  %v1166_v21 = vld [vmem:[%s1683_s3 + $0x18] sm:$0xff]   ;;  %v1167_v29 = vld [vmem:[%s1683_s3 + $0x10] sm:$0xff]   ;;  %s1052_s23 = sshll.u32 %s1689_s19, 3 }
   0xd   : > { %1090 = vmatpush3.bf16.msra.mxu0 %v1162_v0  ;;  %1145 = vmatpush3.bf16.msra.mxu1 %v1162_v0  ;;  %s1365_s30 = scalar_lea.vmem %s1680_s0, %s1049_s27  ;;  %v1375_v6 = vld [vmem:[%s1681_s1] ss:$0 sm:$0xff]  ;;  %v1168_v57 = vld [vmem:[%s1683_s3 + $0x8] sm:$0xff]   ;;  %s1633_s26 = scalar_lea.vmem %s1685_s5, %s1052_s23 }
   0xe   : > { %1091 = vmatprep.subr.bf16.mxu0 %v1163_v1  ;;  %1138 = vmatprep.subr.bf16.mxu1 %v1163_v1  ;;  %v240_v4 = vld [vmem:[%s1365_s30] sm:$0xff]  ;;  %v241_v5 = vld [vmem:[%s1365_s30 + $0x8] sm:$0xff]  ;;  %v242_v10 = vld [vmem:[%s1365_s30 + $0x10] sm:$0xff] }
   0xf   : > { %v279_v7 = vmul.f32 %v1375_v6, %v240_v4  ;;  %v280_v8 = vmul.f32 %v1375_v6, %v241_v5  ;;  %v1382_v9 = vld [vmem:[%s1682_s2] ss:$0 sm:$0xff]  ;;  %v243_v11 = vld [vmem:[%s1365_s30 + $0x18] sm:$0xff]  ;;  %v281_v12 = vmul.f32 %v1375_v6, %v242_v10  ;;  %v245_v15 = vld [vmem:[%s1365_s30 + $0x28] sm:$0xff] }
  0x10   : > { %v282_v13 = vmul.f32 %v1375_v6, %v243_v11  ;;  %v244_v14 = vld [vmem:[%s1365_s30 + $0x20] sm:$0xff]  ;;  %v246_v16 = vld [vmem:[%s1365_s30 + $0x30] sm:$0xff]  ;;  %v247_v20 = vld [vmem:[%s1365_s30 + $0x38] sm:$0xff]  ;;  %v284_v24 = vmul.f32 %v1375_v6, %v245_v15 }
  0x11   : > { %1092 = vmatpush3.bf16.msra.mxu0 %v1163_v1  ;;  %1146 = vmatpush3.bf16.msra.mxu1 %v1163_v1  ;;  %v1392_v17 = vadd.f32 %v1382_v9, %v279_v7  ;;  %v1395_v18 = vadd.f32 %v1382_v9, %v280_v8  ;;  %v283_v19 = vmul.f32 %v1375_v6, %v244_v14  ;;  %v248_v34 = vld [vmem:[%s1365_s30 + $0x40] sm:$0xff]  ;;  %v249_v39 = vld [vmem:[%s1365_s30 + $0x48] sm:$0xff]  ;;  %v250_v44 = vld [vmem:[%s1365_s30 + $0x50] sm:$0xff] }
  0x12   : > { %1093 = vmatprep.subr.bf16.mxu0 %v1164_v2  ;;  %1139 = vmatprep.subr.bf16.mxu1 %v1164_v2  ;;  %v1403_v22 = vadd.f32 %v1382_v9, %v281_v12  ;;  %v1406_v23 = vadd.f32 %v1382_v9, %v282_v13  ;;  %v285_v28 = vmul.f32 %v1375_v6, %v246_v16  ;;  %v251_v48 = vld [vmem:[%s1365_s30 + $0x58] sm:$0xff]  ;;  %v252_v52 = vld [vmem:[%s1365_s30 + $0x60] sm:$0xff]  ;;  %v253_v56 = vld [vmem:[%s1365_s30 + $0x68] sm:$0xff] }
  0x13   : > { %v350_v25 = vsub.f32 0.0, %v1392_v17  ;;  %v351_v26 = vsub.f32 0.0, %v1395_v18  ;;  %v1412_v27 = vadd.f32 %v1382_v9, %v283_v19  ;;  %v1421_v32 = vadd.f32 %v1382_v9, %v284_v24  ;;  %v255_v8 = vld [vmem:[%s1365_s30 + $0x78] sm:$0xff]  ;;  %v1169_v10 = vld [vmem:[%s1683_s3] sm:$0xff]  }
  0x14   : > { %v352_v30 = vsub.f32 0.0, %v1403_v22  ;;  %v353_v31 = vsub.f32 0.0, %v1406_v23  ;;  %v286_v33 = vmul.f32 %v1375_v6, %v247_v20  ;;  %v1427_v38 = vadd.f32 %v1382_v9, %v285_v28  ;;  %v256_v14 = vld [vmem:[%s1365_s30 + $0x80] sm:$0xff]  ;;  %v257_v20 = vld [vmem:[%s1365_s30 + $0x88] sm:$0xff] }
  0x15   : > { %1094 = vmatpush3.bf16.msra.mxu0 %v1164_v2  ;;  %1147 = vmatpush3.bf16.msra.mxu1 %v1164_v2  ;;  %v382_v35 = vmul.f32 1.442695, %v350_v25  ;;  %v384_v36 = vmul.f32 1.442695, %v351_v26  ;;  %v354_v37 = vsub.f32 0.0, %v1412_v27  ;;  %v355_v42 = vsub.f32 0.0, %v1421_v32 }
  0x16   : > { %1095 = vmatprep.subr.bf16.mxu0 %v1165_v3  ;;  %1140 = vmatprep.subr.bf16.mxu1 %v1165_v3  ;;  %v386_v40 = vmul.f32 1.442695, %v352_v30  ;;  %v388_v41 = vmul.f32 1.442695, %v353_v31  ;;  %v1432_v43 = vadd.f32 %v1382_v9, %v286_v33  ;;  %v356_v46 = vsub.f32 0.0, %v1427_v38  ;;  %v258_v26 = vld [vmem:[%s1365_s30 + $0x90] sm:$0xff] }
  0x17   : > { %1170 = vpow2.f32 %v382_v35  ;;  %v390_v45 = vmul.f32 1.442695, %v354_v37  ;;  %v287_v47 = vmul.f32 %v1375_v6, %v248_v34  ;;  %v392_v49 = vmul.f32 1.442695, %v355_v42  ;;  %v259_v31 = vld [vmem:[%s1365_s30 + $0x98] sm:$0xff] }
  0x18   : > { %1172 = vpow2.f32 %v384_v36  ;;  %v357_v50 = vsub.f32 0.0, %v1432_v43  ;;  %v288_v51 = vmul.f32 %v1375_v6, %v249_v39  ;;  %v394_v53 = vmul.f32 1.442695, %v356_v46 }
  0x19   : > { %1096 = vmatpush3.bf16.msra.mxu0 %v1165_v3  ;;  %1148 = vmatpush3.bf16.msra.mxu1 %v1165_v3  ;;  %1174 = vpow2.f32 %v386_v40  ;;  %v1442_v54 = vadd.f32 %v1382_v9, %v287_v47  ;;  %v289_v55 = vmul.f32 %v1375_v6, %v250_v44  ;;  %v290_v60 = vmul.f32 %v1375_v6, %v251_v48  ;;  %v254_v3 = vld [vmem:[%s1365_s30 + $0x70] sm:$0xff] }
  0x1a   : > { %1097 = vmatprep.subr.bf16.mxu0 %v1166_v21  ;;  %1141 = vmatprep.subr.bf16.mxu1 %v1166_v21  ;;  %1176 = vpow2.f32 %v388_v41  ;;  %v396_v58 = vmul.f32 1.442695, %v357_v50  ;;  %v1450_v59 = vadd.f32 %v1382_v9, %v288_v51  ;;  %v291_v63 = vmul.f32 %v1375_v6, %v252_v52 }
  0x1b   : > { %1178 = vpow2.f32 %v390_v45  ;;  %v358_v61 = vsub.f32 0.0, %v1442_v54  ;;  %v1455_v62 = vadd.f32 %v1382_v9, %v289_v55  ;;  %v1460_v1 = vadd.f32 %v1382_v9, %v290_v60  ;;  %v261_v60 = vld [vmem:[%s1365_s30 + $0xa8] sm:$0xff] }
  0x1c   : > { %1180 = vpow2.f32 %v392_v49  ;;  %v359_v0 = vsub.f32 0.0, %v1450_v59  ;;  %v292_v2 = vmul.f32 %v1375_v6, %v253_v56  ;;  %v1466_v7 = vadd.f32 %v1382_v9, %v291_v63 }
  0x1d   : > { %1098 = vmatpush3.bf16.msra.mxu0 %v1166_v21  ;;  %1149 = vmatpush3.bf16.msra.mxu1 %v1166_v21  ;;  %1182 = vpow2.f32 %v394_v53  ;;  %v398_v4 = vmul.f32 1.442695, %v358_v61  ;;  %v360_v5 = vsub.f32 0.0, %v1455_v62  ;;  %v361_v12 = vsub.f32 0.0, %v1460_v1  ;;  %v260_v53 = vld [vmem:[%s1365_s30 + $0xa0] sm:$0xff] }
  0x1e   : > { %1099 = vmatprep.subr.bf16.mxu0 %v1167_v29  ;;  %1142 = vmatprep.subr.bf16.mxu1 %v1167_v29  ;;  %1184 = vpow2.f32 %v396_v58  ;;  %v400_v11 = vmul.f32 1.442695, %v359_v0  ;;  %v1474_v13 = vadd.f32 %v1382_v9, %v292_v2  ;;  %v362_v16 = vsub.f32 0.0, %v1466_v7 }
  0x1f   : > { %1186 = vpow2.f32 %v398_v4  ;;  %v402_v15 = vmul.f32 1.442695, %v360_v5  ;;  %v293_v19 = vmul.f32 %v1375_v6, %v254_v3  ;;  %v404_v21 = vmul.f32 1.442695, %v361_v12  ;;  %v262_v3 = vld [vmem:[%s1365_s30 + $0xb0] sm:$0xff] }
  0x20   : > { %1188 = vpow2.f32 %v400_v11  ;;  %v363_v24 = vsub.f32 0.0, %v1474_v13  ;;  %v294_v25 = vmul.f32 %v1375_v6, %v255_v8  ;;  %v406_v28 = vmul.f32 1.442695, %v362_v16  ;;  %v263_v11 = vld [vmem:[%s1365_s30 + $0xb8] sm:$0xff] }
  0x21   : > { %1100 = vmatpush3.bf16.msra.mxu0 %v1167_v29  ;;  %1150 = vmatpush3.bf16.msra.mxu1 %v1167_v29  ;;  %1190 = vpow2.f32 %v402_v15  ;;  %v1484_v29 = vadd.f32 %v1382_v9, %v293_v19  ;;  %v295_v30 = vmul.f32 %v1375_v6, %v256_v14  ;;  %v296_v35 = vmul.f32 %v1375_v6, %v257_v20 }
  0x22   : > { %1101 = vmatprep.subr.bf16.mxu0 %v1168_v57  ;;  %1143 = vmatprep.subr.bf16.mxu1 %v1168_v57  ;;  %1192 = vpow2.f32 %v404_v21  ;;  %v408_v33 = vmul.f32 1.442695, %v363_v24  ;;  %v1489_v34 = vadd.f32 %v1382_v9, %v294_v25  ;;  %v297_v39 = vmul.f32 %v1375_v6, %v258_v26 }
  0x23   : > { %1194 = vpow2.f32 %v406_v28  ;;  %v364_v36 = vsub.f32 0.0, %v1484_v29  ;;  %v1494_v37 = vadd.f32 %v1382_v9, %v295_v30  ;;  %v1499_v42 = vadd.f32 %v1382_v9, %v296_v35 }
  0x24   : > { %v1171_v40 = vpop.eup %1170  ;;  %1196 = vpow2.f32 %v408_v33  ;;  %v365_v41 = vsub.f32 0.0, %v1489_v34  ;;  %v298_v44 = vmul.f32 %v1375_v6, %v259_v31  ;;  %v1504_v48 = vadd.f32 %v1382_v9, %v297_v39 }
  0x25   : > { %1102 = vmatpush3.bf16.msra.mxu0 %v1168_v57  ;;  %1151 = vmatpush3.bf16.msra.mxu1 %v1168_v57  ;;  %v1173_v45 = vpop.eup %1172  ;;  %v446_v46 = vadd.f32 1.0, %v1171_v40  ;;  %v366_v47 = vsub.f32 0.0, %v1494_v37  ;;  %v367_v51 = vsub.f32 0.0, %v1499_v42  ;;  %v1511_v57 = vmul.f32 1.442695, %v364_v36 }
  0x26   : > { %1103 = vmatprep.subr.bf16.mxu0 %v1169_v10  ;;  %1144 = vmatprep.subr.bf16.mxu1 %v1169_v10  ;;  %v1175_v49 = vpop.eup %1174  ;;  %v447_v50 = vadd.f32 1.0, %v1173_v45  ;;  %v1508_v52 = vadd.f32 %v1382_v9, %v298_v44  ;;  %v1513_v58 = vmul.f32 1.442695, %v365_v41  ;;  %v368_v2 = vsub.f32 0.0, %v1504_v48  ;;  %v264_v45 = vld [vmem:[%s1365_s30 + $0xc0] sm:$0xff] }
  0x27   : > { %v1177_v55 = vpop.eup %1176  ;;  %1198 = vrcp.f32 %v446_v46  ;;  %v448_v56 = vadd.f32 1.0, %v1175_v49  ;;  %v1516_v0 = vmul.f32 1.442695, %v366_v47  ;;  %v1520_v8 = vmul.f32 1.442695, %v367_v51  ;;  %v265_v51 = vld [vmem:[%s1365_s30 + $0xc8] sm:$0xff] }
  0x28   : > { %v1179_v61 = vpop.eup %1178  ;;  %1200 = vrcp.f32 %v447_v50  ;;  %v449_v63 = vadd.f32 1.0, %v1177_v55  ;;  %v369_v15 = vsub.f32 0.0, %v1508_v52  ;;  %v300_v16 = vmul.f32 %v1375_v6, %v261_v60 }
  0x29   : > { %1104 = vmatpush3.bf16.msra.mxu0 %v1169_v10  ;;  %1152 = vmatpush3.bf16.msra.mxu1 %v1169_v10  ;;  %v1181_v4 = vpop.eup %1180  ;;  %1202 = vrcp.f32 %v448_v56  ;;  %v450_v5 = vadd.f32 1.0, %v1179_v61  ;;  %v299_v10 = vmul.f32 %v1375_v6, %v260_v53  ;;  %v301_v24 = vmul.f32 %v1375_v6, %v262_v3  ;;  %v266_v61 = vld [vmem:[%s1365_s30 + $0xd0] sm:$0xff] }
  0x2a   : > { %v1183_v12 = vpop.eup %1182  ;;  %1204 = vrcp.f32 %v449_v63  ;;  %v451_v14 = vadd.f32 1.0, %v1181_v4  ;;  %v1531_v28 = vadd.f32 %v1382_v9, %v300_v16  ;;  %v302_v30 = vmul.f32 %v1375_v6, %v263_v11  ;;  %v267_v63 = vld [vmem:[%s1365_s30 + $0xd8] sm:$0xff] }
  0x2b   : > { %v1185_v19 = vpop.eup %1184  ;;  %1206 = vrcp.f32 %v450_v5  ;;  %v452_v20 = vadd.f32 1.0, %v1183_v12  ;;  %v1527_v21 = vadd.f32 %v1382_v9, %v299_v10  ;;  %v1536_v36 = vadd.f32 %v1382_v9, %v301_v24 }
  0x2c   : > { %v1187_v25 = vpop.eup %1186  ;;  %1208 = vrcp.f32 %v451_v14  ;;  %v453_v26 = vadd.f32 1.0, %v1185_v19  ;;  %v371_v41 = vsub.f32 0.0, %v1531_v28  ;;  %v1540_v44 = vadd.f32 %v1382_v9, %v302_v30  ;;  %v268_v19 = vld [vmem:[%s1365_s30 + $0xe0] sm:$0xff]  ;;  %v269_v30 = vld [vmem:[%s1365_s30 + $0xe8] sm:$0xff] }
  0x2d   : > { %v1189_v31 = vpop.eup %1188  ;;  %1210 = vrcp.f32 %v452_v20  ;;  %v454_v33 = vadd.f32 1.0, %v1187_v25  ;;  %v370_v35 = vsub.f32 0.0, %v1527_v21  ;;  %v418_v49 = vmul.f32 1.442695, %v368_v2 }
  0x2e   : > { %v1191_v39 = vpop.eup %1190  ;;  %1212 = vrcp.f32 %v453_v26  ;;  %v455_v40 = vadd.f32 1.0, %v1189_v31  ;;  %v420_v50 = vmul.f32 1.442695, %v369_v15  ;;  %v372_v56 = vsub.f32 0.0, %v1536_v36 }
  0x2f   : > { %v1193_v46 = vpop.eup %1192  ;;  %1214 = vrcp.f32 %v454_v33  ;;  %v456_v47 = vadd.f32 1.0, %v1191_v39  ;;  %v373_v60 = vsub.f32 0.0, %v1540_v44  ;;  %v422_v5 = vmul.f32 1.442695, %v370_v35 }
  0x30   : > { %v1195_v53 = vpop.eup %1194  ;;  %1216 = vrcp.f32 %v455_v40  ;;  %v457_v55 = vadd.f32 1.0, %v1193_v46  ;;  %v303_v10 = vmul.f32 %v1375_v6, %v264_v45  ;;  %v424_v11 = vmul.f32 1.442695, %v371_v41 }
  0x31   : > { %v1197_v3 = vpop.eup %1196  ;;  %1218 = vrcp.f32 %v456_v47  ;;  %v458_v4 = vadd.f32 1.0, %v1195_v53  ;;  %v304_v12 = vmul.f32 %v1375_v6, %v265_v51  ;;  %v305_v15 = vmul.f32 %v1375_v6, %v266_v61 }
  0x32   : > { %1220 = vrcp.f32 %v457_v55  ;;  %v459_v2 = vadd.f32 1.0, %v1197_v3  ;;  %v1551_v14 = vadd.f32 %v1382_v9, %v303_v10  ;;  %v306_v16 = vmul.f32 %v1375_v6, %v267_v63 }
  0x33   : > { %1222 = vrcp.f32 %v458_v4  ;;  %v426_v24 = vmul.f32 1.442695, %v372_v56  ;;  %v428_v25 = vmul.f32 1.442695, %v373_v60  ;;  %v1557_v26 = vadd.f32 %v1382_v9, %v304_v12 }
  0x34   : > { %v1199_v20 = vpop.eup %1198  ;;  %1224 = vrcp.f32 %v459_v2  ;;  %v374_v35 = vsub.f32 0.0, %v1551_v14  ;;  %v1564_v39 = vadd.f32 %v1382_v9, %v305_v15  ;;  %v1569_v45 = vadd.f32 %v1382_v9, %v306_v16 }
  0x35   : > { %v1201_v31 = vpop.eup %1200  ;;  %v542_v33 = vmul.f32 %v1199_v20, %v1392_v17  ;;  %1226 = vpow2.f32 %v1511_v57  ;;  %v307_v46 = vmul.f32 %v1375_v6, %v268_v19  ;;  %v375_v57 = vsub.f32 0.0, %v1557_v26 }
  0x36   : > { %v1203_v40 = vpop.eup %1202  ;;  %v543_v41 = vmul.f32 %v1201_v31, %v1395_v18  ;;  %1228 = vpow2.f32 %v1513_v58  ;;  %v308_v51 = vmul.f32 %v1375_v6, %v269_v30  ;;  %v430_v58 = vmul.f32 1.442695, %v374_v35 }
  0x37   : > { %v1205_v47 = vpop.eup %1204  ;;  %v544_v17 = vmul.f32 %v1203_v40, %v1403_v22  ;;  %1230 = vpow2.f32 %v1516_v0  ;;  %v376_v61 = vsub.f32 0.0, %v1564_v39  ;;  %v377_v22 = vsub.f32 0.0, %v1569_v45 }
  0x38   : > { %v1207_v53 = vpop.eup %1206  ;;  %v574_v55 = vpack.c.bf16 %v543_v41, %v542_v33  ;;  %v545_v18 = vmul.f32 %v1205_v47, %v1406_v23  ;;  %1232 = vpow2.f32 %v1520_v8  ;;  %v1583_v4 = vadd.f32 %v1382_v9, %v307_v46 }
  0x39   : > { %v1209_v56 = vpop.eup %1208  ;;  %v546_v60 = vmul.f32 %v1207_v53, %v1412_v27  ;;  %1234 = vpow2.f32 %v418_v49  ;;  %v432_v10 = vmul.f32 1.442695, %v375_v57  ;;  %v1587_v27 = vadd.f32 %v1382_v9, %v308_v51 }
  0x3a   : > { %v1211_v0 = vpop.eup %1210  ;;  %1105 = vmatprep.mubr.bf16.mxu0 %v574_v55  ;;  %v575_v63 = vpack.c.bf16 %v545_v18, %v544_v17  ;;  %v547_v3 = vmul.f32 %v1209_v56, %v1421_v32  ;;  %1236 = vpow2.f32 %v420_v50  ;;  %v378_v32 = vsub.f32 0.0, %v1583_v4 }
  0x3b   : > { %v1213_v23 = vpop.eup %1212  ;;  %v548_v8 = vmul.f32 %v1211_v0, %v1427_v38  ;;  %1238 = vpow2.f32 %v422_v5  ;;  %v434_v16 = vmul.f32 1.442695, %v376_v61  ;;  %v379_v38 = vsub.f32 0.0, %v1587_v27 }
  0x3c   : > { %v1215_v49 = vpop.eup %1214  ;;  %1106 = vmatmul.mubr.bf16.vlgmr.msra.gmra.mxu0 %v575_v63  ;;  %v576_v2 = vpack.c.bf16 %v547_v3, %v546_v60  ;;  %v549_v12 = vmul.f32 %v1213_v23, %v1432_v43  ;;  %1240 = vpow2.f32 %v424_v11  ;;  %v436_v20 = vmul.f32 1.442695, %v377_v22 }
  0x3d   : > { %v1217_v50 = vpop.eup %1216  ;;  %v550_v15 = vmul.f32 %v1215_v49, %v1442_v54  ;;  %1242 = vpow2.f32 %v426_v24  ;;  %v438_v43 = vmul.f32 1.442695, %v378_v32  ;;  %v440_v33 = vmul.f32 1.442695, %v379_v38  ;;  %v270_v54 = vld [vmem:[%s1365_s30 + $0xf0] sm:$0xff] }
  0x3e   : > { %v1219_v5 = vpop.eup %1218  ;;  %1109 = vmatprep.mubr.bf16.mxu0 %v576_v2  ;;  %v551_v19 = vmul.f32 %v1217_v50, %v1450_v59  ;;  %1244 = vpow2.f32 %v428_v25  ;;  %v577_v31 = vpack.c.bf16 %v549_v12, %v548_v8  ;;  %v271_v59 = vld [vmem:[%s1365_s30 + $0xf8] sm:$0xff]  ;;  %v309_v25 = vmul.f32 %v1375_v6, %v270_v54  ;;  %s1641_s30 = scalar_lea.vmem %s1684_s4, %s1049_s27 }
  0x3f   : > { %v1221_v30 = vpop.eup %1220  ;;  %1246 = vpow2.f32 %v430_v58  ;;  %v552_v17 = vmul.f32 %v1219_v5, %v1455_v62  ;;  %v310_v61 = vmul.f32 %v1375_v6, %v271_v59 }
  0x40   : > { %v1223_v11 = vpop.eup %1222  ;;  %1248 = vpow2.f32 %v432_v10  ;;  %v578_v24 = vpack.c.bf16 %v551_v19, %v550_v15  ;;  %v553_v57 = vmul.f32 %v1221_v30, %v1460_v1 }
  0x41   : > { %v1225_v35 = vpop.eup %1224  ;;  %1250 = vpow2.f32 %v434_v16  ;;  %v554_v55 = vmul.f32 %v1223_v11, %v1466_v7  ;;  %v1606_v49 = vadd.f32 %v1382_v9, %v310_v61 }
  0x42   : > { %v1227_v40 = vpop.eup %1226  ;;  %1252 = vpow2.f32 %v436_v20  ;;  %v555_v18 = vmul.f32 %v1225_v35, %v1474_v13  ;;  %v579_v1 = vpack.c.bf16 %v553_v57, %v552_v17  ;;  %v1603_v13 = vadd.f32 %v1382_v9, %v309_v25 }
  0x43   : > { %v1229_v41 = vpop.eup %1228  ;;  %v460_v46 = vadd.f32 1.0, %v1227_v40  ;;  %1254 = vpow2.f32 %v438_v43  ;;  %v381_v19 = vsub.f32 0.0, %v1606_v49 }
  0x44   : > { %v1231_v47 = vpop.eup %1230  ;;  %1110 = vmatmul.mubr.bf16.gmra.mxu0 %v577_v31  ;;  %v461_v51 = vadd.f32 1.0, %v1229_v41  ;;  %1256 = vpow2.f32 %v440_v33  ;;  %v580_v23 = vpack.c.bf16 %v555_v18, %v554_v55  ;;  %v380_v16 = vsub.f32 0.0, %v1603_v13 }
  0x45   : > { %v1233_v53 = vpop.eup %1232  ;;  %1113 = vmatprep.mubr.bf16.mxu0 %v578_v24  ;;  %1258 = vrcp.f32 %v460_v46  ;;  %v462_v58 = vadd.f32 1.0, %v1231_v47  ;;  %v444_v24 = vmul.f32 1.442695, %v381_v19 }
  0x46   : > { %v1235_v56 = vpop.eup %1234  ;;  %1260 = vrcp.f32 %v461_v51  ;;  %v463_v60 = vadd.f32 1.0, %v1233_v53  ;;  %v442_v33 = vmul.f32 1.442695, %v380_v16 }
  0x47   : > { %v1237_v22 = vpop.eup %1236  ;;  %1262 = vrcp.f32 %v462_v58  ;;  %v464_v62 = vadd.f32 1.0, %v1235_v56 }
  0x48   : > { %v1239_v0 = vpop.eup %1238  ;;  %1264 = vrcp.f32 %v463_v60  ;;  %v465_v63 = vadd.f32 1.0, %v1237_v22 }
  0x49   : > { %v1241_v3 = vpop.eup %1240  ;;  %1266 = vrcp.f32 %v464_v62  ;;  %v466_v7 = vadd.f32 1.0, %v1239_v0 }
  0x4a   : > { %v1243_v8 = vpop.eup %1242  ;;  %1268 = vrcp.f32 %v465_v63  ;;  %v467_v10 = vadd.f32 1.0, %v1241_v3 }
  0x4b   : > { %v1245_v6 = vpop.eup %1244  ;;  %1270 = vrcp.f32 %v466_v7  ;;  %v468_v2 = vadd.f32 1.0, %v1243_v8 }
  0x4c   : > { %v1247_v12 = vpop.eup %1246  ;;  %1114 = vmatmul.mubr.bf16.gmra.mxu0 %v579_v1  ;;  %1272 = vrcp.f32 %v467_v10  ;;  %v469_v32 = vadd.f32 1.0, %v1245_v6 }
  0x4d   : > { %v1249_v50 = vpop.eup %1248  ;;  %1117 = vmatprep.mubr.bf16.mxu0 %v580_v23  ;;  %1274 = vrcp.f32 %v468_v2  ;;  %v470_v15 = vadd.f32 1.0, %v1247_v12 }
  0x4e   : > { %v1251_v38 = vpop.eup %1250  ;;  %1276 = vrcp.f32 %v469_v32  ;;  %v471_v5 = vadd.f32 1.0, %v1249_v50 }
  0x4f   : > { %v1253_v9 = vpop.eup %1252  ;;  %1278 = vrcp.f32 %v470_v15  ;;  %v472_v20 = vadd.f32 1.0, %v1251_v38 }
  0x50   : > { %v1255_v30 = vpop.eup %1254  ;;  %1280 = vrcp.f32 %v471_v5  ;;  %v473_v43 = vadd.f32 1.0, %v1253_v9 }
  0x51   : > { %v1257_v11 = vpop.eup %1256  ;;  %1282 = vrcp.f32 %v472_v20  ;;  %v474_v31 = vadd.f32 1.0, %v1255_v30 }
  0x52   : > { %v1259_v54 = vpop.eup %1258  ;;  %1284 = vrcp.f32 %v473_v43  ;;  %v475_v35 = vadd.f32 1.0, %v1257_v11 }
  0x53   : > { %v1261_v40 = vpop.eup %1260  ;;  %v556_v41 = vmul.f32 %v1259_v54, %v1484_v29  ;;  %1286 = vrcp.f32 %v474_v31 }
  0x54   : > { %v1263_v46 = vpop.eup %1262  ;;  %v557_v59 = vmul.f32 %v1261_v40, %v1489_v34  ;;  %1288 = vrcp.f32 %v475_v35 }
  0x55   : > { %v1265_v25 = vpop.eup %1264  ;;  %v558_v47 = vmul.f32 %v1263_v46, %v1494_v37  ;;  %1290 = vpow2.f32 %v442_v33 }
  0x56   : > { %v1267_v17 = vpop.eup %1266  ;;  %v581_v57 = vpack.c.bf16 %v557_v59, %v556_v41  ;;  %v559_v51 = vmul.f32 %v1265_v25, %v1499_v42  ;;  %1292 = vpow2.f32 %v444_v24 }
  0x57   : > { %v1269_v53 = vpop.eup %1268  ;;  %v560_v55 = vmul.f32 %v1267_v17, %v1504_v48 }
  0x58   : > { %v1271_v18 = vpop.eup %1270  ;;  %1118 = vmatmul.mubr.bf16.gmra.mxu0 %v581_v57  ;;  %v582_v29 = vpack.c.bf16 %v559_v51, %v558_v47  ;;  %v561_v58 = vmul.f32 %v1269_v53, %v1508_v52 }
  0x59   : > { %v1273_v56 = vpop.eup %1272  ;;  %v562_v34 = vmul.f32 %v1271_v18, %v1527_v21 }
  0x5a   : > { %v1275_v60 = vpop.eup %1274  ;;  %1121 = vmatprep.mubr.bf16.mxu1 %v582_v29  ;;  %v583_v37 = vpack.c.bf16 %v561_v58, %v560_v55  ;;  %v563_v61 = vmul.f32 %v1273_v56, %v1531_v28 }
  0x5b   : > { %v1277_v22 = vpop.eup %1276  ;;  %v564_v0 = vmul.f32 %v1275_v60, %v1536_v36 }
  0x5c   : > { %v1279_v62 = vpop.eup %1278  ;;  %1122 = vmatmul.mubr.bf16.vlgmr.msra.gmra.mxu1 %v583_v37  ;;  %v584_v42 = vpack.c.bf16 %v563_v61, %v562_v34  ;;  %v565_v48 = vmul.f32 %v1277_v22, %v1540_v44 }
  0x5d   : > { %v1281_v1 = vpop.eup %1280  ;;  %v566_v63 = vmul.f32 %v1279_v62, %v1551_v14 }
  0x5e   : > { %v1283_v52 = vpop.eup %1282  ;;  %1125 = vmatprep.mubr.bf16.mxu1 %v584_v42  ;;  %v567_v21 = vmul.f32 %v1281_v1, %v1557_v26  ;;  %v585_v7 = vpack.c.bf16 %v565_v48, %v564_v0 }
  0x5f   : > { %v1285_v3 = vpop.eup %1284  ;;  %v568_v36 = vmul.f32 %v1283_v52, %v1564_v39 }
  0x60   : > { %v1287_v23 = vpop.eup %1286  ;;  %v586_v28 = vpack.c.bf16 %v567_v21, %v566_v63  ;;  %v569_v44 = vmul.f32 %v1285_v3, %v1569_v45 }
  0x61   : > { %v1289_v8 = vpop.eup %1288  ;;  %v570_v14 = vmul.f32 %v1287_v23, %v1583_v4  ;;  %v1306_v4 = vmov 0.0  }
  0x62   : > { %v1291_v10 = vpop.eup %1290  ;;  %v571_v26 = vmul.f32 %v1289_v8, %v1587_v27  ;;  %v587_v32 = vpack.c.bf16 %v569_v44, %v568_v36  ;;  %847 = vst [vmem:[%s1633_s26] sm:$0xff] %v1306_v4 }
  0x63   : > { %v1293_v6 = vpop.eup %1292  ;;  %v476_v2 = vadd.f32 1.0, %v1291_v10 }
  0x64   : > { %1126 = vmatmul.mubr.bf16.gmra.mxu1 %v585_v7  ;;  %v477_v12 = vadd.f32 1.0, %v1293_v6  ;;  %v588_v50 = vpack.c.bf16 %v571_v26, %v570_v14 }
  0x65   : > { %1129 = vmatprep.mubr.bf16.mxu1 %v586_v28  ;;  %1294 = vrcp.f32 %v476_v2 }
  0x66   : > { %1296 = vrcp.f32 %v477_v12 }
  0x6c   : > { %1130 = vmatmul.mubr.bf16.gmra.mxu1 %v587_v32 }
  0x6d   : > { %1133 = vmatprep.mubr.bf16.mxu1 %v588_v50 }
  0x72   : > { %v1295_v15 = vpop.eup %1294 }
  0x73   : > { %v1297_v16 = vpop.eup %1296  ;;  %v572_v39 = vmul.f32 %v1295_v15, %v1603_v13 }
  0x74   : > { %v573_v45 = vmul.f32 %v1297_v16, %v1606_v49 }
  0x76   : > { %v589_v38 = vpack.c.bf16 %v573_v45, %v572_v39 }
  0x78   : > { %1134 = vmatmul.mubr.bf16.gmra.mxu1 %v589_v38 }
  0xfc   : > { %v1107_v27 = vpop.f32.mrf.mxu0 }
  0xfd   : > { %817 = vst [vmem:[%s1641_s30 + $0x10] sm:$0xff] %v1107_v27  ;;  %v888_v43 = vmul.f32 %v1107_v27, %v1107_v27 }
  0xfe   : > { %v688_v13 = vpop.f32.mrf.mxu0 }
  0xff   : > { %815 = vst [vmem:[%s1641_s30] sm:$0xff] %v688_v13  ;;  %v886_v19 = vmul.f32 %v688_v13, %v688_v13 }
 0x100   : > { %v1108_v49 = vpop.f32.mrf.mxu0 }
 0x101   : > { %818 = vst [vmem:[%s1641_s30 + $0x18] sm:$0xff] %v1108_v49  ;;  %v889_v54 = vmul.f32 %v1108_v49, %v1108_v49 }
 0x102   : > { %v691_v5 = vpop.f32.mrf.mxu0 }
 0x103   : > { %816 = vst [vmem:[%s1641_s30 + $0x8] sm:$0xff] %v691_v5  ;;  %v848_v9 = vadd.f32 %v691_v5, %v688_v13  ;;  %v887_v20 = vmul.f32 %v691_v5, %v691_v5 }
 0x104   : > { %v1111_v30 = vpop.f32.mrf.mxu0 }
 0x105   : > { %v849_v11 = vadd.f32 %v1107_v27, %v848_v9  ;;  %v918_v31 = vadd.f32 %v887_v20, %v886_v19  ;;  %821 = vst [vmem:[%s1641_s30 + $0x30] sm:$0xff] %v1111_v30  ;;  %v892_v53 = vmul.f32 %v1111_v30, %v1111_v30 }
 0x106   : > { %v704_v33 = vpop.f32.mrf.mxu0 }
 0x107   : > { %v919_v35 = vadd.f32 %v918_v31, %v888_v43  ;;  %819 = vst [vmem:[%s1641_s30 + $0x20] sm:$0xff] %v704_v33  ;;  %v850_v24 = vadd.f32 %v1108_v49, %v849_v11  ;;  %v890_v46 = vmul.f32 %v704_v33, %v704_v33 }
 0x108   : > { %v1112_v40 = vpop.f32.mrf.mxu0 }
 0x109   : > { %v851_v41 = vadd.f32 %v850_v24, %v704_v33  ;;  %v920_v59 = vadd.f32 %v919_v35, %v889_v54  ;;  %822 = vst [vmem:[%s1641_s30 + $0x38] sm:$0xff] %v1112_v40  ;;  %v893_v58 = vmul.f32 %v1112_v40, %v1112_v40 }
 0x10a   : > { %v707_v25 = vpop.f32.mrf.mxu0 }
 0x10b   : > { %v921_v47 = vadd.f32 %v920_v59, %v890_v46  ;;  %820 = vst [vmem:[%s1641_s30 + $0x28] sm:$0xff] %v707_v25  ;;  %v852_v17 = vadd.f32 %v851_v41, %v707_v25  ;;  %v891_v57 = vmul.f32 %v707_v25, %v707_v25 }
 0x10c   : > { %v1115_v51 = vpop.f32.mrf.mxu0 }
 0x10d   : > { %v853_v55 = vadd.f32 %v1111_v30, %v852_v17  ;;  %v922_v18 = vadd.f32 %v921_v47, %v891_v57  ;;  %825 = vst [vmem:[%s1641_s30 + $0x50] sm:$0xff] %v1115_v51  ;;  %v896_v1 = vmul.f32 %v1115_v51, %v1115_v51 }
 0x10e   : > { %v720_v29 = vpop.f32.mrf.mxu0 }
 0x10f   : > { %v923_v56 = vadd.f32 %v922_v18, %v892_v53  ;;  %823 = vst [vmem:[%s1641_s30 + $0x40] sm:$0xff] %v720_v29  ;;  %v854_v34 = vadd.f32 %v1112_v40, %v853_v55  ;;  %v894_v61 = vmul.f32 %v720_v29, %v720_v29 }
 0x110   : > { %v1116_v60 = vpop.f32.mrf.mxu0 }
 0x111   : > { %v855_v37 = vadd.f32 %v854_v34, %v720_v29  ;;  %v924_v22 = vadd.f32 %v923_v56, %v893_v58  ;;  %826 = vst [vmem:[%s1641_s30 + $0x58] sm:$0xff] %v1116_v60  ;;  %v897_v21 = vmul.f32 %v1116_v60, %v1116_v60 }
 0x112   : > { %v723_v62 = vpop.f32.mrf.mxu0 }
 0x113   : > { %v925_v42 = vadd.f32 %v924_v22, %v894_v61  ;;  %824 = vst [vmem:[%s1641_s30 + $0x48] sm:$0xff] %v723_v62  ;;  %v856_v0 = vadd.f32 %v855_v37, %v723_v62  ;;  %v895_v48 = vmul.f32 %v723_v62, %v723_v62 }
 0x115   : > { %v857_v63 = vadd.f32 %v1115_v51, %v856_v0  ;;  %v926_v52 = vadd.f32 %v925_v42, %v895_v48 }
 0x117   : > { %v927_v3 = vadd.f32 %v926_v52, %v896_v1  ;;  %v858_v23 = vadd.f32 %v1116_v60, %v857_v63 }
 0x118   : > { %v1119_v7 = vpop.f32.mrf.mxu0 }
 0x119   : > { %829 = vst [vmem:[%s1641_s30 + $0x70] sm:$0xff] %v1119_v7  ;;  %v928_v8 = vadd.f32 %v927_v3, %v897_v21  ;;  %v900_v15 = vmul.f32 %v1119_v7, %v1119_v7 }
 0x11a   : > { %v736_v28 = vpop.f32.mrf.mxu0 }
 0x11b   : > { %827 = vst [vmem:[%s1641_s30 + $0x60] sm:$0xff] %v736_v28  ;;  %v859_v10 = vadd.f32 %v858_v23, %v736_v28  ;;  %v898_v6 = vmul.f32 %v736_v28, %v736_v28 }
 0x11c   : > { %v1123_v2 = vpop.f32.mrf.mxu1  ;;  %v1120_v36 = vpop.f32.mrf.mxu0 }
 0x11d   : > { %v929_v44 = vadd.f32 %v928_v8, %v898_v6  ;;  %833 = vst [vmem:[%s1641_s30 + $0x90] sm:$0xff] %v1123_v2  ;;  %830 = vst [vmem:[%s1641_s30 + $0x78] sm:$0xff] %v1120_v36  ;;  %v901_v38 = vmul.f32 %v1120_v36, %v1120_v36  ;;  %v904_v31 = vmul.f32 %v1123_v2, %v1123_v2 }
 0x11e   : > { %v752_v12 = vpop.f32.mrf.mxu1  ;;  %v739_v14 = vpop.f32.mrf.mxu0 }
 0x11f   : > { %831 = vst [vmem:[%s1641_s30 + $0x80] sm:$0xff] %v752_v12  ;;  %828 = vst [vmem:[%s1641_s30 + $0x68] sm:$0xff] %v739_v14  ;;  %v860_v26 = vadd.f32 %v859_v10, %v739_v14  ;;  %v899_v32 = vmul.f32 %v739_v14, %v739_v14  ;;  %v902_v49 = vmul.f32 %v752_v12, %v752_v12 }
 0x120   : > { %v1124_v50 = vpop.f32.mrf.mxu1 }
 0x121   : > { %v861_v16 = vadd.f32 %v1119_v7, %v860_v26  ;;  %v930_v39 = vadd.f32 %v929_v44, %v899_v32  ;;  %834 = vst [vmem:[%s1641_s30 + $0x98] sm:$0xff] %v1124_v50  ;;  %v905_v24 = vmul.f32 %v1124_v50, %v1124_v50 }
 0x122   : > { %v755_v45 = vpop.f32.mrf.mxu1 }
 0x123   : > { %v862_v4 = vadd.f32 %v1120_v36, %v861_v16  ;;  %v931_v27 = vadd.f32 %v930_v39, %v900_v15  ;;  %832 = vst [vmem:[%s1641_s30 + $0x88] sm:$0xff] %v755_v45  ;;  %v903_v30 = vmul.f32 %v755_v45, %v755_v45 }
 0x124   : > { %v1127_v13 = vpop.f32.mrf.mxu1 }
 0x125   : > { %v932_v5 = vadd.f32 %v931_v27, %v901_v38  ;;  %v863_v19 = vadd.f32 %v862_v4, %v752_v12  ;;  %837 = vst [vmem:[%s1641_s30 + $0xb0] sm:$0xff] %v1127_v13  ;;  %v908_v18 = vmul.f32 %v1127_v13, %v1127_v13 }
 0x126   : > { %v768_v9 = vpop.f32.mrf.mxu1 }
 0x127   : > { %v864_v20 = vadd.f32 %v863_v19, %v755_v45  ;;  %v933_v43 = vadd.f32 %v932_v5, %v902_v49  ;;  %835 = vst [vmem:[%s1641_s30 + $0xa0] sm:$0xff] %v768_v9  ;;  %v906_v25 = vmul.f32 %v768_v9, %v768_v9 }
 0x128   : > { %v1128_v11 = vpop.f32.mrf.mxu1 }
 0x129   : > { %v865_v33 = vadd.f32 %v1123_v2, %v864_v20  ;;  %v934_v54 = vadd.f32 %v933_v43, %v903_v30  ;;  %838 = vst [vmem:[%s1641_s30 + $0xb8] sm:$0xff] %v1128_v11  ;;  %v909_v34 = vmul.f32 %v1128_v11, %v1128_v11 }
 0x12a   : > { %v771_v35 = vpop.f32.mrf.mxu1 }
 0x12b   : > { %v935_v40 = vadd.f32 %v934_v54, %v904_v31  ;;  %v866_v41 = vadd.f32 %v1124_v50, %v865_v33  ;;  %836 = vst [vmem:[%s1641_s30 + $0xa8] sm:$0xff] %v771_v35  ;;  %v907_v53 = vmul.f32 %v771_v35, %v771_v35 }
 0x12c   : > { %v1131_v46 = vpop.f32.mrf.mxu1 }
 0x12d   : > { %v867_v59 = vadd.f32 %v866_v41, %v768_v9  ;;  %v936_v47 = vadd.f32 %v935_v40, %v905_v24  ;;  %841 = vst [vmem:[%s1641_s30 + $0xd0] sm:$0xff] %v1131_v46  ;;  %v912_v63 = vmul.f32 %v1131_v46, %v1131_v46 }
 0x12e   : > { %v784_v17 = vpop.f32.mrf.mxu1 }
 0x12f   : > { %v937_v57 = vadd.f32 %v936_v47, %v906_v25  ;;  %v868_v51 = vadd.f32 %v867_v59, %v771_v35  ;;  %839 = vst [vmem:[%s1641_s30 + $0xc0] sm:$0xff] %v784_v17  ;;  %v910_v22 = vmul.f32 %v784_v17, %v784_v17 }
 0x130   : > { %v1132_v55 = vpop.f32.mrf.mxu1 }
 0x131   : > { %v869_v29 = vadd.f32 %v1127_v13, %v868_v51  ;;  %v938_v58 = vadd.f32 %v937_v57, %v907_v53  ;;  %842 = vst [vmem:[%s1641_s30 + $0xd8] sm:$0xff] %v1132_v55  ;;  %v913_v23 = vmul.f32 %v1132_v55, %v1132_v55 }
 0x132   : > { %v787_v56 = vpop.f32.mrf.mxu1 }
 0x133   : > { %v939_v60 = vadd.f32 %v938_v58, %v908_v18  ;;  %v870_v37 = vadd.f32 %v1128_v11, %v869_v29  ;;  %840 = vst [vmem:[%s1641_s30 + $0xc8] sm:$0xff] %v787_v56  ;;  %v911_v48 = vmul.f32 %v787_v56, %v787_v56 }
 0x135   : > { %v871_v61 = vadd.f32 %v870_v37, %v784_v17  ;;  %v940_v62 = vadd.f32 %v939_v60, %v909_v34 }
 0x137   : > { %v941_v42 = vadd.f32 %v940_v62, %v910_v22  ;;  %v872_v0 = vadd.f32 %v871_v61, %v787_v56 }
 0x138   : > { %v1135_v1 = vpop.f32.mrf.mxu1 }
 0x139   : > { %v873_v52 = vadd.f32 %v1131_v46, %v872_v0  ;;  %v942_v21 = vadd.f32 %v941_v42, %v911_v48  ;;  %845 = vst [vmem:[%s1641_s30 + $0xf0] sm:$0xff] %v1135_v1  ;;  %v916_v26 = vmul.f32 %v1135_v1, %v1135_v1 }
 0x13a   : > { %v800_v3 = vpop.f32.mrf.mxu1 }
 0x13b   : > { %v943_v7 = vadd.f32 %v942_v21, %v912_v63  ;;  %843 = vst [vmem:[%s1641_s30 + $0xe0] sm:$0xff] %v800_v3  ;;  %v874_v8 = vadd.f32 %v1132_v55, %v873_v52  ;;  %v914_v6 = vmul.f32 %v800_v3, %v800_v3 }
 0x13c   : > { %v1136_v28 = vpop.f32.mrf.mxu1 }
 0x13d   : > { %v875_v10 = vadd.f32 %v874_v8, %v800_v3  ;;  %v944_v2 = vadd.f32 %v943_v7, %v913_v23  ;;  %846 = vst [vmem:[%s1641_s30 + $0xf8] sm:$0xff] %v1136_v28  ;;  %v917_v15 = vmul.f32 %v1136_v28, %v1136_v28 }
 0x13e   : > { %v803_v36 = vpop.f32.mrf.mxu1 }
 0x13f   : > { %v945_v44 = vadd.f32 %v944_v2, %v914_v6  ;;  %844 = vst [vmem:[%s1641_s30 + $0xe8] sm:$0xff] %v803_v36  ;;  %v876_v12 = vadd.f32 %v875_v10, %v803_v36  ;;  %v915_v14 = vmul.f32 %v803_v36, %v803_v36 }
 0x141   : > { %v877_v32 = vadd.f32 %v1135_v1, %v876_v12  ;;  %v946_v50 = vadd.f32 %v945_v44, %v915_v14 }
 0x143   : > { %v878_v16 = vadd.f32 %v1136_v28, %v877_v32  ;;  %v947_v39 = vadd.f32 %v946_v50, %v916_v26 }
 0x145   : > { %v879_v45 = vrot.slane %v878_v16, 4  ;;  %v948_v38 = vadd.f32 %v947_v39, %v917_v15 }
 0x147   : > { %v880_v4 = vadd.f32 %v879_v45, %v878_v16  ;;  %v949_v27 = vrot.slane %v948_v38, 4 }
 0x149   : > { %v881_v13 = vrot.slane %v880_v4, 2  ;;  %v950_v49 = vadd.f32 %v949_v27, %v948_v38 }
 0x14b   : > { %v882_v5 = vadd.f32 %v881_v13, %v880_v4  ;;  %v951_v19 = vrot.slane %v950_v49, 2 }
 0x14d   : > { %v883_v9 = vrot.slane %v882_v5, 1  ;;  %v952_v20 = vadd.f32 %v951_v19, %v950_v49 }
 0x14f   : > { %v884_v30 = vadd.f32 %v883_v9, %v882_v5  ;;  %v953_v43 = vrot.slane %v952_v20, 1 }
 0x151   : > { %885 = vst [vmem:[%s1633_s26] sm:$0x1] %v884_v30  ;;  %v954_v11 = vadd.f32 %v953_v43, %v952_v20 }
 0x153   : > { %955 = vst [vmem:[%s1633_s26 + $0x1] sm:$0x1] %v954_v11 }
 0x154 PF: > { %s16_s18 = sadd.s32 1, %s1304_s18  }
 0x155   : > { %p13_p5 = scmp.ge.s32.totalorder %s16_s18, 4  }
 0x157   :  { %15 = sbr.rel (!%p13_p5) target bundleno = 1 (0x1), region = 78 }

// kernel: res_unit_n_forward.9
= control target key start
LH: loop header
LB: loop body
LE: loop exit
PB: predicated region body
PF: predicated region fallthrough
CT: control target
= control target key end

     0   :  { %s905_s15 = smov 0   ;;  %s1261_s0 = inlined_call_operand.vmem [shape: f32[512,128], index: 0, kind: input, shape index: {}]   ;;  %s1262_s1 = inlined_call_operand.vmem [shape: f32[1,128], index: 1, kind: input, shape index: {}]   ;;  %s1263_s2 = inlined_call_operand.vmem [shape: f32[1,128], index: 2, kind: input, shape index: {}]   ;;  %s1264_s3 = inlined_call_operand.vmem [shape: f32[512,128], index: 3, kind: input, shape index: {}]   ;;  %s1265_s4 = inlined_call_operand.vmem [shape: f32[512,128], index: 4, kind: output, shape index: {}]  }
   0x1 LB: > { %s721_s16 = sadd.s32 4294967295, %s878_s15   ;;  %p725_p0 = scmp.ge.s32.totalorder %s878_s15, 1  ;;  %s878_s15 = sphi %s905_s15, %s14_s15  }
   0x2   : > { %p174_p1 = scmp.lt.s32.totalorder %s878_s15, 3 }
   0x4   : > { %p175_p2 = pnand %p725_p0, %p174_p1 }
   0x5   : > { %s726_s17 = sshll.u32 (!%p175_p2), %s721_s16, 5 }
   0x6   : > { %178 = sbr.rel (%p175_p2) target bundleno = 121 (0x79), region = 36  ;;  %p206_p3 = scmp.lt.s32.totalorder (!%p175_p2), %s726_s17, 63 }
   0xb   : > { %s1267_s17 = smov (!%p206_p3, %s726_s17), 63  ;;  %v918_v0 = vld [vmem:[%s1262_s1] ss:$0 sm:$0xff] }
   0xc   : > { %s913_s18 = sshll.u32 %s1267_s17, 3  ;;  %v930_v2 = vld [vmem:[%s1263_s2] ss:$0 sm:$0xff] }
   0xd   : > { %s924_s23 = scalar_lea.vmem %s1261_s0, %s913_s18  ;;  %s1093_s28 = scalar_lea.vmem %s1264_s3, %s913_s18 }
   0xe   : > { %v223_v1 = vld [vmem:[%s924_s23] sm:$0xff]  ;;  %v224_v3 = vld [vmem:[%s924_s23 + $0x8] sm:$0xff]  ;;  %v225_v6 = vld [vmem:[%s924_s23 + $0x10] sm:$0xff]  ;;  %s1122_s5 = scalar_lea.vmem %s1265_s4, %s913_s18 }
   0xf   : > { %v262_v4 = vmul.f32 %v918_v0, %v223_v1  ;;  %v263_v5 = vmul.f32 %v918_v0, %v224_v3  ;;  %v264_v7 = vmul.f32 %v918_v0, %v225_v6  ;;  %v226_v8 = vld [vmem:[%s924_s23 + $0x18] sm:$0xff]  ;;  %v227_v9 = vld [vmem:[%s924_s23 + $0x20] sm:$0xff]  ;;  %v228_v14 = vld [vmem:[%s924_s23 + $0x28] sm:$0xff] }
  0x10   : > { %v265_v12 = vmul.f32 %v918_v0, %v226_v8  ;;  %v266_v13 = vmul.f32 %v918_v0, %v227_v9  ;;  %v267_v16 = vmul.f32 %v918_v0, %v228_v14  ;;  %v229_v17 = vld [vmem:[%s924_s23 + $0x30] sm:$0xff]  ;;  %v230_v18 = vld [vmem:[%s924_s23 + $0x38] sm:$0xff]  ;;  %v231_v27 = vld [vmem:[%s924_s23 + $0x40] sm:$0xff] }
  0x11   : > { %v940_v10 = vadd.f32 %v930_v2, %v262_v4  ;;  %v943_v11 = vadd.f32 %v930_v2, %v263_v5  ;;  %v949_v15 = vadd.f32 %v930_v2, %v264_v7  ;;  %v268_v25 = vmul.f32 %v918_v0, %v229_v17  ;;  %v232_v36 = vld [vmem:[%s924_s23 + $0x48] sm:$0xff]  ;;  %v233_v37 = vld [vmem:[%s924_s23 + $0x50] sm:$0xff]  ;;  %v234_v41 = vld [vmem:[%s924_s23 + $0x58] sm:$0xff] }
  0x12   : > { %v957_v21 = vadd.f32 %v930_v2, %v265_v12  ;;  %v960_v22 = vadd.f32 %v930_v2, %v266_v13  ;;  %v964_v24 = vadd.f32 %v930_v2, %v267_v16  ;;  %v269_v26 = vmul.f32 %v918_v0, %v230_v18  ;;  %v235_v48 = vld [vmem:[%s924_s23 + $0x60] sm:$0xff]  ;;  %v236_v49 = vld [vmem:[%s924_s23 + $0x68] sm:$0xff]  ;;  %v237_v59 = vld [vmem:[%s924_s23 + $0x70] sm:$0xff] }
  0x13   : > { %v333_v19 = vsub.f32 0.0, %v940_v10  ;;  %v334_v20 = vsub.f32 0.0, %v943_v11  ;;  %v335_v23 = vsub.f32 0.0, %v949_v15  ;;  %v973_v34 = vadd.f32 %v930_v2, %v268_v25  ;;  %v238_v63 = vld [vmem:[%s924_s23 + $0x78] sm:$0xff]  ;;  %v239_v5 = vld [vmem:[%s924_s23 + $0x80] sm:$0xff]  ;;  %v240_v6 = vld [vmem:[%s924_s23 + $0x88] sm:$0xff] }
  0x14   : > { %v336_v30 = vsub.f32 0.0, %v957_v21  ;;  %v337_v31 = vsub.f32 0.0, %v960_v22  ;;  %v338_v33 = vsub.f32 0.0, %v964_v24  ;;  %v976_v35 = vadd.f32 %v930_v2, %v269_v26 }
  0x15   : > { %v365_v28 = vmul.f32 1.442695, %v333_v19  ;;  %v367_v29 = vmul.f32 1.442695, %v334_v20  ;;  %v369_v32 = vmul.f32 1.442695, %v335_v23  ;;  %v270_v40 = vmul.f32 %v918_v0, %v231_v27 }
  0x16   : > { %v371_v38 = vmul.f32 1.442695, %v336_v30  ;;  %v373_v39 = vmul.f32 1.442695, %v337_v31  ;;  %v375_v42 = vmul.f32 1.442695, %v338_v33  ;;  %v271_v46 = vmul.f32 %v918_v0, %v232_v36 }
  0x17   : > { %744 = vpow2.f32 %v365_v28  ;;  %v339_v43 = vsub.f32 0.0, %v973_v34  ;;  %v340_v44 = vsub.f32 0.0, %v976_v35  ;;  %v985_v45 = vadd.f32 %v930_v2, %v270_v40  ;;  %v241_v20 = vld [vmem:[%s924_s23 + $0x90] sm:$0xff]  ;;  %v242_v23 = vld [vmem:[%s924_s23 + $0x98] sm:$0xff] }
  0x18   : > { %746 = vpow2.f32 %v367_v29  ;;  %v272_v47 = vmul.f32 %v918_v0, %v233_v37  ;;  %v273_v52 = vmul.f32 %v918_v0, %v234_v41  ;;  %v994_v54 = vadd.f32 %v930_v2, %v271_v46  ;;  %v243_v46 = vld [vmem:[%s924_s23 + $0xa0] sm:$0xff] }
  0x19   : > { %748 = vpow2.f32 %v369_v32  ;;  %v377_v50 = vmul.f32 1.442695, %v339_v43  ;;  %v379_v51 = vmul.f32 1.442695, %v340_v44  ;;  %v341_v53 = vsub.f32 0.0, %v985_v45 }
  0x1a   : > { %750 = vpow2.f32 %v371_v38  ;;  %v997_v55 = vadd.f32 %v930_v2, %v272_v47  ;;  %v1000_v56 = vadd.f32 %v930_v2, %v273_v52  ;;  %v274_v57 = vmul.f32 %v918_v0, %v235_v48 }
  0x1b   : > { %752 = vpow2.f32 %v373_v39  ;;  %v275_v58 = vmul.f32 %v918_v0, %v236_v49  ;;  %v381_v60 = vmul.f32 1.442695, %v341_v53  ;;  %v342_v61 = vsub.f32 0.0, %v994_v54 }
  0x1c   : > { %754 = vpow2.f32 %v375_v42  ;;  %v343_v62 = vsub.f32 0.0, %v997_v55  ;;  %v344_v1 = vsub.f32 0.0, %v1000_v56  ;;  %v1010_v3 = vadd.f32 %v930_v2, %v274_v57 }
  0x1d   : > { %756 = vpow2.f32 %v377_v50  ;;  %v1013_v4 = vadd.f32 %v930_v2, %v275_v58  ;;  %v383_v7 = vmul.f32 1.442695, %v342_v61  ;;  %v276_v9 = vmul.f32 %v918_v0, %v237_v59 }
  0x1e   : > { %758 = vpow2.f32 %v379_v51  ;;  %v385_v8 = vmul.f32 1.442695, %v343_v62  ;;  %v387_v12 = vmul.f32 1.442695, %v344_v1  ;;  %v345_v13 = vsub.f32 0.0, %v1010_v3  ;;  %v244_v51 = vld [vmem:[%s924_s23 + $0xa8] sm:$0xff] }
  0x1f   : > { %760 = vpow2.f32 %v381_v60  ;;  %v346_v14 = vsub.f32 0.0, %v1013_v4  ;;  %v277_v16 = vmul.f32 %v918_v0, %v238_v63  ;;  %v1022_v17 = vadd.f32 %v930_v2, %v276_v9  ;;  %v245_v63 = vld [vmem:[%s924_s23 + $0xb0] sm:$0xff] }
  0x20   : > { %762 = vpow2.f32 %v383_v7  ;;  %v278_v18 = vmul.f32 %v918_v0, %v239_v5  ;;  %v279_v19 = vmul.f32 %v918_v0, %v240_v6  ;;  %v389_v25 = vmul.f32 1.442695, %v345_v13 }
  0x21   : > { %764 = vpow2.f32 %v385_v8  ;;  %v391_v26 = vmul.f32 1.442695, %v346_v14  ;;  %v1029_v27 = vadd.f32 %v930_v2, %v277_v16  ;;  %v347_v28 = vsub.f32 0.0, %v1022_v17  ;;  %v246_v8 = vld [vmem:[%s924_s23 + $0xb8] sm:$0xff]  ;;  %v247_v16 = vld [vmem:[%s924_s23 + $0xc0] sm:$0xff] }
  0x22   : > { %766 = vpow2.f32 %v387_v12  ;;  %v1033_v29 = vadd.f32 %v930_v2, %v278_v18  ;;  %v1036_v30 = vadd.f32 %v930_v2, %v279_v19  ;;  %v280_v33 = vmul.f32 %v918_v0, %v241_v20 }
  0x23   : > { %768 = vpow2.f32 %v389_v25  ;;  %v348_v32 = vsub.f32 0.0, %v1029_v27  ;;  %v281_v36 = vmul.f32 %v918_v0, %v242_v23  ;;  %v393_v42 = vmul.f32 1.442695, %v347_v28 }
  0x24   : > { %v745_v31 = vpop.eup %744  ;;  %770 = vpow2.f32 %v391_v26  ;;  %v349_v39 = vsub.f32 0.0, %v1033_v29  ;;  %v350_v43 = vsub.f32 0.0, %v1036_v30  ;;  %v1044_v44 = vadd.f32 %v930_v2, %v280_v33 }
  0x25   : > { %v747_v37 = vpop.eup %746  ;;  %v429_v38 = vadd.f32 1.0, %v745_v31  ;;  %v1047_v49 = vmul.f32 1.442695, %v348_v32  ;;  %v1050_v50 = vadd.f32 %v930_v2, %v281_v36  ;;  %v282_v62 = vmul.f32 %v918_v0, %v243_v46 }
  0x26   : > { %v749_v40 = vpop.eup %748  ;;  %v430_v41 = vadd.f32 1.0, %v747_v37  ;;  %v1053_v57 = vmul.f32 1.442695, %v349_v39  ;;  %v351_v58 = vsub.f32 0.0, %v1044_v44  ;;  %v1056_v61 = vmul.f32 1.442695, %v350_v43 }
  0x27   : > { %v751_v47 = vpop.eup %750  ;;  %772 = vrcp.f32 %v429_v38  ;;  %v431_v48 = vadd.f32 1.0, %v749_v40  ;;  %v352_v6 = vsub.f32 0.0, %v1050_v50  ;;  %v283_v7 = vmul.f32 %v918_v0, %v244_v51 }
  0x28   : > { %v753_v52 = vpop.eup %752  ;;  %774 = vrcp.f32 %v430_v41  ;;  %v432_v53 = vadd.f32 1.0, %v751_v47  ;;  %v1063_v13 = vmul.f32 1.442695, %v351_v58  ;;  %v1066_v14 = vadd.f32 %v930_v2, %v282_v62  ;;  %v248_v41 = vld [vmem:[%s924_s23 + $0xc8] sm:$0xff] }
  0x29   : > { %v755_v59 = vpop.eup %754  ;;  %776 = vrcp.f32 %v431_v48  ;;  %v433_v60 = vadd.f32 1.0, %v753_v52  ;;  %v1070_v20 = vadd.f32 %v930_v2, %v283_v7  ;;  %v284_v23 = vmul.f32 %v918_v0, %v245_v63 }
  0x2a   : > { %v757_v1 = vpop.eup %756  ;;  %778 = vrcp.f32 %v432_v53  ;;  %v434_v5 = vadd.f32 1.0, %v755_v59  ;;  %v353_v26 = vsub.f32 0.0, %v1066_v14  ;;  %v285_v28 = vmul.f32 %v918_v0, %v246_v8  ;;  %v249_v59 = vld [vmem:[%s924_s23 + $0xd0] sm:$0xff] }
  0x2b   : > { %v759_v9 = vpop.eup %758  ;;  %780 = vrcp.f32 %v433_v60  ;;  %v435_v12 = vadd.f32 1.0, %v757_v1  ;;  %v354_v32 = vsub.f32 0.0, %v1070_v20  ;;  %v1077_v33 = vadd.f32 %v930_v2, %v284_v23 }
  0x2c   : > { %v761_v18 = vpop.eup %760  ;;  %782 = vrcp.f32 %v434_v5  ;;  %v436_v19 = vadd.f32 1.0, %v759_v9  ;;  %v286_v36 = vmul.f32 %v918_v0, %v247_v16  ;;  %v1080_v39 = vmul.f32 1.442695, %v352_v6  ;;  %v557_v9 = vld [vmem:[%s1093_s28] sm:$0xff] }
  0x2d   : > { %784 = vrcp.f32 %v435_v12  ;;  %v437_v25 = vadd.f32 1.0, %v761_v18  ;;  %v763_v31 = vpop.eup %762  ;;  %v1083_v40 = vadd.f32 %v930_v2, %v285_v28  ;;  %v1086_v47 = vmul.f32 1.442695, %v353_v26 }
  0x2e   : > { %786 = vrcp.f32 %v436_v19  ;;  %v765_v37 = vpop.eup %764  ;;  %v438_v38 = vadd.f32 1.0, %v763_v31  ;;  %v355_v48 = vsub.f32 0.0, %v1077_v33  ;;  %v1097_v58 = vadd.f32 %v930_v2, %v286_v36  ;;  %v251_v31 = vld [vmem:[%s924_s23 + $0xe0] sm:$0xff] }
  0x2f   : > { %788 = vrcp.f32 %v437_v25  ;;  %v767_v43 = vpop.eup %766  ;;  %v439_v46 = vadd.f32 1.0, %v765_v37  ;;  %v356_v53 = vsub.f32 0.0, %v1083_v40  ;;  %v1101_v63 = vmul.f32 1.442695, %v354_v32  ;;  %v558_v25 = vld [vmem:[%s1093_s28 + $0x8] sm:$0xff]  ;;  %v559_v37 = vld [vmem:[%s1093_s28 + $0x10] sm:$0xff] }
  0x30   : > { %790 = vpow2.f32 %v393_v42  ;;  %v769_v51 = vpop.eup %768  ;;  %v440_v52 = vadd.f32 1.0, %v767_v43  ;;  %v250_v42 = vld [vmem:[%s924_s23 + $0xd8] sm:$0xff]  ;;  %v287_v1 = vmul.f32 %v918_v0, %v248_v41  ;;  %v1104_v6 = vmul.f32 1.442695, %v355_v48 }
  0x31   : > { %792 = vrcp.f32 %v438_v38  ;;  %v771_v60 = vpop.eup %770  ;;  %v441_v62 = vadd.f32 1.0, %v769_v51  ;;  %v357_v7 = vsub.f32 0.0, %v1097_v58  ;;  %v288_v16 = vmul.f32 %v918_v0, %v249_v59  ;;  %v560_v48 = vld [vmem:[%s1093_s28 + $0x18] sm:$0xff] }
  0x32   : > { %794 = vrcp.f32 %v439_v46  ;;  %v442_v5 = vadd.f32 1.0, %v771_v60  ;;  %v1109_v12 = vadd.f32 %v930_v2, %v287_v1  ;;  %v289_v18 = vmul.f32 %v918_v0, %v250_v42  ;;  %v562_v60 = vld [vmem:[%s1093_s28 + $0x28] sm:$0xff] }
  0x33   : > { %796 = vrcp.f32 %v440_v52  ;;  %v411_v26 = vmul.f32 1.442695, %v356_v53  ;;  %v1115_v28 = vmul.f32 1.442695, %v357_v7  ;;  %v1129_v38 = vadd.f32 %v930_v2, %v288_v16  ;;  %v561_v53 = vld [vmem:[%s1093_s28 + $0x20] sm:$0xff] }
  0x34   : > { %v773_v8 = vpop.eup %772  ;;  %798 = vrcp.f32 %v441_v62  ;;  %v290_v59 = vmul.f32 %v918_v0, %v251_v31 }
  0x35   : > { %v775_v19 = vpop.eup %774  ;;  %v525_v23 = vmul.f32 %v773_v8, %v940_v10  ;;  %800 = vrcp.f32 %v442_v5  ;;  %v358_v10 = vsub.f32 0.0, %v1109_v12  ;;  %v359_v62 = vsub.f32 0.0, %v1129_v38  ;;  %v563_v5 = vld [vmem:[%s1093_s28 + $0x30] sm:$0xff] }
  0x36   : > { %v777_v32 = vpop.eup %776  ;;  %v526_v36 = vmul.f32 %v775_v19, %v943_v11  ;;  %802 = vpow2.f32 %v1047_v49  ;;  %v1135_v11 = vadd.f32 %v930_v2, %v289_v18  ;;  %v565_v19 = vld [vmem:[%s1093_s28 + $0x40] sm:$0xff] }
  0x37   : > { %v779_v41 = vpop.eup %778  ;;  %v589_v43 = vadd.f32 %v557_v9, %v525_v23  ;;  %v527_v46 = vmul.f32 %v777_v32, %v949_v15  ;;  %804 = vpow2.f32 %v1053_v57  ;;  %v564_v9 = vld [vmem:[%s1093_s28 + $0x38] sm:$0xff]  ;;  %v415_v16 = vmul.f32 1.442695, %v358_v10  ;;  %v252_v32 = vld [vmem:[%s924_s23 + $0xe8] sm:$0xff] }
  0x38   : > { %v781_v51 = vpop.eup %780  ;;  %v590_v49 = vadd.f32 %v558_v25, %v526_v36  ;;  %v528_v52 = vmul.f32 %v779_v41, %v957_v21  ;;  %806 = vpow2.f32 %v1056_v61  ;;  %v360_v7 = vsub.f32 0.0, %v1135_v11 }
  0x39   : > { %v783_v42 = vpop.eup %782  ;;  %621 = vst [vmem:[%s1122_s5] sm:$0xff] %v589_v43  ;;  %v591_v15 = vadd.f32 %v559_v37, %v527_v46  ;;  %v529_v57 = vmul.f32 %v781_v51, %v960_v22  ;;  %808 = vpow2.f32 %v1063_v13  ;;  %v417_v23 = vmul.f32 1.442695, %v359_v62  ;;  %v567_v43 = vld [vmem:[%s1093_s28 + $0x50] sm:$0xff] }
  0x3a   : > { %v785_v1 = vpop.eup %784  ;;  %622 = vst [vmem:[%s1122_s5 + $0x8] sm:$0xff] %v590_v49  ;;  %v592_v21 = vadd.f32 %v560_v48, %v528_v52  ;;  %v530_v61 = vmul.f32 %v783_v42, %v964_v24  ;;  %810 = vpow2.f32 %v1080_v39  ;;  %v419_v10 = vmul.f32 1.442695, %v360_v7 }
  0x3b   : > { %v787_v8 = vpop.eup %786  ;;  %623 = vst [vmem:[%s1122_s5 + $0x10] sm:$0xff] %v591_v15  ;;  %v593_v22 = vadd.f32 %v561_v53, %v529_v57  ;;  %v531_v13 = vmul.f32 %v785_v1, %v973_v34  ;;  %812 = vpow2.f32 %v1086_v47  ;;  %v1163_v47 = vadd.f32 %v930_v2, %v290_v59  ;;  %v570_v57 = vld [vmem:[%s1093_s28 + $0x68] sm:$0xff] }
  0x3c   : > { %v789_v18 = vpop.eup %788  ;;  %624 = vst [vmem:[%s1122_s5 + $0x18] sm:$0xff] %v592_v21  ;;  %v594_v24 = vadd.f32 %v562_v60, %v530_v61  ;;  %v532_v39 = vmul.f32 %v787_v8, %v976_v35  ;;  %814 = vpow2.f32 %v1101_v63  ;;  %v566_v63 = vld [vmem:[%s1093_s28 + $0x48] sm:$0xff]  ;;  %v291_v49 = vmul.f32 %v918_v0, %v252_v32  ;;  %v253_v60 = vld [vmem:[%s924_s23 + $0xf0] sm:$0xff] }
  0x3d   : > { %v791_v25 = vpop.eup %790  ;;  %625 = vst [vmem:[%s1122_s5 + $0x20] sm:$0xff] %v593_v22  ;;  %v595_v34 = vadd.f32 %v563_v5, %v531_v13  ;;  %v533_v31 = vmul.f32 %v789_v18, %v985_v45  ;;  %816 = vpow2.f32 %v1104_v6  ;;  %v361_v46 = vsub.f32 0.0, %v1163_v47 }
  0x3e   : > { %v793_v36 = vpop.eup %792  ;;  %626 = vst [vmem:[%s1122_s5 + $0x28] sm:$0xff] %v594_v24  ;;  %v596_v35 = vadd.f32 %v564_v9, %v532_v39  ;;  %v443_v37 = vadd.f32 1.0, %v791_v25  ;;  %818 = vpow2.f32 %v411_v26  ;;  %v568_v26 = vld [vmem:[%s1093_s28 + $0x58] sm:$0xff]  ;;  %v292_v9 = vmul.f32 %v918_v0, %v253_v60 }
  0x3f   : > { %v795_v41 = vpop.eup %794  ;;  %627 = vst [vmem:[%s1122_s5 + $0x30] sm:$0xff] %v595_v34  ;;  %v597_v45 = vadd.f32 %v565_v19, %v533_v31  ;;  %v534_v6 = vmul.f32 %v793_v36, %v994_v54  ;;  %820 = vpow2.f32 %v1115_v28  ;;  %v569_v28 = vld [vmem:[%s1093_s28 + $0x60] sm:$0xff]  ;;  %v421_v59 = vmul.f32 1.442695, %v361_v46  ;;  %v572_v60 = vld [vmem:[%s1093_s28 + $0x78] sm:$0xff] }
  0x40   : > { %v797_v48 = vpop.eup %796  ;;  %628 = vst [vmem:[%s1122_s5 + $0x38] sm:$0xff] %v596_v35  ;;  %v535_v51 = vmul.f32 %v795_v41, %v997_v55  ;;  %822 = vrcp.f32 %v443_v37  ;;  %v1197_v32 = vadd.f32 %v930_v2, %v292_v9 }
  0x41   : > { %v799_v52 = vpop.eup %798  ;;  %629 = vst [vmem:[%s1122_s5 + $0x40] sm:$0xff] %v597_v45  ;;  %v598_v53 = vadd.f32 %v566_v63, %v534_v6  ;;  %v536_v54 = vmul.f32 %v797_v48, %v1000_v56  ;;  %824 = vpow2.f32 %v415_v16  ;;  %v254_v56 = vld [vmem:[%s924_s23 + $0xf8] sm:$0xff] }
  0x42   : > { %v801_v42 = vpop.eup %800  ;;  %v599_v15 = vadd.f32 %v567_v43, %v535_v51  ;;  %v537_v55 = vmul.f32 %v799_v52, %v1010_v3  ;;  %826 = vpow2.f32 %v417_v23  ;;  %v1188_v3 = vadd.f32 %v930_v2, %v291_v49  ;;  %v571_v43 = vld [vmem:[%s1093_s28 + $0x70] sm:$0xff] }
  0x43   : > { %v803_v62 = vpop.eup %802  ;;  %630 = vst [vmem:[%s1122_s5 + $0x48] sm:$0xff] %v598_v53  ;;  %v600_v1 = vadd.f32 %v568_v26, %v536_v54  ;;  %v538_v21 = vmul.f32 %v801_v42, %v1013_v4  ;;  %828 = vpow2.f32 %v419_v10  ;;  %v293_v18 = vmul.f32 %v918_v0, %v254_v56 }
  0x44   : > { %v805_v61 = vpop.eup %804  ;;  %631 = vst [vmem:[%s1122_s5 + $0x50] sm:$0xff] %v599_v15  ;;  %v601_v5 = vadd.f32 %v569_v28, %v537_v55  ;;  %v444_v7 = vadd.f32 1.0, %v803_v62  ;;  %830 = vpow2.f32 %v421_v59  ;;  %v362_v25 = vsub.f32 0.0, %v1188_v3 }
  0x45   : > { %v807_v8 = vpop.eup %806  ;;  %632 = vst [vmem:[%s1122_s5 + $0x58] sm:$0xff] %v600_v1  ;;  %v602_v22 = vadd.f32 %v570_v57, %v538_v21  ;;  %v445_v13 = vadd.f32 1.0, %v805_v61  ;;  %v1200_v0 = vadd.f32 %v930_v2, %v293_v18  ;;  %v363_v48 = vsub.f32 0.0, %v1197_v32  ;;  %v573_v21 = vld [vmem:[%s1093_s28 + $0x80] sm:$0xff] }
  0x46   : > { %v809_v16 = vpop.eup %808  ;;  %633 = vst [vmem:[%s1122_s5 + $0x60] sm:$0xff] %v601_v5  ;;  %832 = vrcp.f32 %v444_v7  ;;  %v446_v4 = vadd.f32 1.0, %v807_v8  ;;  %v423_v45 = vmul.f32 1.442695, %v362_v25  ;;  %v574_v5 = vld [vmem:[%s1093_s28 + $0x88] sm:$0xff] }
  0x47   : > { %v811_v24 = vpop.eup %810  ;;  %634 = vst [vmem:[%s1122_s5 + $0x68] sm:$0xff] %v602_v22  ;;  %834 = vrcp.f32 %v445_v13  ;;  %v447_v39 = vadd.f32 1.0, %v809_v16  ;;  %v364_v2 = vsub.f32 0.0, %v1200_v0  ;;  %v425_v15 = vmul.f32 1.442695, %v363_v48  ;;  %v575_v13 = vld [vmem:[%s1093_s28 + $0x90] sm:$0xff] }
  0x48   : > { %v813_v19 = vpop.eup %812  ;;  %836 = vrcp.f32 %v446_v4  ;;  %v448_v23 = vadd.f32 1.0, %v811_v24  ;;  %v576_v4 = vld [vmem:[%s1093_s28 + $0x98] sm:$0xff]  ;;  %v578_v25 = vld [vmem:[%s1093_s28 + $0xa8] sm:$0xff] }
  0x49   : > { %v815_v34 = vpop.eup %814  ;;  %838 = vrcp.f32 %v447_v39  ;;  %v449_v31 = vadd.f32 1.0, %v813_v19  ;;  %v427_v55 = vmul.f32 1.442695, %v364_v2  ;;  %v577_v39 = vld [vmem:[%s1093_s28 + $0xa0] sm:$0xff]  ;;  %v582_v48 = vld [vmem:[%s1093_s28 + $0xc8] sm:$0xff] }
  0x4a   : > { %v817_v36 = vpop.eup %816  ;;  %840 = vrcp.f32 %v448_v23  ;;  %v450_v35 = vadd.f32 1.0, %v815_v34 }
  0x4b   : > { %v819_v63 = vpop.eup %818  ;;  %842 = vrcp.f32 %v449_v31  ;;  %v451_v37 = vadd.f32 1.0, %v817_v36  ;;  %v579_v36 = vld [vmem:[%s1093_s28 + $0xb0] sm:$0xff] }
  0x4c   : > { %v821_v10 = vpop.eup %820  ;;  %844 = vrcp.f32 %v450_v35  ;;  %v452_v41 = vadd.f32 1.0, %v819_v63 }
  0x4d   : > { %v823_v6 = vpop.eup %822  ;;  %846 = vrcp.f32 %v451_v37  ;;  %v453_v46 = vadd.f32 1.0, %v821_v10  ;;  %v580_v37 = vld [vmem:[%s1093_s28 + $0xb8] sm:$0xff] }
  0x4e   : > { %v825_v51 = vpop.eup %824  ;;  %v539_v26 = vmul.f32 %v823_v6, %v1022_v17  ;;  %848 = vrcp.f32 %v452_v41 }
  0x4f   : > { %v827_v49 = vpop.eup %826  ;;  %850 = vrcp.f32 %v453_v46  ;;  %v454_v52 = vadd.f32 1.0, %v825_v51 }
  0x50   : > { %v829_v53 = vpop.eup %828  ;;  %v603_v54 = vadd.f32 %v571_v43, %v539_v26  ;;  %v455_v28 = vadd.f32 1.0, %v827_v49  ;;  %852 = vpow2.f32 %v423_v45  ;;  %v581_v45 = vld [vmem:[%s1093_s28 + $0xc0] sm:$0xff]  ;;  %v583_v49 = vld [vmem:[%s1093_s28 + $0xd0] sm:$0xff] }
  0x51   : > { %v831_v59 = vpop.eup %830  ;;  %854 = vrcp.f32 %v454_v52  ;;  %v456_v42 = vadd.f32 1.0, %v829_v53 }
  0x52   : > { %635 = vst [vmem:[%s1122_s5 + $0x70] sm:$0xff] %v603_v54  ;;  %856 = vrcp.f32 %v455_v28  ;;  %v457_v17 = vadd.f32 1.0, %v831_v59 }
  0x53   : > { %v833_v57 = vpop.eup %832  ;;  %858 = vrcp.f32 %v456_v42  ;;  %v585_v42 = vld [vmem:[%s1093_s28 + $0xe0] sm:$0xff] }
  0x54   : > { %v835_v62 = vpop.eup %834  ;;  %v540_v1 = vmul.f32 %v833_v57, %v1029_v27  ;;  %860 = vrcp.f32 %v457_v17 }
  0x55   : > { %v837_v56 = vpop.eup %836  ;;  %v541_v61 = vmul.f32 %v835_v62, %v1033_v29  ;;  %862 = vpow2.f32 %v425_v15 }
  0x56   : > { %v839_v7 = vpop.eup %838  ;;  %v604_v8 = vadd.f32 %v572_v60, %v540_v1  ;;  %v542_v22 = vmul.f32 %v837_v56, %v1036_v30  ;;  %864 = vpow2.f32 %v427_v55  ;;  %v586_v1 = vld [vmem:[%s1093_s28 + $0xe8] sm:$0xff] }
  0x57   : > { %v841_v9 = vpop.eup %840  ;;  %v605_v27 = vadd.f32 %v573_v21, %v541_v61  ;;  %v543_v16 = vmul.f32 %v839_v7, %v1044_v44  ;;  %v587_v61 = vld [vmem:[%s1093_s28 + $0xf0] sm:$0xff] }
  0x58   : > { %v843_v18 = vpop.eup %842  ;;  %636 = vst [vmem:[%s1122_s5 + $0x78] sm:$0xff] %v604_v8  ;;  %v606_v29 = vadd.f32 %v574_v5, %v542_v22  ;;  %v544_v24 = vmul.f32 %v841_v9, %v1050_v50  ;;  %v588_v8 = vld [vmem:[%s1093_s28 + $0xf8] sm:$0xff] }
  0x59   : > { %v845_v19 = vpop.eup %844  ;;  %637 = vst [vmem:[%s1122_s5 + $0x80] sm:$0xff] %v605_v27  ;;  %v607_v30 = vadd.f32 %v575_v13, %v543_v16  ;;  %v545_v23 = vmul.f32 %v843_v18, %v1066_v14 }
  0x5a   : > { %v847_v34 = vpop.eup %846  ;;  %638 = vst [vmem:[%s1122_s5 + $0x88] sm:$0xff] %v606_v29  ;;  %v608_v44 = vadd.f32 %v576_v4, %v544_v24  ;;  %v546_v31 = vmul.f32 %v845_v19, %v1070_v20 }
  0x5b   : > { %v849_v35 = vpop.eup %848  ;;  %639 = vst [vmem:[%s1122_s5 + $0x90] sm:$0xff] %v607_v30  ;;  %v609_v50 = vadd.f32 %v577_v39, %v545_v23  ;;  %v547_v63 = vmul.f32 %v847_v34, %v1077_v33 }
  0x5c   : > { %v851_v10 = vpop.eup %850  ;;  %640 = vst [vmem:[%s1122_s5 + $0x98] sm:$0xff] %v608_v44  ;;  %v610_v14 = vadd.f32 %v578_v25, %v546_v31  ;;  %v548_v41 = vmul.f32 %v849_v35, %v1083_v40 }
  0x5d   : > { %v853_v6 = vpop.eup %852  ;;  %641 = vst [vmem:[%s1122_s5 + $0xa0] sm:$0xff] %v609_v50  ;;  %v611_v20 = vadd.f32 %v579_v36, %v547_v63  ;;  %v549_v43 = vmul.f32 %v851_v10, %v1097_v58  ;;  %v584_v58 = vld [vmem:[%s1093_s28 + $0xd8] sm:$0xff] }
  0x5e   : > { %v855_v46 = vpop.eup %854  ;;  %642 = vst [vmem:[%s1122_s5 + $0xa8] sm:$0xff] %v610_v14  ;;  %v612_v33 = vadd.f32 %v580_v37, %v548_v41  ;;  %v458_v51 = vadd.f32 1.0, %v853_v6 }
  0x5f   : > { %v857_v26 = vpop.eup %856  ;;  %643 = vst [vmem:[%s1122_s5 + $0xb0] sm:$0xff] %v611_v20  ;;  %v613_v2 = vadd.f32 %v581_v45, %v549_v43  ;;  %v550_v40 = vmul.f32 %v855_v46, %v1109_v12 }
  0x60   : > { %v859_v52 = vpop.eup %858  ;;  %644 = vst [vmem:[%s1122_s5 + $0xb8] sm:$0xff] %v612_v33  ;;  %v551_v53 = vmul.f32 %v857_v26, %v1129_v38  ;;  %866 = vrcp.f32 %v458_v51 }
  0x61   : > { %v861_v54 = vpop.eup %860  ;;  %645 = vst [vmem:[%s1122_s5 + $0xc0] sm:$0xff] %v613_v2  ;;  %v614_v28 = vadd.f32 %v582_v48, %v550_v40  ;;  %v552_v59 = vmul.f32 %v859_v52, %v1135_v11 }
  0x62   : > { %v863_v15 = vpop.eup %862  ;;  %v615_v12 = vadd.f32 %v583_v49, %v551_v53  ;;  %v553_v17 = vmul.f32 %v861_v54, %v1163_v47 }
  0x63   : > { %v865_v55 = vpop.eup %864  ;;  %646 = vst [vmem:[%s1122_s5 + $0xc8] sm:$0xff] %v614_v28  ;;  %v616_v38 = vadd.f32 %v584_v58, %v552_v59  ;;  %v459_v57 = vadd.f32 1.0, %v863_v15 }
  0x64   : > { %647 = vst [vmem:[%s1122_s5 + $0xd0] sm:$0xff] %v615_v12  ;;  %v617_v60 = vadd.f32 %v585_v42, %v553_v17  ;;  %v460_v62 = vadd.f32 1.0, %v865_v55 }
  0x65   : > { %648 = vst [vmem:[%s1122_s5 + $0xd8] sm:$0xff] %v616_v38  ;;  %868 = vrcp.f32 %v459_v57 }
  0x66   : > { %649 = vst [vmem:[%s1122_s5 + $0xe0] sm:$0xff] %v617_v60  ;;  %870 = vrcp.f32 %v460_v62 }
  0x6d   : > { %v867_v11 = vpop.eup %866 }
  0x6e   : > { %v554_v47 = vmul.f32 %v867_v11, %v1188_v3 }
  0x70   : > { %v618_v21 = vadd.f32 %v586_v1, %v554_v47 }
  0x72   : > { %v869_v56 = vpop.eup %868  ;;  %650 = vst [vmem:[%s1122_s5 + $0xe8] sm:$0xff] %v618_v21 }
  0x73   : > { %v871_v5 = vpop.eup %870  ;;  %v555_v7 = vmul.f32 %v869_v56, %v1197_v32 }
  0x74   : > { %v556_v22 = vmul.f32 %v871_v5, %v1200_v0 }
  0x75   : > { %v619_v13 = vadd.f32 %v587_v61, %v555_v7 }
  0x76   : > { %v620_v9 = vadd.f32 %v588_v8, %v556_v22 }
  0x77   : > { %651 = vst [vmem:[%s1122_s5 + $0xf0] sm:$0xff] %v619_v13 }
  0x78   : > { %652 = vst [vmem:[%s1122_s5 + $0xf8] sm:$0xff] %v620_v9 }
  0x79 PF: > { %s14_s15 = sadd.s32 1, %s878_s15  }
  0x7a   : > { %p11_p4 = scmp.ge.s32.totalorder %s14_s15, 4  }
  0x7c   :  { %13 = sbr.rel (!%p11_p4) target bundleno = 1 (0x1), region = 69 }

// kernel: res_unit_n_forward.6
= control target key start
LH: loop header
LB: loop body
LE: loop exit
PB: predicated region body
PF: predicated region fallthrough
CT: control target
= control target key end

     0   :  { %s4708_s18 = smov 0   ;;  %s5964_s0 = inlined_call_operand.vmem [shape: f32[2,16,16,128], index: 0, kind: input, shape index: {}]   ;;  %s5965_s1 = inlined_call_operand.vmem [shape: f32[1,128], index: 1, kind: input, shape index: {}]   ;;  %s5966_s2 = inlined_call_operand.vmem [shape: f32[1,128], index: 2, kind: input, shape index: {}]   ;;  %s5967_s3 = inlined_call_operand.vmem [shape: bf16[3,3,128,128], index: 3, kind: input, shape index: {}]   ;;  %s5968_s4 = inlined_call_operand.vmem [shape: f32[512,128], index: 4, kind: output, shape index: {0}]   ;;  %s5969_s5 = inlined_call_operand.vmem [shape: f32[16,128], index: 5, kind: output, shape index: {1}]  }
   0x1 LB: > { %s4714_s19 = sadd.s32 4294967295, %s4675_s18   ;;  %p3581_p0 = scmp.ge.s32.totalorder %s4675_s18, 1  ;;  %s4675_s18 = sphi %s4708_s18, %s16_s18  }
   0x2   : > { %p190_p1 = scmp.lt.s32.totalorder %s4675_s18, 3 }
   0x4   : > { %p191_p2 = pnand %p3581_p0, %p190_p1 }
   0x6   : > { %194 = sbr.rel (%p191_p2) target bundleno = 595 (0x253), region = 36 }
   0xb   : > { %v4465_v0 = vld [vmem:[%s5967_s3 + $0x78] sm:$0xff]   ;;  %v4724_v1 = vld [vmem:[%s5967_s3 + $0x70] sm:$0xff]   ;;  %v4677_v2 = vmov 0.0   ;;  %p222_p3 = scmp.lt.s32.totalorder %s4714_s19, 1  ;;  %v4467_v3 = vld [vmem:[%s5967_s3 + $0x68] sm:$0xff]  }
   0xc   : > { %572 = vst [vmem:[#allocation2] sm:$0xff] %v4677_v2  ;;  %573 = vst [vmem:[#allocation2 + $0x8] sm:$0xff] %v4677_v2  ;;  %4008 = vmatprep.subr.bf16.mxu0 %v4465_v0  ;;  %4440 = vmatprep.subr.bf16.mxu1 %v4465_v0  ;;  %v4468_v4 = vld [vmem:[%s5967_s3 + $0x60] sm:$0xff]   ;;  %v4469_v18 = vld [vmem:[%s5967_s3 + $0x58] sm:$0xff]  }
   0xd   : > { %574 = vst [vmem:[#allocation2 + $0x10] sm:$0x3] %v4677_v2  ;;  %575 = vst [vmem:[#allocation2 + $0x18] sm:$0xff] %v4677_v2  ;;  %4009 = vmatpush3.bf16.msra.mxu0 %v4465_v0  ;;  %4448 = vmatpush3.bf16.msra.mxu1 %v4465_v0  ;;  %s4728_s24 = scalar_select %p222_p3, %s4714_s19, 1  ;;  %v4751_v10 = vld [vmem:[%s5965_s1] ss:$0 sm:$0xff] }
   0xe   : > { %576 = vst [vmem:[#allocation2 + $0x20] sm:$0xff] %v4677_v2  ;;  %577 = vst [vmem:[#allocation2 + $0x28] sm:$0x3] %v4677_v2  ;;  %4010 = vmatprep.subr.bf16.mxu0 %v4724_v1  ;;  %4441 = vmatprep.subr.bf16.mxu1 %v4724_v1  ;;  %v4756_v11 = vld [vmem:[%s5966_s2] ss:$0 sm:$0xff]  ;;  %v4470_v26 = vld [vmem:[%s5967_s3 + $0x50] sm:$0xff]  }
   0xf   : > { %578 = vst [vmem:[#allocation2 + $0x30] sm:$0xff] %v4677_v2  ;;  %579 = vst [vmem:[#allocation2 + $0x38] sm:$0xff] %v4677_v2  ;;  %s3791_s27 = sshll.u32 %s4728_s24, 8  ;;  %v4471_v53 = vld [vmem:[%s5967_s3 + $0x48] sm:$0xff]   ;;  %s3586_s23 = sshll.u32 %s4728_s24, 3 }
  0x10   : > { %580 = vst [vmem:[#allocation2 + $0x40] sm:$0x3] %v4677_v2  ;;  %581 = vst [vmem:[#allocation2 + $0x48] sm:$0xff] %v4677_v2  ;;  %s4739_s30 = scalar_lea.vmem %s5964_s0, %s3791_s27  ;;  %s5712_s27 = scalar_lea.vmem %s5969_s5, %s3586_s23 }
  0x11   : > { %582 = vst [vmem:[#allocation2 + $0x50] sm:$0xff] %v4677_v2  ;;  %583 = vst [vmem:[#allocation2 + $0x58] sm:$0x3] %v4677_v2  ;;  %4011 = vmatpush3.bf16.msra.mxu0 %v4724_v1  ;;  %4449 = vmatpush3.bf16.msra.mxu1 %v4724_v1  ;;  %v238_v7 = vld [vmem:[%s4739_s30] sm:$0xff]  ;;  %v239_v9 = vld [vmem:[%s4739_s30 + $0x8] sm:$0xff]  ;;  %s3584_s24 = sshll.u32 %s4714_s19, 5 }
  0x12   : > { %584 = vst [vmem:[#allocation2 + $0x60] sm:$0xff] %v4677_v2  ;;  %585 = vst [vmem:[#allocation2 + $0x68] sm:$0xff] %v4677_v2  ;;  %4012 = vmatprep.subr.bf16.mxu0 %v4467_v3  ;;  %4442 = vmatprep.subr.bf16.mxu1 %v4467_v3  ;;  %v277_v12 = vmul.f32 %v4751_v10, %v238_v7  ;;  %v278_v13 = vmul.f32 %v4751_v10, %v239_v9  ;;  %v252_v14 = vld [vmem:[%s4739_s30 + $0x70] sm:$0xff]  ;;  %v253_v15 = vld [vmem:[%s4739_s30 + $0x78] sm:$0xff]  ;;  %p228_p4 = scmp.lt.s32.totalorder %s3584_s24, 63 }
  0x13   : > { %586 = vst [vmem:[#allocation2 + $0x70] sm:$0x3] %v4677_v2  ;;  %587 = vst [vmem:[#allocation2 + $0x78] sm:$0xff] %v4677_v2  ;;  %v723_v5 = vld [vmem:[#allocation2 + $0x1] sm:$0xff]  ;;  %v291_v16 = vmul.f32 %v4751_v10, %v252_v14  ;;  %v292_v17 = vmul.f32 %v4751_v10, %v253_v15  ;;  %v240_v33 = vld [vmem:[%s4739_s30 + $0x10] sm:$0xff] }
  0x14   : > { %588 = vst [vmem:[#allocation2 + $0x80] sm:$0xff] %v4677_v2  ;;  %589 = vst [vmem:[#allocation2 + $0x88] sm:$0x3] %v4677_v2  ;;  %v724_v6 = vld [vmem:[#allocation2 + $0x9] sm:$0xff]  ;;  %v4768_v19 = vadd.f32 %v4756_v11, %v277_v12  ;;  %v4771_v20 = vadd.f32 %v4756_v11, %v278_v13  ;;  %v254_v21 = vld [vmem:[%s4739_s30 + $0x80] sm:$0xff]  ;;  %v279_v38 = vmul.f32 %v4751_v10, %v240_v33  ;;  %s6061_s24 = smov (!%p228_p4, %s3584_s24), 63 }
  0x15   : > { %590 = vst [vmem:[#allocation2 + $0x90] sm:$0xff] %v4677_v2  ;;  %591 = vst [vmem:[#allocation2 + $0x98] sm:$0xff] %v4677_v2  ;;  %v755_v8 = vpack.c.bf16 %v724_v6, %v723_v5  ;;  %4013 = vmatpush3.bf16.msra.mxu0 %v4467_v3  ;;  %4450 = vmatpush3.bf16.msra.mxu1 %v4467_v3  ;;  %v4775_v22 = vadd.f32 %v4756_v11, %v291_v16  ;;  %v255_v24 = vld [vmem:[%s4739_s30 + $0x88] sm:$0xff]  ;;  %v241_v34 = vld [vmem:[%s4739_s30 + $0x18] sm:$0xff]  ;;  %s3585_s19 = sshll.u32 %s6061_s24, 3 }
  0x16   : > { %592 = vst [vmem:[#allocation2 + $0xa0] sm:$0x3] %v4677_v2  ;;  %593 = vst [vmem:[#allocation2 + $0xa8] sm:$0xff] %v4677_v2  ;;  %4014 = vmatprep.subr.bf16.mxu0 %v4468_v4  ;;  %4443 = vmatprep.subr.bf16.mxu1 %v4468_v4  ;;  %v4778_v23 = vadd.f32 %v4756_v11, %v292_v17  ;;  %v293_v25 = vmul.f32 %v4751_v10, %v254_v21  ;;  %v348_v27 = vsub.f32 0.0, %v4768_v19  ;;  %v242_v39 = vld [vmem:[%s4739_s30 + $0x20] sm:$0xff]  ;;  %v243_v40 = vld [vmem:[%s4739_s30 + $0x28] sm:$0xff]  ;;  %s5839_s6 = scalar_lea.vmem %s5968_s4, %s3585_s19 }
  0x17   : > { %594 = vst [vmem:[#allocation2 + $0xb0] sm:$0xff] %v4677_v2  ;;  %595 = vst [vmem:[#allocation2 + $0xb8] sm:$0x3] %v4677_v2  ;;  %4024 = vmatprep.mubr.bf16.mxu0 %v755_v8  ;;  %v349_v28 = vsub.f32 0.0, %v4771_v20  ;;  %v294_v29 = vmul.f32 %v4751_v10, %v255_v24  ;;  %v362_v30 = vsub.f32 0.0, %v4775_v22  ;;  %v280_v44 = vmul.f32 %v4751_v10, %v241_v34  ;;  %v256_v48 = vld [vmem:[%s4739_s30 + $0x90] sm:$0xff] }
  0x18   : > { %596 = vst [vmem:[#allocation2 + $0xc0] sm:$0xff] %v4677_v2  ;;  %597 = vst [vmem:[#allocation2 + $0xc8] sm:$0xff] %v4677_v2  ;;  %v363_v31 = vsub.f32 0.0, %v4778_v23  ;;  %v4791_v32 = vadd.f32 %v4756_v11, %v293_v25  ;;  %v380_v35 = vmul.f32 1.442695, %v348_v27  ;;  %v4805_v46 = vadd.f32 %v4756_v11, %v279_v38  ;;  %v257_v52 = vld [vmem:[%s4739_s30 + $0x98] sm:$0xff] }
  0x19   : > { %598 = vst [vmem:[#allocation2 + $0xd0] sm:$0x3] %v4677_v2  ;;  %599 = vst [vmem:[#allocation2 + $0xd8] sm:$0xff] %v4677_v2  ;;  %4015 = vmatpush3.bf16.msra.mxu0 %v4468_v4  ;;  %4451 = vmatpush3.bf16.msra.mxu1 %v4468_v4  ;;  %v382_v36 = vmul.f32 1.442695, %v349_v28  ;;  %v4796_v37 = vadd.f32 %v4756_v11, %v294_v29  ;;  %v281_v47 = vmul.f32 %v4751_v10, %v242_v39  ;;  %v258_v60 = vld [vmem:[%s4739_s30 + $0xa0] sm:$0xff] }
  0x1a   : > { %600 = vst [vmem:[#allocation2 + $0xe0] sm:$0xff] %v4677_v2  ;;  %601 = vst [vmem:[#allocation2 + $0xe8] sm:$0x3] %v4677_v2  ;;  %4016 = vmatprep.subr.bf16.mxu0 %v4469_v18  ;;  %4444 = vmatprep.subr.bf16.mxu1 %v4469_v18  ;;  %v408_v41 = vmul.f32 1.442695, %v362_v30  ;;  %v364_v43 = vsub.f32 0.0, %v4791_v32  ;;  %4537 = vpow2.f32 %v380_v35  ;;  %v4810_v50 = vadd.f32 %v4756_v11, %v280_v44 }
  0x1b   : > { %602 = vst [vmem:[#allocation2 + $0xf0] sm:$0xff] %v4677_v2  ;;  %603 = vst [vmem:[#allocation2 + $0xf8] sm:$0xff] %v4677_v2  ;;  %v410_v42 = vmul.f32 1.442695, %v363_v31  ;;  %v365_v45 = vsub.f32 0.0, %v4796_v37  ;;  %4539 = vpow2.f32 %v382_v36  ;;  %v282_v51 = vmul.f32 %v4751_v10, %v243_v40  ;;  %v259_v0 = vld [vmem:[%s4739_s30 + $0xa8] sm:$0xff] }
  0x1c   : > { %604 = vst [vmem:[#allocation2 + $0x100] sm:$0x3] %v4677_v2  ;;  %605 = vst [vmem:[#allocation2 + $0x108] sm:$0xff] %v4677_v2  ;;  %v412_v49 = vmul.f32 1.442695, %v364_v43  ;;  %4541 = vpow2.f32 %v408_v41  ;;  %v350_v55 = vsub.f32 0.0, %v4805_v46  ;;  %v4819_v56 = vadd.f32 %v4756_v11, %v281_v47 }
  0x1d   : > { %606 = vst [vmem:[#allocation2 + $0x110] sm:$0xff] %v4677_v2  ;;  %607 = vst [vmem:[#allocation2 + $0x118] sm:$0x3] %v4677_v2  ;;  %4017 = vmatpush3.bf16.msra.mxu0 %v4469_v18  ;;  %4452 = vmatpush3.bf16.msra.mxu1 %v4469_v18  ;;  %v414_v54 = vmul.f32 1.442695, %v365_v45  ;;  %4543 = vpow2.f32 %v410_v42  ;;  %v351_v57 = vsub.f32 0.0, %v4810_v50  ;;  %v4823_v58 = vadd.f32 %v4756_v11, %v282_v51 }
  0x1e   : > { %608 = vst [vmem:[#allocation2 + $0x120] sm:$0xff] %v4677_v2  ;;  %609 = vst [vmem:[#allocation2 + $0x128] sm:$0xff] %v4677_v2  ;;  %4018 = vmatprep.subr.bf16.mxu0 %v4470_v26  ;;  %4445 = vmatprep.subr.bf16.mxu1 %v4470_v26  ;;  %v295_v59 = vmul.f32 %v4751_v10, %v256_v48  ;;  %4545 = vpow2.f32 %v412_v49  ;;  %v384_v61 = vmul.f32 1.442695, %v350_v55  ;;  %v352_v62 = vsub.f32 0.0, %v4819_v56  ;;  %v4472_v4 = vld [vmem:[%s5967_s3 + $0x40] sm:$0xff]  }
  0x1f   : > { %610 = vst [vmem:[#allocation2 + $0x130] sm:$0x3] %v4677_v2  ;;  %611 = vst [vmem:[#allocation2 + $0x138] sm:$0xff] %v4677_v2  ;;  %v296_v63 = vmul.f32 %v4751_v10, %v257_v52  ;;  %4547 = vpow2.f32 %v414_v54  ;;  %v386_v1 = vmul.f32 1.442695, %v351_v57  ;;  %v297_v7 = vmul.f32 %v4751_v10, %v258_v60  ;;  %v244_v8 = vld [vmem:[%s4739_s30 + $0x30] sm:$0xff] }
  0x20   : > { %612 = vst [vmem:[#allocation2 + $0x140] sm:$0xff] %v4677_v2  ;;  %613 = vst [vmem:[#allocation2 + $0x148] sm:$0x3] %v4677_v2  ;;  %v4832_v3 = vadd.f32 %v4756_v11, %v295_v59  ;;  %4549 = vpow2.f32 %v384_v61  ;;  %v388_v5 = vmul.f32 1.442695, %v352_v62  ;;  %v245_v9 = vld [vmem:[%s4739_s30 + $0x38] sm:$0xff]  ;;  %v298_v14 = vmul.f32 %v4751_v10, %v259_v0 }
  0x21   : > { %614 = vst [vmem:[#allocation2 + $0x150] sm:$0xff] %v4677_v2  ;;  %615 = vst [vmem:[#allocation2 + $0x158] sm:$0xff] %v4677_v2  ;;  %4019 = vmatpush3.bf16.msra.mxu0 %v4470_v26  ;;  %4453 = vmatpush3.bf16.msra.mxu1 %v4470_v26  ;;  %v4838_v6 = vadd.f32 %v4756_v11, %v296_v63  ;;  %4551 = vpow2.f32 %v386_v1  ;;  %v246_v15 = vld [vmem:[%s4739_s30 + $0x40] sm:$0xff]  ;;  %v4848_v17 = vadd.f32 %v4756_v11, %v297_v7  ;;  %v247_v21 = vld [vmem:[%s4739_s30 + $0x48] sm:$0xff] }
  0x22   : > { %616 = vst [vmem:[#allocation2 + $0x160] sm:$0x3] %v4677_v2  ;;  %617 = vst [vmem:[#allocation2 + $0x168] sm:$0xff] %v4677_v2  ;;  %4020 = vmatprep.subr.bf16.mxu0 %v4471_v53  ;;  %4446 = vmatprep.subr.bf16.mxu1 %v4471_v53  ;;  %v366_v13 = vsub.f32 0.0, %v4832_v3  ;;  %4553 = vpow2.f32 %v388_v5  ;;  %v283_v18 = vmul.f32 %v4751_v10, %v244_v8  ;;  %v4859_v27 = vld [vmem:[%s5967_s3 + $0x38] sm:$0xff]   ;;  %v260_v34 = vld [vmem:[%s4739_s30 + $0xb0] sm:$0xff] }
  0x23   : > { %618 = vst [vmem:[#allocation2 + $0x170] sm:$0xff] %v4677_v2  ;;  %619 = vst [vmem:[#allocation2 + $0x178] sm:$0x3] %v4677_v2  ;;  %v367_v16 = vsub.f32 0.0, %v4838_v6  ;;  %v4853_v25 = vadd.f32 %v4756_v11, %v298_v14  ;;  %v284_v26 = vmul.f32 %v4751_v10, %v245_v9  ;;  %v4864_v28 = vld [vmem:[%s5967_s3 + $0xb8] sm:$0xff]   ;;  %v368_v30 = vsub.f32 0.0, %v4848_v17 }
  0x24   : > { %620 = vst [vmem:[#allocation2 + $0x180] sm:$0xff] %v4677_v2  ;;  %621 = vst [vmem:[#allocation2 + $0x188] sm:$0xff] %v4677_v2  ;;  %v416_v24 = vmul.f32 1.442695, %v366_v13  ;;  %v4868_v31 = vadd.f32 %v4756_v11, %v283_v18  ;;  %v285_v33 = vmul.f32 %v4751_v10, %v246_v15  ;;  %v286_v38 = vmul.f32 %v4751_v10, %v247_v21  ;;  %v261_v47 = vld [vmem:[%s4739_s30 + $0xb8] sm:$0xff]  ;;  %v262_v59 = vld [vmem:[%s4739_s30 + $0xc0] sm:$0xff] }
  0x25   : > { %622 = vst [vmem:[#allocation2 + $0x190] sm:$0x3] %v4677_v2  ;;  %623 = vst [vmem:[#allocation2 + $0x198] sm:$0xff] %v4677_v2  ;;  %4021 = vmatpush3.bf16.msra.mxu0 %v4471_v53  ;;  %4454 = vmatpush3.bf16.msra.mxu1 %v4471_v53  ;;  %v418_v29 = vmul.f32 1.442695, %v367_v16  ;;  %v369_v35 = vsub.f32 0.0, %v4853_v25  ;;  %v4874_v36 = vadd.f32 %v4756_v11, %v284_v26 }
  0x26   : > { %624 = vst [vmem:[#allocation2 + $0x1a0] sm:$0xff] %v4677_v2  ;;  %625 = vst [vmem:[#allocation2 + $0x1a8] sm:$0x3] %v4677_v2  ;;  %v353_v2 = vsub.f32 0.0, %v4823_v58  ;;  %4022 = vmatprep.subr.bf16.mxu0 %v4472_v4  ;;  %4447 = vmatprep.subr.bf16.mxu1 %v4472_v4  ;;  %v420_v39 = vmul.f32 1.442695, %v368_v30  ;;  %v4879_v41 = vadd.f32 %v4756_v11, %v285_v33 }
  0x27   : > { %v354_v40 = vsub.f32 0.0, %v4868_v31  ;;  %v4538_v42 = vpop.eup %4537  ;;  %v422_v43 = vmul.f32 1.442695, %v369_v35  ;;  %v355_v44 = vsub.f32 0.0, %v4874_v36  ;;  %v4883_v45 = vadd.f32 %v4756_v11, %v286_v38  ;;  %v263_v0 = vld [vmem:[%s4739_s30 + $0xc8] sm:$0xff]  ;;  %v249_v30 = vld [vmem:[%s4739_s30 + $0x58] sm:$0xff] }
  0x28   : > { %v390_v12 = vmul.f32 1.442695, %v353_v2  ;;  %v299_v48 = vmul.f32 %v4751_v10, %v260_v34  ;;  %v4540_v49 = vpop.eup %4539  ;;  %v444_v51 = vadd.f32 1.0, %v4538_v42  ;;  %v356_v52 = vsub.f32 0.0, %v4879_v41 }
  0x29   : > { %4023 = vmatpush3.bf16.msra.mxu0 %v4472_v4  ;;  %4455 = vmatpush3.bf16.msra.mxu1 %v4472_v4  ;;  %v4542_v53 = vpop.eup %4541  ;;  %v445_v54 = vadd.f32 1.0, %v4540_v49  ;;  %v392_v55 = vmul.f32 1.442695, %v354_v40  ;;  %v4890_v57 = vmul.f32 1.442695, %v355_v44  ;;  %v357_v62 = vsub.f32 0.0, %v4883_v45 }
  0x2a   : > { %4555 = vpow2.f32 %v390_v12  ;;  %4056 = vmatprep.subr.bf16.mxu1 %v4859_v27  ;;  %4104 = vmatprep.subr.bf16.mxu0 %v4864_v28  ;;  %v4544_v60 = vpop.eup %4543  ;;  %v458_v61 = vadd.f32 1.0, %v4542_v53  ;;  %v300_v63 = vmul.f32 %v4751_v10, %v261_v47  ;;  %v4896_v4 = vmul.f32 1.442695, %v356_v52 }
  0x2b   : > { %4557 = vpow2.f32 %v416_v24  ;;  %v4546_v1 = vpop.eup %4545  ;;  %v459_v2 = vadd.f32 1.0, %v4544_v60  ;;  %v4899_v5 = vadd.f32 %v4756_v11, %v299_v48  ;;  %v301_v12 = vmul.f32 %v4751_v10, %v262_v59  ;;  %v264_v60 = vld [vmem:[%s4739_s30 + $0xd0] sm:$0xff] }
  0x2c   : > { %4559 = vpow2.f32 %v418_v29  ;;  %v4548_v7 = vpop.eup %4547  ;;  %v460_v8 = vadd.f32 1.0, %v4546_v1  ;;  %v4902_v9 = vadd.f32 %v4756_v11, %v300_v63  ;;  %v302_v16 = vmul.f32 %v4751_v10, %v263_v0  ;;  %v248_v29 = vld [vmem:[%s4739_s30 + $0x50] sm:$0xff] }
  0x2d   : > { %4561 = vpow2.f32 %v420_v39  ;;  %v4550_v13 = vpop.eup %4549  ;;  %v461_v14 = vadd.f32 1.0, %v4548_v7  ;;  %v370_v15 = vsub.f32 0.0, %v4899_v5  ;;  %v4909_v26 = vadd.f32 %v4756_v11, %v301_v12  ;;  %v250_v39 = vld [vmem:[%s4739_s30 + $0x60] sm:$0xff] }
  0x2e   : > { %4563 = vpow2.f32 %v422_v43  ;;  %v4552_v18 = vpop.eup %4551  ;;  %v446_v21 = vadd.f32 1.0, %v4550_v13  ;;  %v371_v24 = vsub.f32 0.0, %v4902_v9  ;;  %v4913_v35 = vmul.f32 1.442695, %v357_v62 }
  0x2f   : > { %4565 = vrcp.f32 %v444_v51  ;;  %v4554_v33 = vpop.eup %4553  ;;  %v447_v34 = vadd.f32 1.0, %v4552_v18  ;;  %v4916_v38 = vadd.f32 %v4756_v11, %v302_v16  ;;  %v4919_v43 = vmul.f32 1.442695, %v370_v15  ;;  %v251_v51 = vld [vmem:[%s4739_s30 + $0x68] sm:$0xff] }
  0x30   : > { %4567 = vrcp.f32 %v445_v54  ;;  %v448_v42 = vadd.f32 1.0, %v4554_v33  ;;  %v372_v44 = vsub.f32 0.0, %v4909_v26  ;;  %v4922_v48 = vmul.f32 1.442695, %v371_v24 }
  0x31   : > { %4569 = vrcp.f32 %v458_v61  ;;  %v287_v49 = vmul.f32 %v4751_v10, %v248_v29  ;;  %v373_v53 = vsub.f32 0.0, %v4916_v38  ;;  %v288_v54 = vmul.f32 %v4751_v10, %v249_v30 }
  0x32   : > { %4571 = vrcp.f32 %v459_v2  ;;  %v289_v59 = vmul.f32 %v4751_v10, %v250_v39  ;;  %v4930_v63 = vmul.f32 1.442695, %v372_v44  ;;  %v290_v7 = vmul.f32 %v4751_v10, %v251_v51 }
  0x33   : > { %4573 = vrcp.f32 %v460_v8  ;;  %v4933_v0 = vadd.f32 %v4756_v11, %v287_v49  ;;  %v4936_v2 = vadd.f32 %v4756_v11, %v288_v54  ;;  %v303_v15 = vmul.f32 %v4751_v10, %v264_v60  ;;  %v4476_v49 = vld [vmem:[%s5967_s3 + $0xb0] sm:$0xff]  }
  0x34   : > { %4575 = vrcp.f32 %v461_v14  ;;  %v4941_v13 = vadd.f32 %v4756_v11, %v289_v59  ;;  %v265_v14 = vld [vmem:[%s4739_s30 + $0xd8] sm:$0xff]  ;;  %v430_v30 = vmul.f32 1.442695, %v373_v53 }
  0x35   : > { %4577 = vrcp.f32 %v446_v21  ;;  %v358_v12 = vsub.f32 0.0, %v4933_v0  ;;  %v4947_v21 = vadd.f32 %v4756_v11, %v290_v7  ;;  %v304_v51 = vmul.f32 %v4751_v10, %v265_v14 }
  0x36   : > { %4579 = vrcp.f32 %v447_v34  ;;  %v360_v33 = vsub.f32 0.0, %v4941_v13 }
  0x37   : > { %v4556_v40 = vpop.eup %4555  ;;  %4581 = vrcp.f32 %v448_v42 }
  0x38   : > { %v449_v47 = vadd.f32 1.0, %v4556_v40  ;;  %v4558_v52 = vpop.eup %4557  ;;  %v400_v40 = vmul.f32 1.442695, %v358_v12  ;;  %v404_v54 = vmul.f32 1.442695, %v360_v33 }
  0x39   : > { %v4560_v61 = vpop.eup %4559  ;;  %v462_v62 = vadd.f32 1.0, %v4558_v52  ;;  %v266_v52 = vld [vmem:[%s4739_s30 + $0xe0] sm:$0xff] }
  0x3a   : > { %4583 = vrcp.f32 %v449_v47  ;;  %v463_v1 = vadd.f32 1.0, %v4560_v61  ;;  %v4562_v8 = vpop.eup %4561 }
  0x3b   : > { %4585 = vpow2.f32 %v392_v55  ;;  %v4564_v16 = vpop.eup %4563  ;;  %v464_v18 = vadd.f32 1.0, %v4562_v8  ;;  %v359_v55 = vsub.f32 0.0, %v4936_v2  ;;  %v305_v8 = vmul.f32 %v4751_v10, %v266_v52 }
  0x3c   : > { %4587 = vrcp.f32 %v462_v62  ;;  %v4566_v24 = vpop.eup %4565  ;;  %v465_v29 = vadd.f32 1.0, %v4564_v16  ;;  %v4967_v62 = vadd.f32 %v4756_v11, %v304_v51 }
  0x3d   : > { %4589 = vrcp.f32 %v463_v1  ;;  %v4568_v34 = vpop.eup %4567  ;;  %v540_v39 = vmul.f32 %v4566_v24, %v4768_v19  ;;  %v402_v42 = vmul.f32 1.442695, %v359_v55  ;;  %v267_v1 = vld [vmem:[%s4739_s30 + $0xe8] sm:$0xff] }
  0x3e   : > { %4591 = vpow2.f32 %v4890_v57  ;;  %v4570_v44 = vpop.eup %4569  ;;  %v541_v47 = vmul.f32 %v4568_v34, %v4771_v20  ;;  %v361_v57 = vsub.f32 0.0, %v4947_v21  ;;  %v4962_v20 = vadd.f32 %v4756_v11, %v303_v15 }
  0x3f   : > { %4593 = vrcp.f32 %v464_v18  ;;  %v4572_v53 = vpop.eup %4571  ;;  %627 = vst [vmem:[#allocation2 + $0x19] sm:$0xff] %v540_v39  ;;  %v554_v19 = vmul.f32 %v4570_v44, %v4775_v22  ;;  %v375_v14 = vsub.f32 0.0, %v4967_v62  ;;  %v306_v18 = vmul.f32 %v4751_v10, %v267_v1 }
  0x40   : > { %4595 = vrcp.f32 %v465_v29  ;;  %v4574_v59 = vpop.eup %4573  ;;  %628 = vst [vmem:[#allocation2 + $0x21] sm:$0xff] %v541_v47  ;;  %v756_v60 = vpack.c.bf16 %v541_v47, %v540_v39  ;;  %v555_v61 = vmul.f32 %v4572_v53, %v4778_v23  ;;  %v406_v16 = vmul.f32 1.442695, %v361_v57 }
  0x41   : > { %4597 = vpow2.f32 %v4896_v4  ;;  %v4576_v7 = vpop.eup %4575  ;;  %641 = vst [vmem:[#allocation2 + $0xc1] sm:$0xff] %v554_v19  ;;  %v556_v22 = vmul.f32 %v4574_v59, %v4791_v32  ;;  %v374_v4 = vsub.f32 0.0, %v4962_v20  ;;  %v4475_v32 = vld [vmem:[%s5967_s3 + $0x30] sm:$0xff]   ;;  %v4990_v10 = vadd.f32 %v4756_v11, %v305_v8 }
  0x42   : > { %4599 = vpow2.f32 %v4913_v35  ;;  %v4578_v12 = vpop.eup %4577  ;;  %4025 = vmatmul.mubr.bf16.vlgmr.msra.gmra.mxu0 %v756_v60  ;;  %642 = vst [vmem:[#allocation2 + $0xc9] sm:$0xff] %v555_v61  ;;  %v763_v23 = vpack.c.bf16 %v555_v61, %v554_v19  ;;  %v557_v35 = vmul.f32 %v4576_v7, %v4796_v37  ;;  %v434_v34 = vmul.f32 1.442695, %v375_v14  ;;  %v4479_v61 = vld [vmem:[%s5967_s3 + $0x20] sm:$0xff]   ;;  %v4481_v14 = vld [vmem:[%s5967_s3 + $0x18] sm:$0xff]  }
  0x43   : > { %4601 = vpow2.f32 %v4919_v43  ;;  %v4580_v15 = vpop.eup %4579  ;;  %643 = vst [vmem:[#allocation2 + $0xd9] sm:$0xff] %v556_v22  ;;  %4105 = vmatpush3.bf16.msra.mxu0 %v4864_v28  ;;  %v542_v43 = vmul.f32 %v4578_v12, %v4805_v46  ;;  %v432_v28 = vmul.f32 1.442695, %v374_v4  ;;  %v4478_v46 = vld [vmem:[%s5967_s3 + $0xa8] sm:$0xff]  }
  0x44   : > { %4603 = vpow2.f32 %v4922_v48  ;;  %v4582_v37 = vpop.eup %4581  ;;  %4040 = vmatprep.mubr.bf16.mxu1 %v763_v23  ;;  %644 = vst [vmem:[#allocation2 + $0xe1] sm:$0xff] %v557_v35  ;;  %v764_v48 = vpack.c.bf16 %v557_v35, %v556_v22  ;;  %4106 = vmatprep.subr.bf16.mxu0 %v4476_v49  ;;  %v543_v55 = vmul.f32 %v4580_v15, %v4810_v50  ;;  %v4484_v15 = vld [vmem:[%s5967_s3 + $0x90] sm:$0xff]  }
  0x45   : > { %4605 = vpow2.f32 %v4930_v63  ;;  %629 = vst [vmem:[#allocation2 + $0x31] sm:$0xff] %v542_v43  ;;  %v544_v29 = vmul.f32 %v4582_v37, %v4819_v56  ;;  %v4993_v63 = vadd.f32 %v4756_v11, %v306_v18 }
  0x46   : > { %4607 = vpow2.f32 %v430_v30  ;;  %4041 = vmatmul.mubr.bf16.vlgmr.msra.gmra.mxu1 %v764_v48  ;;  %630 = vst [vmem:[#allocation2 + $0x39] sm:$0xff] %v543_v55  ;;  %v757_v50 = vpack.c.bf16 %v543_v55, %v542_v43 }
  0x47   : > { %v4584_v24 = vpop.eup %4583  ;;  %4609 = vpow2.f32 %v400_v40  ;;  %4057 = vmatpush3.bf16.msra.mxu1 %v4859_v27  ;;  %4107 = vmatpush3.bf16.msra.mxu0 %v4476_v49  ;;  %631 = vst [vmem:[#allocation2 + $0x49] sm:$0xff] %v544_v29  ;;  %v376_v40 = vsub.f32 0.0, %v4990_v10  ;;  %v377_v11 = vsub.f32 0.0, %v4993_v63  ;;  %v4480_v27 = vld [vmem:[%s5967_s3 + $0xa0] sm:$0xff]  }
  0x48   : > { %v4586_v33 = vpop.eup %4585  ;;  %v545_v30 = vmul.f32 %v4584_v24, %v4823_v58  ;;  %4611 = vpow2.f32 %v402_v42  ;;  %4058 = vmatprep.subr.bf16.mxu1 %v4475_v32  ;;  %4028 = vmatprep.mubr.bf16.mxu0 %v757_v50  ;;  %v4477_v42 = vld [vmem:[%s5967_s3 + $0x28] sm:$0xff]  }
  0x49   : > { %v4588_v56 = vpop.eup %4587  ;;  %v450_v39 = vadd.f32 1.0, %v4586_v33  ;;  %4613 = vpow2.f32 %v404_v54  ;;  %4108 = vmatprep.subr.bf16.mxu0 %v4478_v46  ;;  %v436_v51 = vmul.f32 1.442695, %v376_v40 }
  0x4a   : > { %v4590_v44 = vpop.eup %4589  ;;  %632 = vst [vmem:[#allocation2 + $0x51] sm:$0xff] %v545_v30  ;;  %v758_v47 = vpack.c.bf16 %v545_v30, %v544_v29  ;;  %v558_v58 = vmul.f32 %v4588_v56, %v4832_v3  ;;  %4615 = vpow2.f32 %v406_v16  ;;  %v438_v3 = vmul.f32 1.442695, %v377_v11  ;;  %v4486_v29 = vld [vmem:[%s5967_s3 + $0x88] sm:$0xff]  }
  0x4b   : > { %v4592_v49 = vpop.eup %4591  ;;  %v559_v57 = vmul.f32 %v4590_v44, %v4838_v6  ;;  %4617 = vrcp.f32 %v450_v39  ;;  %4059 = vmatpush3.bf16.msra.mxu1 %v4475_v32  ;;  %4109 = vmatpush3.bf16.msra.mxu0 %v4478_v46  ;;  %v4485_v39 = vld [vmem:[%s5967_s3 + $0x8] sm:$0xff]   ;;  %v4488_v44 = vld [vmem:[%s5967_s3 + $0x80] sm:$0xff]  }
  0x4c   : > { %v4594_v52 = vpop.eup %4593  ;;  %4029 = vmatmul.mubr.bf16.gmra.mxu0 %v758_v47  ;;  %645 = vst [vmem:[#allocation2 + $0xf1] sm:$0xff] %v558_v58  ;;  %v451_v53 = vadd.f32 1.0, %v4592_v49  ;;  %4619 = vpow2.f32 %v432_v28  ;;  %4060 = vmatprep.subr.bf16.mxu1 %v4477_v42  ;;  %v4483_v28 = vld [vmem:[%s5967_s3 + $0x10] sm:$0xff]  }
  0x4d   : > { %v4596_v19 = vpop.eup %4595  ;;  %646 = vst [vmem:[#allocation2 + $0xf9] sm:$0xff] %v559_v57  ;;  %v765_v54 = vpack.c.bf16 %v559_v57, %v558_v58  ;;  %v560_v59 = vmul.f32 %v4594_v52, %v4848_v17  ;;  %4621 = vpow2.f32 %v434_v34  ;;  %4110 = vmatprep.subr.bf16.mxu0 %v4480_v27  ;;  %v4482_v17 = vld [vmem:[%s5967_s3 + $0x98] sm:$0xff]   ;;  %v4487_v57 = vld [vmem:[%s5967_s3] sm:$0xff]  }
  0x4e   : > { %v4598_v60 = vpop.eup %4597  ;;  %v561_v6 = vmul.f32 %v4596_v19, %v4853_v25  ;;  %4623 = vrcp.f32 %v451_v53 }
  0x4f   : > { %v4600_v1 = vpop.eup %4599  ;;  %4044 = vmatprep.mubr.bf16.mxu1 %v765_v54  ;;  %647 = vst [vmem:[#allocation2 + $0x109] sm:$0xff] %v560_v59  ;;  %v452_v7 = vadd.f32 1.0, %v4598_v60  ;;  %4625 = vpow2.f32 %v436_v51  ;;  %4061 = vmatpush3.bf16.msra.mxu1 %v4477_v42 }
  0x50   : > { %v4602_v22 = vpop.eup %4601  ;;  %648 = vst [vmem:[#allocation2 + $0x111] sm:$0xff] %v561_v6  ;;  %v766_v4 = vpack.c.bf16 %v561_v6, %v560_v59  ;;  %v453_v8 = vadd.f32 1.0, %v4600_v1  ;;  %4627 = vpow2.f32 %v438_v3  ;;  %4111 = vmatpush3.bf16.msra.mxu0 %v4480_v27  ;;  %4062 = vmatprep.subr.bf16.mxu1 %v4479_v61 }
  0x51   : > { %v4604_v25 = vpop.eup %4603  ;;  %4629 = vrcp.f32 %v452_v7  ;;  %v466_v12 = vadd.f32 1.0, %v4602_v22  ;;  %4112 = vmatprep.subr.bf16.mxu0 %v4482_v17 }
  0x52   : > { %v4606_v23 = vpop.eup %4605  ;;  %4045 = vmatmul.mubr.bf16.gmra.mxu1 %v766_v4  ;;  %4631 = vrcp.f32 %v453_v8  ;;  %v467_v35 = vadd.f32 1.0, %v4604_v25  ;;  %v1206_v25 = vld [vmem:[#allocation2 + $0x2] sm:$0xff] }
  0x53   : > { %v4608_v32 = vpop.eup %4607  ;;  %4633 = vrcp.f32 %v466_v12  ;;  %v468_v43 = vadd.f32 1.0, %v4606_v23  ;;  %4063 = vmatpush3.bf16.msra.mxu1 %v4479_v61 }
  0x54   : > { %v4610_v16 = vpop.eup %4609  ;;  %4635 = vrcp.f32 %v467_v35  ;;  %v469_v18 = vadd.f32 1.0, %v4608_v32  ;;  %4113 = vmatpush3.bf16.msra.mxu0 %v4482_v17  ;;  %4064 = vmatprep.subr.bf16.mxu1 %v4481_v14  ;;  %v1207_v35 = vld [vmem:[#allocation2 + $0xa] sm:$0xff] }
  0x55   : > { %v4612_v37 = vpop.eup %4611  ;;  %4637 = vrcp.f32 %v468_v43  ;;  %v454_v48 = vadd.f32 1.0, %v4610_v16  ;;  %4114 = vmatprep.subr.bf16.mxu0 %v4484_v15  ;;  %v268_v32 = vld [vmem:[%s4739_s30 + $0xf0] sm:$0xff]  ;;  %v1238_v16 = vpack.c.bf16 %v1207_v35, %v1206_v25 }
  0x56   : > { %v4614_v55 = vpop.eup %4613  ;;  %4639 = vrcp.f32 %v469_v18  ;;  %v455_v24 = vadd.f32 1.0, %v4612_v37 }
  0x57   : > { %v4616_v46 = vpop.eup %4615  ;;  %4641 = vrcp.f32 %v454_v48  ;;  %v456_v33 = vadd.f32 1.0, %v4614_v55  ;;  %4065 = vmatpush3.bf16.msra.mxu1 %v4481_v14  ;;  %v269_v55 = vld [vmem:[%s4739_s30 + $0xf8] sm:$0xff] }
  0x58   : > { %v4618_v50 = vpop.eup %4617  ;;  %4643 = vrcp.f32 %v455_v24  ;;  %v457_v30 = vadd.f32 1.0, %v4616_v46  ;;  %4115 = vmatpush3.bf16.msra.mxu0 %v4484_v15  ;;  %4066 = vmatprep.subr.bf16.mxu1 %v4483_v28  ;;  %v4666_v24 = vld [vmem:[%s5966_s2] ss:$0 sm:$0xff] }
  0x59   : > { %v4620_v34 = vpop.eup %4619  ;;  %v546_v56 = vmul.f32 %v4618_v50, %v4868_v31  ;;  %4645 = vrcp.f32 %v456_v33  ;;  %4116 = vmatprep.subr.bf16.mxu0 %v4486_v29 }
  0x5a   : > { %v4622_v40 = vpop.eup %4621  ;;  %4647 = vrcp.f32 %v457_v30  ;;  %v470_v11 = vadd.f32 1.0, %v4620_v34  ;;  %v1208_v30 = vld [vmem:[#allocation2 + $0x1a] sm:$0xff] }
  0x5b   : > { %v4624_v47 = vpop.eup %4623  ;;  %633 = vst [vmem:[#allocation2 + $0x61] sm:$0xff] %v546_v56  ;;  %v471_v58 = vadd.f32 1.0, %v4622_v40  ;;  %4067 = vmatpush3.bf16.msra.mxu1 %v4483_v28  ;;  %v1210_v40 = vld [vmem:[#allocation2 + $0x32] sm:$0xff] }
  0x5c   : > { %v4626_v31 = vpop.eup %4625  ;;  %v547_v42 = vmul.f32 %v4624_v47, %v4874_v36  ;;  %4649 = vrcp.f32 %v470_v11  ;;  %4117 = vmatpush3.bf16.msra.mxu0 %v4486_v29  ;;  %4068 = vmatprep.subr.bf16.mxu1 %v4485_v39  ;;  %v5043_v36 = vld [vmem:[%s5967_s3 + $0x138] sm:$0xff]  }
  0x5d   : > { %v4628_v27 = vpop.eup %4627  ;;  %4651 = vrcp.f32 %v471_v58  ;;  %v472_v49 = vadd.f32 1.0, %v4626_v31  ;;  %4118 = vmatprep.subr.bf16.mxu0 %v4488_v44  ;;  %v1211_v11 = vld [vmem:[#allocation2 + $0x3a] sm:$0xff] }
  0x5e   : > { %v4630_v51 = vpop.eup %4629  ;;  %634 = vst [vmem:[#allocation2 + $0x69] sm:$0xff] %v547_v42  ;;  %v5038_v52 = vpack.c.bf16 %v547_v42, %v546_v56  ;;  %v473_v53 = vadd.f32 1.0, %v4628_v27  ;;  %v661_v27 = vld [vmem:[#allocation2 + $0x18] sm:$0xff] }
  0x5f   : > { %v4632_v3 = vpop.eup %4631  ;;  %v548_v19 = vmul.f32 %v4630_v51, %v4879_v41  ;;  %4653 = vrcp.f32 %v472_v49  ;;  %4069 = vmatpush3.bf16.msra.mxu1 %v4485_v39  ;;  %v5055_v41 = vld [vmem:[%s5967_s3 + $0xf8] sm:$0xff]   ;;  %v5105_v49 = vpack.c.bf16 %v1211_v11, %v1210_v40  ;;  %v662_v51 = vld [vmem:[#allocation2 + $0x20] sm:$0xff]  ;;  %v1223_v40 = vld [vmem:[#allocation2 + $0xca] sm:$0xff] }
  0x60   : > { %v4634_v54 = vpop.eup %4633  ;;  %4032 = vmatprep.mubr.bf16.mxu0 %v5038_v52  ;;  %v549_v59 = vmul.f32 %v4632_v3, %v4883_v45  ;;  %4655 = vrcp.f32 %v473_v53  ;;  %4119 = vmatpush3.bf16.msra.mxu0 %v4488_v44  ;;  %v4667_v44 = vld [vmem:[#allocation2] sm:$0xff]  ;;  %v663_v53 = vld [vmem:[#allocation2 + $0x30] sm:$0xff]  ;;  %v664_v3 = vld [vmem:[#allocation2 + $0x38] sm:$0xff] }
  0x61   : > { %v4636_v60 = vpop.eup %4635  ;;  %635 = vst [vmem:[#allocation2 + $0x79] sm:$0xff] %v548_v19  ;;  %v562_v6 = vmul.f32 %v4634_v54, %v4899_v5  ;;  %4070 = vmatprep.subr.bf16.mxu1 %v4487_v57  ;;  %4200 = vmatprep.subr.bf16.mxu0 %v5043_v36  ;;  %v5098_v47 = vpack.c.bf16 %v4667_v44, %v4667_v44  ;;  %v1213_v54 = vld [vmem:[#allocation2 + $0x52] sm:$0xff]  ;;  %v4502_v11 = vld [vmem:[%s5967_s3 + $0x108] sm:$0xff]  }
  0x62   : > { %v4638_v61 = vpop.eup %4637  ;;  %636 = vst [vmem:[#allocation2 + $0x81] sm:$0xff] %v549_v59  ;;  %v5049_v1 = vpack.c.bf16 %v549_v59, %v548_v19  ;;  %v563_v7 = vmul.f32 %v4636_v60, %v4902_v9  ;;  %v1212_v19 = vld [vmem:[#allocation2 + $0x4a] sm:$0xff] }
  0x63   : > { %v4640_v45 = vpop.eup %4639  ;;  %649 = vst [vmem:[#allocation2 + $0x121] sm:$0xff] %v562_v6  ;;  %v564_v5 = vmul.f32 %v4638_v61, %v4909_v26  ;;  %4071 = vmatpush3.bf16.msra.mxu1 %v4487_v57  ;;  %v4494_v59 = vld [vmem:[%s5967_s3 + $0x128] sm:$0xff]  }
  0x64   : > { %v4642_v17 = vpop.eup %4641  ;;  %4033 = vmatmul.mubr.bf16.gmra.mxu0 %v5049_v1  ;;  %650 = vst [vmem:[#allocation2 + $0x129] sm:$0xff] %v563_v7  ;;  %v5060_v22 = vpack.c.bf16 %v563_v7, %v562_v6  ;;  %v565_v9 = vmul.f32 %v4640_v45, %v4916_v38  ;;  %4152 = vmatprep.subr.bf16.mxu1 %v5055_v41  ;;  %v4491_v45 = vld [vmem:[%s5967_s3 + $0xf0] sm:$0xff]  }
  0x65   : > { %v4644_v4 = vpop.eup %4643  ;;  %651 = vst [vmem:[#allocation2 + $0x139] sm:$0xff] %v564_v5  ;;  %v550_v8 = vmul.f32 %v4642_v17, %v4933_v0  ;;  %v1214_v60 = vld [vmem:[#allocation2 + $0x62] sm:$0xff]  ;;  %v5118_v6 = vpack.c.bf16 %v662_v51, %v661_v27  ;;  %v1215_v61 = vld [vmem:[#allocation2 + $0x6a] sm:$0xff]  ;;  %v5120_v7 = vpack.c.bf16 %v664_v3, %v663_v53 }
  0x66   : > { %v4646_v12 = vpop.eup %4645  ;;  %4048 = vmatprep.mubr.bf16.mxu1 %v5060_v22  ;;  %652 = vst [vmem:[#allocation2 + $0x141] sm:$0xff] %v565_v9  ;;  %v5065_v26 = vpack.c.bf16 %v565_v9, %v564_v5  ;;  %v551_v23 = vmul.f32 %v4644_v4, %v4936_v2  ;;  %v4665_v2 = vld [vmem:[%s5965_s1] ss:$0 sm:$0xff]  ;;  %v5125_v5 = vpack.c.bf16 %v1213_v54, %v1212_v19  ;;  %v666_v9 = vld [vmem:[#allocation2 + $0x50] sm:$0xff]  ;;  %v668_v25 = vld [vmem:[#allocation2 + $0x68] sm:$0xff] }
  0x67   : > { %v4648_v14 = vpop.eup %4647  ;;  %637 = vst [vmem:[#allocation2 + $0x91] sm:$0xff] %v550_v8  ;;  %v552_v38 = vmul.f32 %v4646_v12, %v4941_v13  ;;  %v307_v18 = vmul.f32 %v4665_v2, %v268_v32  ;;  %v308_v28 = vmul.f32 %v4665_v2, %v269_v55  ;;  %v4496_v17 = vld [vmem:[%s5967_s3 + $0x120] sm:$0xff]   ;;  %v5130_v4 = vpack.c.bf16 %v1215_v61, %v1214_v60  ;;  %v4493_v12 = vld [vmem:[%s5967_s3 + $0xe8] sm:$0xff]  }
  0x68   : > { %4049 = vmatmul.mubr.bf16.gmra.mxu1 %v5065_v26  ;;  %638 = vst [vmem:[#allocation2 + $0x99] sm:$0xff] %v551_v23  ;;  %v5071_v0 = vpack.c.bf16 %v551_v23, %v550_v8  ;;  %v553_v15 = vmul.f32 %v4648_v14, %v4947_v21  ;;  %v667_v8 = vld [vmem:[#allocation2 + $0x60] sm:$0xff]  ;;  %v676_v3 = vld [vmem:[#allocation2 + $0xc8] sm:$0xff] }
  0x69   : > { %v4650_v43 = vpop.eup %4649  ;;  %639 = vst [vmem:[#allocation2 + $0xa9] sm:$0xff] %v552_v38  ;;  %v5087_v29 = vadd.f32 %v4666_v24, %v307_v18  ;;  %v5093_v34 = vadd.f32 %v4666_v24, %v308_v28  ;;  %v1216_v23 = vld [vmem:[#allocation2 + $0x7a] sm:$0xff]  ;;  %v1217_v35 = vld [vmem:[#allocation2 + $0x82] sm:$0xff] }
  0x6a   : > { %v4652_v37 = vpop.eup %4651  ;;  %4036 = vmatprep.mubr.bf16.mxu0 %v5071_v0  ;;  %640 = vst [vmem:[#allocation2 + $0xb1] sm:$0xff] %v553_v15  ;;  %v5079_v13 = vpack.c.bf16 %v553_v15, %v552_v38  ;;  %v566_v48 = vmul.f32 %v4650_v43, %v4962_v20  ;;  %v4498_v15 = vld [vmem:[%s5967_s3 + $0x118] sm:$0xff]   ;;  %v5147_v18 = vpack.c.bf16 %v1217_v35, %v1216_v23  ;;  %v670_v24 = vld [vmem:[#allocation2 + $0x80] sm:$0xff]  ;;  %v4501_v19 = vld [vmem:[%s5967_s3 + $0xc8] sm:$0xff]  }
  0x6b   : > { %v567_v21 = vmul.f32 %v4652_v37, %v4967_v62  ;;  %v1209_v62 = vld [vmem:[#allocation2 + $0x22] sm:$0xff]  ;;  %v378_v56 = vsub.f32 0.0, %v5087_v29  ;;  %v379_v58 = vsub.f32 0.0, %v5093_v34  ;;  %v669_v28 = vld [vmem:[#allocation2 + $0x78] sm:$0xff] }
  0x6c   : > { %v4654_v46 = vpop.eup %4653  ;;  %4037 = vmatmul.mubr.bf16.gmra.mxu0 %v5079_v13  ;;  %653 = vst [vmem:[#allocation2 + $0x151] sm:$0xff] %v566_v48  ;;  %v5103_v42 = vpack.c.bf16 %v1209_v62, %v1208_v30  ;;  %v4495_v37 = vld [vmem:[%s5967_s3 + $0xe0] sm:$0xff]  }
  0x6d   : > { %v4656_v33 = vpop.eup %4655  ;;  %654 = vst [vmem:[#allocation2 + $0x159] sm:$0xff] %v567_v21  ;;  %v5090_v50 = vpack.c.bf16 %v567_v21, %v566_v48  ;;  %v568_v20 = vmul.f32 %v4654_v46, %v4990_v10  ;;  %4120 = vmatprep.mubr.bf16.mxu0 %v1238_v16  ;;  %v440_v10 = vmul.f32 1.442695, %v378_v56  ;;  %v442_v57 = vmul.f32 1.442695, %v379_v58  ;;  %v4500_v21 = vld [vmem:[%s5967_s3 + $0x110] sm:$0xff]  }
  0x6e   : > { %v569_v39 = vmul.f32 %v4656_v33, %v4993_v63  ;;  %v4492_v63 = vld [vmem:[%s5967_s3 + $0x130] sm:$0xff]   ;;  %v5164_v56 = vpack.c.bf16 %v670_v24, %v669_v28  ;;  %v675_v53 = vld [vmem:[#allocation2 + $0xc0] sm:$0xff] }
  0x6f   : > { %4052 = vmatprep.mubr.bf16.mxu1 %v5090_v50  ;;  %655 = vst [vmem:[#allocation2 + $0x169] sm:$0xff] %v568_v20  ;;  %4657 = vpow2.f32 %v440_v10  ;;  %v1218_v14 = vld [vmem:[#allocation2 + $0x92] sm:$0xff]  ;;  %v1219_v38 = vld [vmem:[#allocation2 + $0x9a] sm:$0xff]  ;;  %v1231_v28 = vld [vmem:[#allocation2 + $0x12a] sm:$0xff] }
  0x70   : > { %656 = vst [vmem:[#allocation2 + $0x171] sm:$0xff] %v569_v39  ;;  %v5101_v31 = vpack.c.bf16 %v569_v39, %v568_v20  ;;  %4659 = vpow2.f32 %v442_v57  ;;  %v5152_v48 = vpack.c.bf16 %v1219_v38, %v1218_v14  ;;  %v671_v46 = vld [vmem:[#allocation2 + $0x90] sm:$0xff]  ;;  %v672_v33 = vld [vmem:[#allocation2 + $0x98] sm:$0xff]  ;;  %v1222_v39 = vld [vmem:[#allocation2 + $0xc2] sm:$0xff] }
  0x71   : > { %v4497_v20 = vld [vmem:[%s5967_s3 + $0xd8] sm:$0xff]   ;;  %v1220_v30 = vld [vmem:[#allocation2 + $0xaa] sm:$0xff]  ;;  %v5169_v44 = vpack.c.bf16 %v672_v33, %v671_v46  ;;  %v5176_v27 = vpack.c.bf16 %v1223_v40, %v1222_v39  ;;  %v4503_v23 = vld [vmem:[%s5967_s3 + $0xc0] sm:$0xff]  }
  0x72   : > { %4053 = vmatmul.mubr.bf16.gmra.mxu1 %v5101_v31  ;;  %v1221_v62 = vld [vmem:[#allocation2 + $0xb2] sm:$0xff]  ;;  %v673_v57 = vld [vmem:[#allocation2 + $0xa8] sm:$0xff]  ;;  %v1224_v54 = vld [vmem:[#allocation2 + $0xda] sm:$0xff] }
  0x73   : > { %4072 = vmatprep.mubr.bf16.mxu1 %v5098_v47  ;;  %v5171_v58 = vpack.c.bf16 %v1221_v62, %v1220_v30  ;;  %v4499_v10 = vld [vmem:[%s5967_s3 + $0xd0] sm:$0xff]   ;;  %v678_v38 = vld [vmem:[#allocation2 + $0xe0] sm:$0xff]  ;;  %v684_v39 = vld [vmem:[#allocation2 + $0x128] sm:$0xff] }
  0x74   : > { %4121 = vmatmul.mubr.bf16.vlgmr.msra.gmra.mxu0 %v5103_v42  ;;  %v674_v51 = vld [vmem:[#allocation2 + $0xb0] sm:$0xff]  ;;  %v683_v62 = vld [vmem:[#allocation2 + $0x120] sm:$0xff] }
  0x75   : > { %4201 = vmatpush3.bf16.msra.mxu0 %v5043_v36  ;;  %4124 = vmatprep.mubr.bf16.mxu0 %v5105_v49  ;;  %v665_v36 = vld [vmem:[#allocation2 + $0x48] sm:$0xff]  ;;  %v5188_v61 = vpack.c.bf16 %v674_v51, %v673_v57  ;;  %v682_v30 = vld [vmem:[#allocation2 + $0x110] sm:$0xff]  ;;  %v1232_v40 = vld [vmem:[#allocation2 + $0x13a] sm:$0xff]  ;;  %v5233_v51 = vpack.c.bf16 %v684_v39, %v683_v62 }
  0x76   : > { %4202 = vmatprep.subr.bf16.mxu0 %v4492_v63  ;;  %v5143_v43 = vpack.c.bf16 %v666_v9, %v665_v36  ;;  %v5193_v36 = vld [vmem:[%s5967_s3 + $0x1b8] sm:$0xff]   ;;  %v5195_v9 = vpack.c.bf16 %v676_v3, %v675_v53  ;;  %v4508_v39 = vld [vmem:[%s5967_s3 + $0x1b0] sm:$0xff]  }
  0x77   : > { %v1235_v57 = vld [vmem:[#allocation2 + $0x15a] sm:$0xff] }
  0x79   : > { %4203 = vmatpush3.bf16.msra.mxu0 %v4492_v63  ;;  %v4504_v63 = vld [vmem:[%s5967_s3 + $0x100] sm:$0xff]  }
  0x7a   : > { %4073 = vmatmul.mubr.bf16.vlgmr.msra.gmra.mxu1 %v5118_v6  ;;  %4204 = vmatprep.subr.bf16.mxu0 %v4494_v59 }
  0x7b   : > { %4153 = vmatpush3.bf16.msra.mxu1 %v5055_v41  ;;  %4076 = vmatprep.mubr.bf16.mxu1 %v5120_v7  ;;  %v5145_v41 = vpack.c.bf16 %v668_v25, %v667_v8 }
  0x7c   : > { %4125 = vmatmul.mubr.bf16.gmra.mxu0 %v5125_v5  ;;  %4154 = vmatprep.subr.bf16.mxu1 %v4491_v45  ;;  %v4658_v32 = vpop.eup %4657 }
  0x7d   : > { %4128 = vmatprep.mubr.bf16.mxu0 %v5130_v4  ;;  %4205 = vmatpush3.bf16.msra.mxu0 %v4494_v59  ;;  %v474_v16 = vadd.f32 1.0, %v4658_v32  ;;  %v4660_v2 = vpop.eup %4659  ;;  %v1225_v59 = vld [vmem:[#allocation2 + $0xe2] sm:$0xff]  ;;  %v679_v32 = vld [vmem:[#allocation2 + $0xf0] sm:$0xff] }
  0x7e   : > { %4206 = vmatprep.subr.bf16.mxu0 %v4496_v17  ;;  %v475_v55 = vadd.f32 1.0, %v4660_v2  ;;  %v1228_v2 = vld [vmem:[#allocation2 + $0x10a] sm:$0xff] }
  0x7f   : > { %4155 = vmatpush3.bf16.msra.mxu1 %v4491_v45  ;;  %4661 = vrcp.f32 %v474_v16  ;;  %v1226_v45 = vld [vmem:[#allocation2 + $0xf2] sm:$0xff] }
  0x80   : > { %4156 = vmatprep.subr.bf16.mxu1 %v4493_v12  ;;  %4663 = vrcp.f32 %v475_v55  ;;  %v680_v16 = vld [vmem:[#allocation2 + $0xf8] sm:$0xff] }
  0x81   : > { %4207 = vmatpush3.bf16.msra.mxu0 %v4496_v17  ;;  %v1227_v17 = vld [vmem:[#allocation2 + $0xfa] sm:$0xff]  ;;  %v5220_v24 = vpack.c.bf16 %v680_v16, %v679_v32  ;;  %v689_v32 = vld [vmem:[#allocation2 + $0x168] sm:$0xff]  ;;  %v690_v16 = vld [vmem:[#allocation2 + $0x170] sm:$0xff] }
  0x82   : > { %4077 = vmatmul.mubr.bf16.gmra.mxu1 %v5143_v43  ;;  %4208 = vmatprep.subr.bf16.mxu0 %v4498_v15  ;;  %v5203_v35 = vpack.c.bf16 %v1227_v17, %v1226_v45  ;;  %v1236_v45 = vld [vmem:[#allocation2 + $0x16a] sm:$0xff]  ;;  %v1237_v17 = vld [vmem:[#allocation2 + $0x172] sm:$0xff] }
  0x83   : > { %4080 = vmatprep.mubr.bf16.mxu1 %v5145_v41  ;;  %4157 = vmatpush3.bf16.msra.mxu1 %v4493_v12  ;;  %v5198_v12 = vpack.c.bf16 %v1225_v59, %v1224_v54  ;;  %v686_v54 = vld [vmem:[#allocation2 + $0x140] sm:$0xff]  ;;  %v687_v59 = vld [vmem:[#allocation2 + $0x150] sm:$0xff] }
  0x84   : > { %4129 = vmatmul.mubr.bf16.gmra.mxu0 %v5147_v18  ;;  %4158 = vmatprep.subr.bf16.mxu1 %v4495_v37 }
  0x85   : > { %4132 = vmatprep.mubr.bf16.mxu0 %v5152_v48  ;;  %4209 = vmatpush3.bf16.msra.mxu0 %v4498_v15 }
  0x86   : > { %4210 = vmatprep.subr.bf16.mxu0 %v4500_v21 }
  0x87   : > { %4159 = vmatpush3.bf16.msra.mxu1 %v4495_v37  ;;  %v1229_v37 = vld [vmem:[#allocation2 + $0x112] sm:$0xff] }
  0x88   : > { %4160 = vmatprep.subr.bf16.mxu1 %v4497_v20  ;;  %v5222_v46 = vpack.c.bf16 %v1229_v37, %v1228_v2  ;;  %v1820_v2 = vld [vmem:[#allocation2 + $0x31] sm:$0xff]  ;;  %v1821_v37 = vld [vmem:[#allocation2 + $0x39] sm:$0xff] }
  0x89   : > { %4211 = vmatpush3.bf16.msra.mxu0 %v4500_v21  ;;  %v1230_v21 = vld [vmem:[#allocation2 + $0x122] sm:$0xff] }
  0x8a   : > { %4081 = vmatmul.mubr.bf16.gmra.mxu1 %v5164_v56  ;;  %4212 = vmatprep.subr.bf16.mxu0 %v4502_v11  ;;  %v5225_v33 = vpack.c.bf16 %v1231_v28, %v1230_v21  ;;  %v5252_v21 = vpack.c.bf16 %v690_v16, %v689_v32  ;;  %v1822_v28 = vld [vmem:[#allocation2 + $0x49] sm:$0xff]  ;;  %v1839_v16 = vld [vmem:[#allocation2 + $0x111] sm:$0xff] }
  0x8b   : > { %4084 = vmatprep.mubr.bf16.mxu1 %v5169_v44  ;;  %4161 = vmatpush3.bf16.msra.mxu1 %v4497_v20  ;;  %v681_v20 = vld [vmem:[#allocation2 + $0x108] sm:$0xff] }
  0x8c   : > { %4133 = vmatmul.mubr.bf16.gmra.mxu0 %v5171_v58  ;;  %4162 = vmatprep.subr.bf16.mxu1 %v4499_v10  ;;  %v4662_v60 = vpop.eup %4661  ;;  %v1838_v32 = vld [vmem:[#allocation2 + $0x109] sm:$0xff] }
  0x8d   : > { %4136 = vmatprep.mubr.bf16.mxu0 %v5176_v27  ;;  %4213 = vmatpush3.bf16.msra.mxu0 %v4502_v11  ;;  %v570_v8 = vmul.f32 %v4662_v60, %v5087_v29  ;;  %v4664_v25 = vpop.eup %4663  ;;  %v677_v29 = vld [vmem:[#allocation2 + $0xd8] sm:$0xff]  ;;  %v1233_v11 = vld [vmem:[#allocation2 + $0x142] sm:$0xff] }
  0x8e   : > { %4214 = vmatprep.subr.bf16.mxu0 %v4504_v63  ;;  %v571_v14 = vmul.f32 %v4664_v25, %v5093_v34  ;;  %v5215_v34 = vld [vmem:[%s5967_s3 + $0x178] sm:$0xff]   ;;  %v5218_v55 = vpack.c.bf16 %v678_v38, %v677_v29  ;;  %v5235_v53 = vpack.c.bf16 %v1233_v11, %v1232_v40  ;;  %v5247_v29 = vpack.c.bf16 %v1237_v17, %v1236_v45  ;;  %v4510_v40 = vld [vmem:[%s5967_s3 + $0x1a8] sm:$0xff]   ;;  %v4507_v11 = vld [vmem:[%s5967_s3 + $0x170] sm:$0xff]  }
  0x8f   : > { %4163 = vmatpush3.bf16.msra.mxu1 %v4499_v10  ;;  %657 = vst [vmem:[#allocation2 + $0x181] sm:$0xff] %v570_v8  ;;  %v5231_v10 = vpack.c.bf16 %v682_v30, %v681_v20  ;;  %v688_v60 = vld [vmem:[#allocation2 + $0x158] sm:$0xff]  ;;  %v5254_v30 = vpack.c.bf16 %v1821_v37, %v1820_v2 }
  0x90   : > { %4164 = vmatprep.subr.bf16.mxu1 %v4501_v19  ;;  %658 = vst [vmem:[#allocation2 + $0x189] sm:$0xff] %v571_v14  ;;  %v5209_v15 = vpack.c.bf16 %v571_v14, %v570_v8  ;;  %v1818_v25 = vld [vmem:[#allocation2 + $0x19] sm:$0xff]  ;;  %v5245_v14 = vpack.c.bf16 %v688_v60, %v687_v59  ;;  %v1823_v20 = vld [vmem:[#allocation2 + $0x51] sm:$0xff]  ;;  %v1835_v59 = vld [vmem:[#allocation2 + $0xe1] sm:$0xff] }
  0x91   : > { %4215 = vmatpush3.bf16.msra.mxu0 %v4504_v63  ;;  %v1234_v63 = vld [vmem:[#allocation2 + $0x152] sm:$0xff]  ;;  %v5256_v62 = vpack.c.bf16 %v1823_v20, %v1822_v28  ;;  %v4518_v60 = vld [vmem:[%s5967_s3 + $0x188] sm:$0xff]   ;;  %v4519_v28 = vld [vmem:[%s5967_s3 + $0x140] sm:$0xff]   ;;  %v5327_v20 = vpack.c.bf16 %v1839_v16, %v1838_v32 }
  0x92   : > { %4085 = vmatmul.mubr.bf16.gmra.mxu1 %v5188_v61  ;;  %4296 = vmatprep.subr.bf16.mxu0 %v5193_v36  ;;  %v5237_v3 = vpack.c.bf16 %v1235_v57, %v1234_v63  ;;  %v4514_v63 = vld [vmem:[%s5967_s3 + $0x198] sm:$0xff]   ;;  %v1832_v57 = vld [vmem:[#allocation2 + $0xc1] sm:$0xff] }
  0x93   : > { %4088 = vmatprep.mubr.bf16.mxu1 %v5195_v9  ;;  %4165 = vmatpush3.bf16.msra.mxu1 %v4501_v19  ;;  %v685_v19 = vld [vmem:[#allocation2 + $0x138] sm:$0xff]  ;;  %v3047_v16 = vld [vmem:[#allocation2 + $0x62] sm:$0xff] }
  0x94   : > { %4137 = vmatmul.mubr.bf16.gmra.mxu0 %v5198_v12  ;;  %4166 = vmatprep.subr.bf16.mxu1 %v4503_v23  ;;  %v5243_v8 = vpack.c.bf16 %v686_v54, %v685_v19  ;;  %v1833_v19 = vld [vmem:[#allocation2 + $0xc9] sm:$0xff]  ;;  %v1834_v54 = vld [vmem:[#allocation2 + $0xd9] sm:$0xff] }
  0x95   : > { %4140 = vmatprep.mubr.bf16.mxu0 %v5203_v35  ;;  %v5302_v45 = vpack.c.bf16 %v1833_v19, %v1832_v57  ;;  %v5307_v17 = vpack.c.bf16 %v1835_v59, %v1834_v54  ;;  %v4522_v2 = vld [vmem:[%s5967_s3 + $0x238] sm:$0xff]  }
  0x97   : > { %4167 = vmatpush3.bf16.msra.mxu1 %v4503_v23  ;;  %v1819_v23 = vld [vmem:[#allocation2 + $0x21] sm:$0xff] }
  0x98   : > { %4248 = vmatprep.subr.bf16.mxu1 %v5215_v34  ;;  %v1850_v38 = vpack.c.bf16 %v1819_v23, %v1818_v25  ;;  %v4517_v25 = vld [vmem:[%s5967_s3 + $0x148] sm:$0xff]   ;;  %v1836_v23 = vld [vmem:[#allocation2 + $0xf1] sm:$0xff] }
  0x9a   : > { %4089 = vmatmul.mubr.bf16.gmra.mxu1 %v5218_v55 }
  0x9b   : > { %4092 = vmatprep.mubr.bf16.mxu1 %v5220_v24 }
  0x9c   : > { %4141 = vmatmul.mubr.bf16.gmra.mxu0 %v5222_v46 }
  0x9d   : > { %4144 = vmatprep.mubr.bf16.mxu0 %v5225_v33 }
  0xa2   : > { %4093 = vmatmul.mubr.bf16.gmra.mxu1 %v5231_v10 }
  0xa3   : > { %4096 = vmatprep.mubr.bf16.mxu1 %v5233_v51 }
  0xa4   : > { %4145 = vmatmul.mubr.bf16.gmra.mxu0 %v5235_v53 }
  0xa5   : > { %4148 = vmatprep.mubr.bf16.mxu0 %v5237_v3 }
  0xaa   : > { %4097 = vmatmul.mubr.bf16.gmra.mxu1 %v5243_v8 }
  0xab   : > { %4100 = vmatprep.mubr.bf16.mxu1 %v5245_v14 }
  0xac   : > { %4149 = vmatmul.mubr.bf16.gmra.mxu0 %v5247_v29 }
  0xad   : > { %4216 = vmatprep.mubr.bf16.mxu0 %v1850_v38  ;;  %v1837_v38 = vld [vmem:[#allocation2 + $0xf9] sm:$0xff] }
  0xae   : > { %v5322_v37 = vpack.c.bf16 %v1837_v38, %v1836_v23  ;;  %v3046_v23 = vld [vmem:[#allocation2 + $0x52] sm:$0xff] }
  0xb2   : > { %4101 = vmatmul.mubr.bf16.gmra.mxu1 %v5252_v21 }
  0xb3   : > { %4168 = vmatprep.mubr.bf16.mxu1 %v5118_v6  ;;  %v4512_v6 = vld [vmem:[%s5967_s3 + $0x1a0] sm:$0xff]  }
  0xb4   : > { %4217 = vmatmul.mubr.bf16.vlgmr.msra.gmra.mxu0 %v5254_v30 }
  0xb5   : > { %4297 = vmatpush3.bf16.msra.mxu0 %v5193_v36  ;;  %4220 = vmatprep.mubr.bf16.mxu0 %v5256_v62  ;;  %v4509_v36 = vld [vmem:[%s5967_s3 + $0x168] sm:$0xff]  }
  0xb6   : > { %4298 = vmatprep.subr.bf16.mxu0 %v4508_v39 }
  0xb9   : > { %4299 = vmatpush3.bf16.msra.mxu0 %v4508_v39  ;;  %v4521_v39 = vld [vmem:[%s5967_s3 + $0x1f8] sm:$0xff]  }
  0xba   : > { %4169 = vmatmul.mubr.bf16.vlgmr.msra.gmra.mxu1 %v5120_v7  ;;  %4300 = vmatprep.subr.bf16.mxu0 %v4510_v40 }
  0xbb   : > { %4249 = vmatpush3.bf16.msra.mxu1 %v5215_v34  ;;  %4172 = vmatprep.mubr.bf16.mxu1 %v5143_v43  ;;  %v4511_v34 = vld [vmem:[%s5967_s3 + $0x160] sm:$0xff]  }
  0xbc   : > { %4221 = vmatmul.mubr.bf16.gmra.mxu0 %v5038_v52  ;;  %4250 = vmatprep.subr.bf16.mxu1 %v4507_v11  ;;  %v4516_v52 = vld [vmem:[%s5967_s3 + $0x190] sm:$0xff]  }
  0xbd   : > { %4224 = vmatprep.mubr.bf16.mxu0 %v5049_v1  ;;  %4301 = vmatpush3.bf16.msra.mxu0 %v4510_v40  ;;  %v4513_v1 = vld [vmem:[%s5967_s3 + $0x158] sm:$0xff]   ;;  %v1542_v40 = vld [vmem:[#allocation2 + $0x180] sm:$0xff] }
  0xbe   : > { %4302 = vmatprep.subr.bf16.mxu0 %v4512_v6 }
  0xbf   : > { %4251 = vmatpush3.bf16.msra.mxu1 %v4507_v11  ;;  %v1543_v11 = vld [vmem:[#allocation2 + $0x188] sm:$0xff] }
  0xc0   : > { %4252 = vmatprep.subr.bf16.mxu1 %v4509_v36 }
  0xc1   : > { %4303 = vmatpush3.bf16.msra.mxu0 %v4512_v6 }
  0xc2   : > { %4173 = vmatmul.mubr.bf16.gmra.mxu1 %v5145_v41  ;;  %4304 = vmatprep.subr.bf16.mxu0 %v4514_v63 }
  0xc3   : > { %4176 = vmatprep.mubr.bf16.mxu1 %v5164_v56  ;;  %4253 = vmatpush3.bf16.msra.mxu1 %v4509_v36 }
  0xc4   : > { %4225 = vmatmul.mubr.bf16.gmra.mxu0 %v5071_v0  ;;  %4254 = vmatprep.subr.bf16.mxu1 %v4511_v34  ;;  %v4515_v0 = vld [vmem:[%s5967_s3 + $0x150] sm:$0xff]  }
  0xc5   : > { %4228 = vmatprep.mubr.bf16.mxu0 %v5079_v13  ;;  %4305 = vmatpush3.bf16.msra.mxu0 %v4514_v63  ;;  %v4520_v13 = vld [vmem:[%s5967_s3 + $0x180] sm:$0xff]   ;;  %v4533_v63 = vld [vmem:[%s5967_s3 + $0x1c8] sm:$0xff]  }
  0xc6   : > { %4306 = vmatprep.subr.bf16.mxu0 %v4516_v52 }
  0xc7   : > { %4255 = vmatpush3.bf16.msra.mxu1 %v4511_v34 }
  0xc8   : > { %4256 = vmatprep.subr.bf16.mxu1 %v4513_v1 }
  0xc9   : > { %4307 = vmatpush3.bf16.msra.mxu0 %v4516_v52 }
  0xca   : > { %4177 = vmatmul.mubr.bf16.gmra.mxu1 %v5169_v44  ;;  %4308 = vmatprep.subr.bf16.mxu0 %v4518_v60 }
  0xcb   : > { %4180 = vmatprep.mubr.bf16.mxu1 %v5188_v61  ;;  %4257 = vmatpush3.bf16.msra.mxu1 %v4513_v1 }
  0xcc   : > { %4229 = vmatmul.mubr.bf16.gmra.mxu0 %v5302_v45  ;;  %4258 = vmatprep.subr.bf16.mxu1 %v4515_v0 }
  0xcd   : > { %4232 = vmatprep.mubr.bf16.mxu0 %v5307_v17  ;;  %4309 = vmatpush3.bf16.msra.mxu0 %v4518_v60  ;;  %v2155_v60 = vld [vmem:[#allocation2 + $0x18a] sm:$0xff] }
  0xce   : > { %4310 = vmatprep.subr.bf16.mxu0 %v4520_v13 }
  0xcf   : > { %4259 = vmatpush3.bf16.msra.mxu1 %v4515_v0 }
  0xd0   : > { %4260 = vmatprep.subr.bf16.mxu1 %v4517_v25 }
  0xd1   : > { %4311 = vmatpush3.bf16.msra.mxu0 %v4520_v13 }
  0xd2   : > { %4181 = vmatmul.mubr.bf16.gmra.mxu1 %v5195_v9  ;;  %4392 = vmatprep.subr.bf16.mxu0 %v4522_v2 }
  0xd3   : > { %4184 = vmatprep.mubr.bf16.mxu1 %v5218_v55  ;;  %4261 = vmatpush3.bf16.msra.mxu1 %v4517_v25  ;;  %v3045_v25 = vld [vmem:[#allocation2 + $0x4a] sm:$0xff] }
  0xd4   : > { %4233 = vmatmul.mubr.bf16.gmra.mxu0 %v5322_v37  ;;  %4262 = vmatprep.subr.bf16.mxu1 %v4519_v28 }
  0xd5   : > { %4236 = vmatprep.mubr.bf16.mxu0 %v5327_v20 }
  0xd7   : > { %4263 = vmatpush3.bf16.msra.mxu1 %v4519_v28  ;;  %v3076_v28 = vpack.c.bf16 %v3046_v23, %v3045_v25  ;;  %v2745_v25 = vld [vmem:[#allocation2 + $0x91] sm:$0xff]  ;;  %v2746_v23 = vld [vmem:[#allocation2 + $0x99] sm:$0xff] }
  0xd8   : > { %4344 = vmatprep.subr.bf16.mxu1 %v4521_v39 }
  0xda   : > { %4185 = vmatmul.mubr.bf16.gmra.mxu1 %v5220_v24 }
  0xdb   : > { %4188 = vmatprep.mubr.bf16.mxu1 %v5231_v10 }
  0xdc   : > { %4237 = vmatmul.mubr.bf16.gmra.mxu0 %v5060_v22  ;;  %v5348_v22 = vpack.c.bf16 %v1543_v11, %v1542_v40 }
  0xdd   : > { %4240 = vmatprep.mubr.bf16.mxu0 %v5065_v26  ;;  %v4524_v26 = vld [vmem:[%s5967_s3 + $0x230] sm:$0xff]  }
  0xe2   : > { %4189 = vmatmul.mubr.bf16.gmra.mxu1 %v5233_v51 }
  0xe3   : > { %4192 = vmatprep.mubr.bf16.mxu1 %v5243_v8 }
  0xe4   : > { %4241 = vmatmul.mubr.bf16.gmra.mxu0 %v5090_v50  ;;  %v4526_v50 = vld [vmem:[%s5967_s3 + $0x228] sm:$0xff]  }
  0xe5   : > { %4244 = vmatprep.mubr.bf16.mxu0 %v5101_v31  ;;  %v4523_v31 = vld [vmem:[%s5967_s3 + $0x1f0] sm:$0xff]  }
  0xea   : > { %4193 = vmatmul.mubr.bf16.gmra.mxu1 %v5245_v14 }
  0xeb   : > { %4196 = vmatprep.mubr.bf16.mxu1 %v5252_v21 }
  0xec   : > { %4245 = vmatmul.mubr.bf16.gmra.mxu0 %v5209_v15 }
  0xed   : > { %4312 = vmatprep.mubr.bf16.mxu0 %v5120_v7  ;;  %v4525_v7 = vld [vmem:[%s5967_s3 + $0x1e8] sm:$0xff]  }
  0xf2   : > { %4197 = vmatmul.mubr.bf16.gmra.mxu1 %v5348_v22 }
  0xf3   : > { %4264 = vmatprep.mubr.bf16.mxu1 %v5103_v42  ;;  %v4528_v42 = vld [vmem:[%s5967_s3 + $0x220] sm:$0xff]  }
  0xf4   : > { %4313 = vmatmul.mubr.bf16.vlgmr.msra.gmra.mxu0 %v5143_v43  ;;  %v4532_v43 = vld [vmem:[%s5967_s3 + $0x210] sm:$0xff]  }
  0xf5   : > { %4393 = vmatpush3.bf16.msra.mxu0 %v4522_v2  ;;  %4316 = vmatprep.mubr.bf16.mxu0 %v5145_v41  ;;  %v3048_v2 = vld [vmem:[#allocation2 + $0x6a] sm:$0xff] }
  0xf6   : > { %4394 = vmatprep.subr.bf16.mxu0 %v4524_v26 }
  0xf9   : > { %4395 = vmatpush3.bf16.msra.mxu0 %v4524_v26  ;;  %v2741_v26 = vld [vmem:[#allocation2 + $0x61] sm:$0xff] }
  0xfa   : > { %4265 = vmatmul.mubr.bf16.vlgmr.msra.gmra.mxu1 %v5105_v49  ;;  %4396 = vmatprep.subr.bf16.mxu0 %v4526_v50  ;;  %v4530_v49 = vld [vmem:[%s5967_s3 + $0x218] sm:$0xff]  }
  0xfb   : > { %4345 = vmatpush3.bf16.msra.mxu1 %v4521_v39  ;;  %4268 = vmatprep.mubr.bf16.mxu1 %v5125_v5  ;;  %v4527_v5 = vld [vmem:[%s5967_s3 + $0x1e0] sm:$0xff]   ;;  %v3077_v39 = vpack.c.bf16 %v3048_v2, %v3047_v16  ;;  %v3053_v2 = vld [vmem:[#allocation2 + $0xaa] sm:$0xff] }
  0xfc   : > { %4317 = vmatmul.mubr.bf16.gmra.mxu0 %v5164_v56  ;;  %4346 = vmatprep.subr.bf16.mxu1 %v4523_v31  ;;  %v4529_v56 = vld [vmem:[%s5967_s3 + $0x1d8] sm:$0xff]  }
  0xfd   : > { %4320 = vmatprep.mubr.bf16.mxu0 %v5169_v44  ;;  %4397 = vmatpush3.bf16.msra.mxu0 %v4526_v50  ;;  %v2742_v50 = vld [vmem:[#allocation2 + $0x69] sm:$0xff] }
  0xfe   : > { %4398 = vmatprep.subr.bf16.mxu0 %v4528_v42 }
  0xff   : > { %4347 = vmatpush3.bf16.msra.mxu1 %v4523_v31  ;;  %v3049_v31 = vld [vmem:[#allocation2 + $0x7a] sm:$0xff] }
 0x100   : > { %4348 = vmatprep.subr.bf16.mxu1 %v4525_v7 }
 0x101   : > { %4399 = vmatpush3.bf16.msra.mxu0 %v4528_v42  ;;  %v3050_v42 = vld [vmem:[#allocation2 + $0x82] sm:$0xff] }
 0x102   : > { %4269 = vmatmul.mubr.bf16.gmra.mxu1 %v5130_v4  ;;  %4400 = vmatprep.subr.bf16.mxu0 %v4530_v49  ;;  %v5385_v41 = vpop.f32.mrf.mxu0  ;;  %v4534_v4 = vld [vmem:[%s5967_s3 + $0x208] sm:$0xff]  }
 0x103   : > { %4272 = vmatprep.mubr.bf16.mxu1 %v5147_v18  ;;  %4349 = vmatpush3.bf16.msra.mxu1 %v4525_v7 }
 0x104   : > { %4321 = vmatmul.mubr.bf16.gmra.mxu0 %v5188_v61  ;;  %4350 = vmatprep.subr.bf16.mxu1 %v4527_v5  ;;  %v5396_v44 = vpop.f32.mrf.mxu0  ;;  %v4531_v61 = vld [vmem:[%s5967_s3 + $0x1d0] sm:$0xff]  }
 0x105   : > { %4324 = vmatprep.mubr.bf16.mxu0 %v5195_v9  ;;  %4401 = vmatpush3.bf16.msra.mxu0 %v4530_v49  ;;  %v4536_v9 = vld [vmem:[%s5967_s3 + $0x200] sm:$0xff]  }
 0x106   : > { %4402 = vmatprep.subr.bf16.mxu0 %v4532_v43  ;;  %v5394_v18 = vpop.f32.mrf.mxu1  ;;  %v5409_v36 = vpop.f32.mrf.mxu0 }
 0x107   : > { %4351 = vmatpush3.bf16.msra.mxu1 %v4527_v5  ;;  %v3051_v5 = vld [vmem:[#allocation2 + $0x92] sm:$0xff] }
 0x108   : > { %4352 = vmatprep.subr.bf16.mxu1 %v4529_v56  ;;  %v5407_v6 = vpop.f32.mrf.mxu1 }
 0x109   : > { %4403 = vmatpush3.bf16.msra.mxu0 %v4532_v43  ;;  %v3052_v43 = vld [vmem:[#allocation2 + $0x9a] sm:$0xff] }
 0x10a   : > { %4273 = vmatmul.mubr.bf16.gmra.mxu1 %v5152_v48  ;;  %4404 = vmatprep.subr.bf16.mxu0 %v4534_v4  ;;  %v5415_v48 = vpop.f32.mrf.mxu1 }
 0x10b   : > { %4276 = vmatprep.mubr.bf16.mxu1 %v5171_v58  ;;  %4353 = vmatpush3.bf16.msra.mxu1 %v4529_v56  ;;  %v5417_v58 = vpop.f32.mrf.mxu0  ;;  %v2771_v56 = vpack.c.bf16 %v2742_v50, %v2741_v26 }
 0x10c   : > { %4325 = vmatmul.mubr.bf16.gmra.mxu0 %v5218_v55  ;;  %4354 = vmatprep.subr.bf16.mxu1 %v4531_v61  ;;  %v4535_v55 = vld [vmem:[%s5967_s3 + $0x1c0] sm:$0xff]  }
 0x10d   : > { %4328 = vmatprep.mubr.bf16.mxu0 %v5220_v24  ;;  %4405 = vmatpush3.bf16.msra.mxu0 %v4534_v4  ;;  %v5425_v24 = vpop.f32.mrf.mxu1  ;;  %v5427_v34 = vpop.f32.mrf.mxu0 }
 0x10e   : > { %4406 = vmatprep.subr.bf16.mxu0 %v4536_v9 }
 0x10f   : > { %4355 = vmatpush3.bf16.msra.mxu1 %v4531_v61  ;;  %v5432_v1 = vpop.f32.mrf.mxu0 }
 0x110   : > { %4356 = vmatprep.subr.bf16.mxu1 %v4533_v63 }
 0x111   : > { %4407 = vmatpush3.bf16.msra.mxu0 %v4536_v9  ;;  %v3078_v9 = vpack.c.bf16 %v3050_v42, %v3049_v31  ;;  %v3055_v31 = vld [vmem:[#allocation2 + $0xc2] sm:$0xff] }
 0x112   : > { %4277 = vmatmul.mubr.bf16.gmra.mxu1 %v5176_v27  ;;  %v5430_v52 = vpop.f32.mrf.mxu1 }
 0x113   : > { %4280 = vmatprep.mubr.bf16.mxu1 %v5198_v12  ;;  %4357 = vmatpush3.bf16.msra.mxu1 %v4533_v63  ;;  %v5439_v12 = vpop.f32.mrf.mxu0 }
 0x114   : > { %4329 = vmatmul.mubr.bf16.gmra.mxu0 %v5231_v10  ;;  %4358 = vmatprep.subr.bf16.mxu1 %v4535_v55  ;;  %v5437_v27 = vpop.f32.mrf.mxu1 }
 0x115   : > { %4332 = vmatprep.mubr.bf16.mxu0 %v5233_v51  ;;  %v5444_v51 = vpop.f32.mrf.mxu0 }
 0x116   : > { %v5442_v10 = vpop.f32.mrf.mxu1 }
 0x117   : > { %4359 = vmatpush3.bf16.msra.mxu1 %v4535_v55 }
 0x118   : > { %v5448_v57 = vpop.f32.mrf.mxu1 }
 0x11a   : > { %4281 = vmatmul.mubr.bf16.gmra.mxu1 %v5203_v35 }
 0x11b   : > { %4284 = vmatprep.mubr.bf16.mxu1 %v5222_v46 }
 0x11c   : > { %4333 = vmatmul.mubr.bf16.gmra.mxu0 %v5243_v8  ;;  %v3043_v8 = vld [vmem:[#allocation2 + $0x32] sm:$0xff] }
 0x11d   : > { %4336 = vmatprep.mubr.bf16.mxu0 %v5245_v14  ;;  %v3044_v14 = vld [vmem:[#allocation2 + $0x3a] sm:$0xff] }
 0x11e   : > { %v3075_v59 = vpack.c.bf16 %v3044_v14, %v3043_v8  ;;  %v2743_v14 = vld [vmem:[#allocation2 + $0x79] sm:$0xff] }
 0x122   : > { %4285 = vmatmul.mubr.bf16.gmra.mxu1 %v5225_v33 }
 0x123   : > { %4288 = vmatprep.mubr.bf16.mxu1 %v5235_v53 }
 0x124   : > { %v5450_v35 = vpop.f32.mrf.mxu0  ;;  %4337 = vmatmul.mubr.bf16.gmra.mxu0 %v5252_v21  ;;  %v2154_v21 = vld [vmem:[#allocation2 + $0x182] sm:$0xff] }
 0x125   : > { %4340 = vmatprep.mubr.bf16.mxu0 %v5348_v22 }
 0x126   : > { %v5454_v46 = vpop.f32.mrf.mxu0 }
 0x128   : > { %v5456_v19 = vpop.f32.mrf.mxu1  ;;  %v5458_v54 = vpop.f32.mrf.mxu0 }
 0x12a   : > { %4289 = vmatmul.mubr.bf16.gmra.mxu1 %v5237_v3  ;;  %v5461_v33 = vpop.f32.mrf.mxu1  ;;  %v5463_v53 = vpop.f32.mrf.mxu0  ;;  %v5473_v3 = vpack.c.bf16 %v2155_v60, %v2154_v21 }
 0x12b   : > { %4292 = vmatprep.mubr.bf16.mxu1 %v5247_v29 }
 0x12c   : > { %v5466_v0 = vpop.f32.mrf.mxu1  ;;  %v5468_v13 = vpop.f32.mrf.mxu0  ;;  %4341 = vmatmul.mubr.bf16.gmra.mxu0 %v5098_v47 }
 0x12d   : > { %4408 = vmatprep.mubr.bf16.mxu0 %v3075_v59  ;;  %v2744_v59 = vld [vmem:[#allocation2 + $0x81] sm:$0xff] }
 0x12e   : > { %v5471_v38 = vpop.f32.mrf.mxu1  ;;  %v5475_v32 = vpop.f32.mrf.mxu0 }
 0x130   : > { %v5477_v29 = vpop.f32.mrf.mxu0 }
 0x132   : > { %v5479_v40 = vpop.f32.mrf.mxu1  ;;  %4293 = vmatmul.mubr.bf16.gmra.mxu1 %v5473_v3  ;;  %v5482_v47 = vpop.f32.mrf.mxu0 }
 0x133   : > { %4360 = vmatprep.mubr.bf16.mxu1 %v5254_v30  ;;  %v3079_v30 = vpack.c.bf16 %v3052_v43, %v3051_v5  ;;  %v2773_v5 = vpack.c.bf16 %v2746_v23, %v2745_v25 }
 0x134   : > { %v5485_v11 = vpop.f32.mrf.mxu1  ;;  %v4122_v22 = vpop.f32.mrf.mxu0  ;;  %4409 = vmatmul.mubr.bf16.vlgmr.msra.gmra.mxu0 %v3076_v28  ;;  %v3054_v28 = vld [vmem:[#allocation2 + $0xb2] sm:$0xff] }
 0x135   : > { %4412 = vmatprep.mubr.bf16.mxu0 %v3077_v39 }
 0x136   : > { %v5487_v7 = vpop.f32.mrf.mxu1  ;;  %v1353_v49 = vpop.f32.mrf.mxu0 }
 0x138   : > { %v5489_v4 = vpop.f32.mrf.mxu1  ;;  %v4123_v61 = vpop.f32.mrf.mxu0 }
 0x13a   : > { %v4074_v63 = vpop.f32.mrf.mxu1  ;;  %4361 = vmatmul.mubr.bf16.vlgmr.msra.gmra.mxu1 %v5256_v62  ;;  %v1356_v55 = vpop.f32.mrf.mxu0  ;;  %v2772_v62 = vpack.c.bf16 %v2744_v59, %v2743_v14  ;;  %v2747_v59 = vld [vmem:[#allocation2 + $0xa9] sm:$0xff] }
 0x13b   : > { %v1088_v8 = vadd.f32 %v4074_v63, %v5385_v41  ;;  %4364 = vmatprep.mubr.bf16.mxu1 %v2771_v56  ;;  %v3056_v41 = vld [vmem:[#allocation2 + $0xca] sm:$0xff]  ;;  %v3080_v63 = vpack.c.bf16 %v3054_v28, %v3053_v2 }
 0x13c   : > { %v1079_v21 = vpop.f32.mrf.mxu1  ;;  %v4126_v60 = vpop.f32.mrf.mxu0  ;;  %4413 = vmatmul.mubr.bf16.gmra.mxu0 %v3078_v9 }
 0x13d   : > { %v1080_v16 = vadd.f32 %v1079_v21, %v5396_v44  ;;  %4416 = vmatprep.mubr.bf16.mxu0 %v3079_v30  ;;  %v5494_v39 = vadd.f32 %v4122_v22, %v1088_v8  ;;  %v3081_v30 = vpack.c.bf16 %v3056_v41, %v3055_v31 }
 0x13e   : > { %v4075_v26 = vpop.f32.mrf.mxu1  ;;  %v1369_v50 = vpop.f32.mrf.mxu0 }
 0x13f   : > { %5970 = vst [vmem:[#allocation3_spill] sm:$0xff] %v5494_v39  ;;  %v1091_v42 = vadd.f32 %v4075_v26, %v5409_v36  ;;  %v5497_v43 = vadd.f32 %v1353_v49, %v1080_v16  ;;  %v2748_v39 = vld [vmem:[#allocation2 + $0xb1] sm:$0xff]  ;;  %v3058_v16 = vld [vmem:[#allocation2 + $0xe2] sm:$0xff] }
 0x140   : > { %v1082_v56 = vpop.f32.mrf.mxu1  ;;  %v4127_v9 = vpop.f32.mrf.mxu0  ;;  %v2774_v28 = vpack.c.bf16 %v2748_v39, %v2747_v59 }
 0x141   : > { %v1083_v44 = vadd.f32 %v1082_v56, %v5417_v58  ;;  %v5500_v21 = vadd.f32 %v4123_v61, %v1091_v42  ;;  %v3057_v58 = vld [vmem:[#allocation2 + $0xda] sm:$0xff] }
 0x142   : > { %v4078_v22 = vpop.f32.mrf.mxu1  ;;  %4365 = vmatmul.mubr.bf16.gmra.mxu1 %v2772_v62  ;;  %v1372_v8 = vpop.f32.mrf.mxu0  ;;  %v3059_v62 = vld [vmem:[#allocation2 + $0xf2] sm:$0xff] }
 0x143   : > { %v1104_v14 = vadd.f32 %v4078_v22, %v5427_v34  ;;  %4368 = vmatprep.mubr.bf16.mxu1 %v2773_v5  ;;  %v5503_v36 = vadd.f32 %v1356_v55, %v1083_v44  ;;  %v3060_v34 = vld [vmem:[#allocation2 + $0xfa] sm:$0xff]  ;;  %v3082_v5 = vpack.c.bf16 %v3058_v16, %v3057_v58  ;;  %v3064_v58 = vld [vmem:[#allocation2 + $0x12a] sm:$0xff] }
 0x144   : > { %v1095_v49 = vpop.f32.mrf.mxu1  ;;  %v4130_v25 = vpop.f32.mrf.mxu0  ;;  %4417 = vmatmul.mubr.bf16.gmra.mxu0 %v3080_v63 }
 0x145   : > { %v1096_v23 = vadd.f32 %v1095_v49, %v5432_v1  ;;  %4420 = vmatprep.mubr.bf16.mxu0 %v3081_v30  ;;  %v5506_v61 = vadd.f32 %v4126_v60, %v1104_v14  ;;  %v3083_v1 = vpack.c.bf16 %v3060_v34, %v3059_v62  ;;  %v3061_v14 = vld [vmem:[#allocation2 + $0x10a] sm:$0xff] }
 0x146   : > { %v4079_v2 = vpop.f32.mrf.mxu1  ;;  %v1385_v26 = vpop.f32.mrf.mxu0 }
 0x147   : > { %v1107_v31 = vadd.f32 %v4079_v2, %v5439_v12  ;;  %v5509_v41 = vadd.f32 %v1369_v50, %v1096_v23  ;;  %v3063_v23 = vld [vmem:[#allocation2 + $0x122] sm:$0xff] }
 0x148   : > { %v1098_v55 = vpop.f32.mrf.mxu1  ;;  %v4131_v42 = vpop.f32.mrf.mxu0  ;;  %v3085_v62 = vpack.c.bf16 %v3064_v58, %v3063_v23 }
 0x149   : > { %v1099_v56 = vadd.f32 %v1098_v55, %v5444_v51  ;;  %v5512_v63 = vadd.f32 %v4127_v9, %v1107_v31  ;;  %v3062_v51 = vld [vmem:[#allocation2 + $0x112] sm:$0xff] }
 0x14a   : > { %v4082_v44 = vpop.f32.mrf.mxu1  ;;  %4369 = vmatmul.mubr.bf16.gmra.mxu1 %v2774_v28  ;;  %v1388_v60 = vpop.f32.mrf.mxu0  ;;  %v3084_v2 = vpack.c.bf16 %v3062_v51, %v3061_v14 }
 0x14b   : > { %v1120_v39 = vadd.f32 %v4082_v44, %v5450_v35  ;;  %4372 = vmatprep.mubr.bf16.mxu1 %v5302_v45  ;;  %v5516_v30 = vadd.f32 %v1372_v8, %v1099_v56  ;;  %v2758_v56 = vld [vmem:[#allocation2 + $0x129] sm:$0xff] }
 0x14c   : > { %v1111_v12 = vpop.f32.mrf.mxu1  ;;  %v4134_v50 = vpop.f32.mrf.mxu0  ;;  %4421 = vmatmul.mubr.bf16.gmra.mxu0 %v3082_v5  ;;  %v2757_v5 = vld [vmem:[#allocation2 + $0x121] sm:$0xff] }
 0x14d   : > { %v1112_v22 = vadd.f32 %v1111_v12, %v5454_v46  ;;  %4424 = vmatprep.mubr.bf16.mxu0 %v3083_v1  ;;  %v5519_v59 = vadd.f32 %v4130_v25, %v1120_v39  ;;  %v3066_v1 = vld [vmem:[#allocation2 + $0x142] sm:$0xff]  ;;  %v3067_v12 = vld [vmem:[#allocation2 + $0x152] sm:$0xff] }
 0x14e   : > { %v4083_v9 = vpop.f32.mrf.mxu1  ;;  %v1401_v49 = vpop.f32.mrf.mxu0 }
 0x14f   : > { %v1123_v35 = vadd.f32 %v4083_v9, %v5458_v54  ;;  %v5522_v16 = vadd.f32 %v1385_v26, %v1112_v22 }
 0x150   : > { %v1114_v45 = vpop.f32.mrf.mxu1  ;;  %v4135_v8 = vpop.f32.mrf.mxu0 }
 0x151   : > { %v1115_v28 = vadd.f32 %v1114_v45, %v5463_v53  ;;  %v5525_v46 = vadd.f32 %v4131_v42, %v1123_v35  ;;  %v3065_v42 = vld [vmem:[#allocation2 + $0x13a] sm:$0xff] }
 0x152   : > { %v4086_v34 = vpop.f32.mrf.mxu1  ;;  %4373 = vmatmul.mubr.bf16.gmra.mxu1 %v5307_v17  ;;  %v1404_v25 = vpop.f32.mrf.mxu0  ;;  %v3086_v9 = vpack.c.bf16 %v3066_v1, %v3065_v42 }
 0x153   : > { %v1136_v31 = vadd.f32 %v4086_v34, %v5468_v13  ;;  %4376 = vmatprep.mubr.bf16.mxu1 %v5322_v37  ;;  %v5530_v55 = vadd.f32 %v1388_v60, %v1115_v28  ;;  %v3068_v13 = vld [vmem:[#allocation2 + $0x15a] sm:$0xff]  ;;  %v2779_v60 = vpack.c.bf16 %v2758_v56, %v2757_v5  ;;  %v2761_v34 = vld [vmem:[#allocation2 + $0x151] sm:$0xff] }
 0x154   : > { %v1127_v54 = vpop.f32.mrf.mxu1  ;;  %v4138_v26 = vpop.f32.mrf.mxu0  ;;  %4425 = vmatmul.mubr.bf16.gmra.mxu0 %v3084_v2  ;;  %v2759_v2 = vld [vmem:[#allocation2 + $0x139] sm:$0xff] }
 0x155   : > { %v1128_v53 = vadd.f32 %v1127_v54, %v5475_v32  ;;  %4428 = vmatprep.mubr.bf16.mxu0 %v3085_v62  ;;  %v5533_v44 = vadd.f32 %v4134_v50, %v1136_v31  ;;  %v3087_v32 = vpack.c.bf16 %v3068_v13, %v3067_v12  ;;  %v2762_v31 = vld [vmem:[#allocation2 + $0x159] sm:$0xff] }
 0x156   : > { %v4087_v17 = vpop.f32.mrf.mxu1  ;;  %v1417_v39 = vpop.f32.mrf.mxu0  ;;  %v3070_v54 = vld [vmem:[#allocation2 + $0x172] sm:$0xff]  ;;  %v2781_v42 = vpack.c.bf16 %v2762_v31, %v2761_v34 }
 0x157   : > { %v1139_v37 = vadd.f32 %v4087_v17, %v5477_v29  ;;  %v5536_v22 = vadd.f32 %v1401_v49, %v1128_v53  ;;  %v2760_v29 = vld [vmem:[#allocation2 + $0x141] sm:$0xff] }
 0x158   : > { %v1130_v14 = vpop.f32.mrf.mxu1  ;;  %v4139_v51 = vpop.f32.mrf.mxu0  ;;  %v2780_v56 = vpack.c.bf16 %v2760_v29, %v2759_v2 }
 0x159   : > { %v1131_v23 = vadd.f32 %v1130_v14, %v5482_v47  ;;  %v5539_v58 = vadd.f32 %v4135_v8, %v1139_v37  ;;  %v3069_v8 = vld [vmem:[#allocation2 + $0x16a] sm:$0xff] }
 0x15a   : > { %v4090_v35 = vpop.f32.mrf.mxu1  ;;  %4377 = vmatmul.mubr.bf16.gmra.mxu1 %v5327_v20  ;;  %v1420_v50 = vpop.f32.mrf.mxu0  ;;  %v3088_v12 = vpack.c.bf16 %v3070_v54, %v3069_v8  ;;  %v2763_v14 = vld [vmem:[#allocation2 + $0x169] sm:$0xff]  ;;  %v2767_v54 = vld [vmem:[#allocation2 + $0x199] sm:$0xff] }
 0x15b   : > { %v1152_v45 = vadd.f32 %v4090_v35, %v5394_v18  ;;  %4380 = vmatprep.mubr.bf16.mxu1 %v2779_v60  ;;  %v5543_v28 = vadd.f32 %v1404_v25, %v1131_v23 }
 0x15c   : > { %v1143_v49 = vpop.f32.mrf.mxu1  ;;  %v4142_v62 = vpop.f32.mrf.mxu0  ;;  %4429 = vmatmul.mubr.bf16.gmra.mxu0 %v3086_v9  ;;  %v2764_v9 = vld [vmem:[#allocation2 + $0x171] sm:$0xff] }
 0x15d   : > { %v1144_v47 = vadd.f32 %v1143_v49, %v5407_v6  ;;  %4432 = vmatprep.mubr.bf16.mxu0 %v3087_v32  ;;  %v5546_v5 = vadd.f32 %v4138_v26, %v1152_v45  ;;  %v2782_v2 = vpack.c.bf16 %v2764_v9, %v2763_v14 }
 0x15e   : > { %v4091_v20 = vpop.f32.mrf.mxu1  ;;  %v1433_v18 = vpop.f32.mrf.mxu0 }
 0x15f   : > { %v1155_v53 = vadd.f32 %v4091_v20, %v5415_v48  ;;  %v5549_v25 = vadd.f32 %v1417_v39, %v1144_v47  ;;  %v2768_v20 = vld [vmem:[#allocation2 + $0x1a1] sm:$0xff] }
 0x160   : > { %v1146_v1 = vpop.f32.mrf.mxu1  ;;  %v4143_v17 = vpop.f32.mrf.mxu0 }
 0x161   : > { %v1147_v13 = vadd.f32 %v1146_v1, %v5425_v24  ;;  %v5552_v37 = vadd.f32 %v4139_v51, %v1155_v53  ;;  %v3073_v24 = vld [vmem:[#allocation2 + $0x19a] sm:$0xff]  ;;  %v3074_v51 = vld [vmem:[#allocation2 + $0x1a2] sm:$0xff]  ;;  %v2784_v1 = vpack.c.bf16 %v2768_v20, %v2767_v54 }
 0x162   : > { %v4094_v6 = vpop.f32.mrf.mxu1  ;;  %4381 = vmatmul.mubr.bf16.gmra.mxu1 %v2780_v56  ;;  %v1436_v60 = vpop.f32.mrf.mxu0  ;;  %v3090_v31 = vpack.c.bf16 %v3074_v51, %v3073_v24 }
 0x163   : > { %v1168_v26 = vadd.f32 %v4094_v6, %v5430_v52  ;;  %4384 = vmatprep.mubr.bf16.mxu1 %v2781_v42  ;;  %v5555_v23 = vadd.f32 %v1420_v50, %v1147_v13 }
 0x164   : > { %v1159_v48 = vpop.f32.mrf.mxu1  ;;  %v4146_v39 = vpop.f32.mrf.mxu0  ;;  %4433 = vmatmul.mubr.bf16.gmra.mxu0 %v3088_v12 }
 0x165   : > { %v1160_v32 = vadd.f32 %v1159_v48, %v5437_v27  ;;  %4436 = vmatprep.mubr.bf16.mxu0 %v5473_v3  ;;  %v5559_v35 = vadd.f32 %v4142_v62, %v1168_v26 }
 0x166   : > { %v4095_v45 = vpop.f32.mrf.mxu1  ;;  %v1449_v29 = vpop.f32.mrf.mxu0 }
 0x167   : > { %v1171_v52 = vadd.f32 %v4095_v45, %v5442_v10  ;;  %v5562_v49 = vadd.f32 %v1433_v18, %v1160_v32 }
 0x168   : > { %v1162_v50 = vpop.f32.mrf.mxu1  ;;  %v4147_v34 = vpop.f32.mrf.mxu0 }
 0x169   : > { %v1163_v47 = vadd.f32 %v1162_v50, %v5448_v57  ;;  %v5565_v8 = vadd.f32 %v4143_v17, %v1171_v52 }
 0x16a   : > { %v4098_v27 = vpop.f32.mrf.mxu1  ;;  %4385 = vmatmul.mubr.bf16.gmra.mxu1 %v2782_v2  ;;  %v1452_v3 = vpop.f32.mrf.mxu0 }
 0x16b   : > { %v1184_v62 = vadd.f32 %v4098_v27, %v5456_v19  ;;  %4388 = vmatprep.mubr.bf16.mxu1 %v5209_v15  ;;  %v5569_v56 = vadd.f32 %v1436_v60, %v1163_v47 }
 0x16c   : > { %v1175_v10 = vpop.f32.mrf.mxu1  ;;  %v4150_v18 = vpop.f32.mrf.mxu0  ;;  %4437 = vmatmul.mubr.bf16.gmra.mxu0 %v3090_v31  ;;  %v5971_v31 = vld [vmem:[#allocation3_spill] sm:$0xff] }
 0x16d   : > { %v1176_v53 = vadd.f32 %v1175_v10, %v5461_v33  ;;  %v5572_v42 = vadd.f32 %v4146_v39, %v1184_v62 }
 0x16e   : > { %v4099_v57 = vpop.f32.mrf.mxu1  ;;  %v1465_v17 = vpop.f32.mrf.mxu0 }
 0x16f   : > { %v1187_v12 = vadd.f32 %v4099_v57, %v5466_v0  ;;  %v5575_v13 = vadd.f32 %v1449_v29, %v1176_v53 }
 0x170   : > { %v1178_v19 = vpop.f32.mrf.mxu1  ;;  %v4151_v15 = vpop.f32.mrf.mxu0 }
 0x171   : > { %v1179_v6 = vadd.f32 %v1178_v19, %v5471_v38  ;;  %v5578_v60 = vadd.f32 %v4147_v34, %v1187_v12 }
 0x172   : > { %v4102_v26 = vpop.f32.mrf.mxu1  ;;  %4389 = vmatmul.mubr.bf16.gmra.mxu1 %v2784_v1  ;;  %v1468_v14 = vpop.f32.mrf.mxu0 }
 0x173   : > { %v1200_v33 = vadd.f32 %v4102_v26, %v5479_v40  ;;  %v5581_v9 = vadd.f32 %v1452_v3, %v1179_v6 }
 0x174   : > { %v1191_v48 = vpop.f32.mrf.mxu1  ;;  %v4218_v39 = vpop.f32.mrf.mxu0 }
 0x175   : > { %v1192_v32 = vadd.f32 %v1191_v48, %v5485_v11  ;;  %v5584_v0 = vadd.f32 %v4150_v18, %v1200_v33 }
 0x176   : > { %v4103_v24 = vpop.f32.mrf.mxu1  ;;  %v1965_v51 = vpop.f32.mrf.mxu0 }
 0x177   : > { %v1203_v45 = vadd.f32 %v4103_v24, %v5487_v7  ;;  %v5587_v38 = vadd.f32 %v1465_v17, %v1192_v32 }
 0x178   : > { %v1194_v2 = vpop.f32.mrf.mxu1  ;;  %v4219_v29 = vpop.f32.mrf.mxu0 }
 0x179   : > { %v1195_v52 = vadd.f32 %v1194_v2, %v5489_v4  ;;  %v5590_v50 = vadd.f32 %v4151_v15, %v1203_v45 }
 0x17a   : > { %v4170_v40 = vpop.f32.mrf.mxu1  ;;  %v1968_v34 = vpop.f32.mrf.mxu0 }
 0x17b   : > { %v1788_v47 = vadd.f32 %v4170_v40, %v5971_v31  ;;  %v5593_v27 = vadd.f32 %v1468_v14, %v1195_v52 }
 0x17c   : > { %v1659_v11 = vpop.f32.mrf.mxu1  ;;  %v4222_v3 = vpop.f32.mrf.mxu0 }
 0x17d   : > { %v1786_v62 = vadd.f32 %v1659_v11, %v5497_v43  ;;  %v5596_v54 = vadd.f32 %v4218_v39, %v1788_v47 }
 0x17e   : > { %v4171_v7 = vpop.f32.mrf.mxu1  ;;  %v1981_v20 = vpop.f32.mrf.mxu0 }
 0x17f   : > { %v1789_v10 = vadd.f32 %v4171_v7, %v5500_v21  ;;  %v5599_v18 = vadd.f32 %v1965_v51, %v1786_v62 }
 0x180   : > { %v1662_v4 = vpop.f32.mrf.mxu1  ;;  %v4223_v53 = vpop.f32.mrf.mxu0 }
 0x181   : > { %v1787_v57 = vadd.f32 %v1662_v4, %v5503_v36  ;;  %v5602_v1 = vadd.f32 %v4219_v29, %v1789_v10 }
 0x182   : > { %v4174_v17 = vpop.f32.mrf.mxu1  ;;  %v1984_v12 = vpop.f32.mrf.mxu0 }
 0x183   : > { %v1792_v19 = vadd.f32 %v4174_v17, %v5506_v61  ;;  %v5605_v15 = vadd.f32 %v1968_v34, %v1787_v57 }
 0x184   : > { %v1675_v43 = vpop.f32.mrf.mxu1  ;;  %v4226_v6 = vpop.f32.mrf.mxu0 }
 0x185   : > { %v1790_v26 = vadd.f32 %v1675_v43, %v5509_v41  ;;  %v5608_v14 = vadd.f32 %v4222_v3, %v1792_v19 }
 0x186   : > { %v4175_v21 = vpop.f32.mrf.mxu1  ;;  %v1997_v33 = vpop.f32.mrf.mxu0 }
 0x187   : > { %v1793_v48 = vadd.f32 %v4175_v21, %v5512_v63  ;;  %v5611_v39 = vadd.f32 %v1981_v20, %v1790_v26 }
 0x188   : > { %v1678_v36 = vpop.f32.mrf.mxu1  ;;  %v4227_v32 = vpop.f32.mrf.mxu0 }
 0x189   : > { %v1791_v24 = vadd.f32 %v1678_v36, %v5516_v30  ;;  %v5614_v51 = vadd.f32 %v4223_v53, %v1793_v48 }
 0x18a   : > { %v4178_v61 = vpop.f32.mrf.mxu1  ;;  %v2000_v45 = vpop.f32.mrf.mxu0 }
 0x18b   : > { %v1796_v2 = vadd.f32 %v4178_v61, %v5519_v59  ;;  %v5617_v29 = vadd.f32 %v1984_v12, %v1791_v24 }
 0x18c   : > { %v1691_v41 = vpop.f32.mrf.mxu1  ;;  %v4230_v52 = vpop.f32.mrf.mxu0 }
 0x18d   : > { %v1794_v40 = vadd.f32 %v1691_v41, %v5522_v16  ;;  %v5620_v34 = vadd.f32 %v4226_v6, %v1796_v2 }
 0x18e   : > { %v4179_v63 = vpop.f32.mrf.mxu1  ;;  %v2013_v31 = vpop.f32.mrf.mxu0 }
 0x18f   : > { %v1797_v47 = vadd.f32 %v4179_v63, %v5525_v46  ;;  %v5623_v11 = vadd.f32 %v1997_v33, %v1794_v40 }
 0x190   : > { %v1694_v30 = vpop.f32.mrf.mxu1  ;;  %v4231_v3 = vpop.f32.mrf.mxu0 }
 0x191   : > { %v1795_v62 = vadd.f32 %v1694_v30, %v5530_v55  ;;  %v5626_v7 = vadd.f32 %v4227_v32, %v1797_v47 }
 0x192   : > { %v4182_v59 = vpop.f32.mrf.mxu1  ;;  %v2016_v20 = vpop.f32.mrf.mxu0 }
 0x193   : > { %v1800_v10 = vadd.f32 %v4182_v59, %v5533_v44  ;;  %v5629_v4 = vadd.f32 %v2000_v45, %v1795_v62 }
 0x194   : > { %v1707_v16 = vpop.f32.mrf.mxu1  ;;  %v4234_v53 = vpop.f32.mrf.mxu0 }
 0x195   : > { %v1798_v57 = vadd.f32 %v1707_v16, %v5536_v22  ;;  %v5632_v17 = vadd.f32 %v4230_v52, %v1800_v10 }
 0x196   : > { %v4183_v46 = vpop.f32.mrf.mxu1  ;;  %v2029_v12 = vpop.f32.mrf.mxu0 }
 0x197   : > { %v1801_v19 = vadd.f32 %v4183_v46, %v5539_v58  ;;  %v5635_v43 = vadd.f32 %v2013_v31, %v1798_v57 }
 0x198   : > { %v1710_v55 = vpop.f32.mrf.mxu1  ;;  %v4235_v6 = vpop.f32.mrf.mxu0 }
 0x199   : > { %v1799_v26 = vadd.f32 %v1710_v55, %v5543_v28  ;;  %v5638_v21 = vadd.f32 %v4231_v3, %v1801_v19 }
 0x19a   : > { %v4186_v44 = vpop.f32.mrf.mxu1  ;;  %v2032_v33 = vpop.f32.mrf.mxu0 }
 0x19b   : > { %v1804_v48 = vadd.f32 %v4186_v44, %v5546_v5  ;;  %v5641_v36 = vadd.f32 %v2016_v20, %v1799_v26 }
 0x19c   : > { %v1723_v22 = vpop.f32.mrf.mxu1  ;;  %v4238_v32 = vpop.f32.mrf.mxu0 }
 0x19d   : > { %v1802_v24 = vadd.f32 %v1723_v22, %v5549_v25  ;;  %v5644_v61 = vadd.f32 %v4234_v53, %v1804_v48 }
 0x19e   : > { %v4187_v58 = vpop.f32.mrf.mxu1  ;;  %v2045_v45 = vpop.f32.mrf.mxu0 }
 0x19f   : > { %v1805_v2 = vadd.f32 %v4187_v58, %v5552_v37  ;;  %v5647_v41 = vadd.f32 %v2029_v12, %v1802_v24 }
 0x1a0   : > { %v1726_v28 = vpop.f32.mrf.mxu1  ;;  %v4239_v52 = vpop.f32.mrf.mxu0 }
 0x1a1   : > { %v1803_v40 = vadd.f32 %v1726_v28, %v5555_v23  ;;  %v5650_v63 = vadd.f32 %v4235_v6, %v1805_v2 }
 0x1a2   : > { %v4190_v5 = vpop.f32.mrf.mxu1  ;;  %v2048_v31 = vpop.f32.mrf.mxu0 }
 0x1a3   : > { %v1808_v47 = vadd.f32 %v4190_v5, %v5559_v35  ;;  %v5653_v30 = vadd.f32 %v2032_v33, %v1803_v40 }
 0x1a4   : > { %v1739_v25 = vpop.f32.mrf.mxu1  ;;  %v4242_v3 = vpop.f32.mrf.mxu0 }
 0x1a5   : > { %5972 = vst [vmem:[#allocation3_spill] sm:$0xff] %v5653_v30  ;;  %v1806_v62 = vadd.f32 %v1739_v25, %v5562_v49  ;;  %v5656_v59 = vadd.f32 %v4238_v32, %v1808_v47 }
 0x1a6   : > { %v4191_v37 = vpop.f32.mrf.mxu1  ;;  %v2061_v20 = vpop.f32.mrf.mxu0 }
 0x1a7   : > { %5973 = vst [vmem:[#allocation4_spill] sm:$0xff] %v5656_v59  ;;  %v1809_v10 = vadd.f32 %v4191_v37, %v5565_v8  ;;  %v5659_v16 = vadd.f32 %v2045_v45, %v1806_v62 }
 0x1a8   : > { %v1742_v23 = vpop.f32.mrf.mxu1  ;;  %v4243_v53 = vpop.f32.mrf.mxu0 }
 0x1a9   : > { %5974 = vst [vmem:[#allocation5_spill] sm:$0xff] %v5659_v16  ;;  %v1807_v57 = vadd.f32 %v1742_v23, %v5569_v56  ;;  %v5662_v46 = vadd.f32 %v4239_v52, %v1809_v10 }
 0x1aa   : > { %v4194_v35 = vpop.f32.mrf.mxu1  ;;  %v2064_v12 = vpop.f32.mrf.mxu0 }
 0x1ab   : > { %5975 = vst [vmem:[#allocation6_spill] sm:$0xff] %v5662_v46  ;;  %v1812_v19 = vadd.f32 %v4194_v35, %v5572_v42  ;;  %v5665_v55 = vadd.f32 %v2048_v31, %v1807_v57  ;;  %v4668_v35 = vld [vmem:[#allocation2] sm:$0xff] }
 0x1ac   : > { %v1755_v49 = vpop.f32.mrf.mxu1  ;;  %v4246_v6 = vpop.f32.mrf.mxu0  ;;  %3381 = vst [vmem:[%s5712_s27] sm:$0xff] %v4668_v35 }
 0x1ad   : > { %5976 = vst [vmem:[#allocation7_spill] sm:$0xff] %v5665_v55  ;;  %v1810_v26 = vadd.f32 %v1755_v49, %v5575_v13  ;;  %v5668_v44 = vadd.f32 %v4242_v3, %v1812_v19 }
 0x1ae   : > { %v4195_v8 = vpop.f32.mrf.mxu1  ;;  %v2077_v33 = vpop.f32.mrf.mxu0 }
 0x1af   : > { %5977 = vst [vmem:[#allocation8_spill] sm:$0xff] %v5668_v44  ;;  %v1813_v48 = vadd.f32 %v4195_v8, %v5578_v60  ;;  %v5671_v22 = vadd.f32 %v2061_v20, %v1810_v26 }
 0x1b0   : > { %v1758_v56 = vpop.f32.mrf.mxu1  ;;  %v4247_v32 = vpop.f32.mrf.mxu0 }
 0x1b1   : > { %5978 = vst [vmem:[#allocation9_spill] sm:$0xff] %v5671_v22  ;;  %v1811_v24 = vadd.f32 %v1758_v56, %v5581_v9  ;;  %v5674_v58 = vadd.f32 %v4243_v53, %v1813_v48 }
 0x1b2   : > { %v4198_v42 = vpop.f32.mrf.mxu1  ;;  %v2080_v45 = vpop.f32.mrf.mxu0 }
 0x1b3   : > { %5979 = vst [vmem:[#allocation10_spill] sm:$0xff] %v5674_v58  ;;  %v1816_v2 = vadd.f32 %v4198_v42, %v5584_v0  ;;  %v5677_v28 = vadd.f32 %v2064_v12, %v1811_v24 }
 0x1b4   : > { %v1771_v13 = vpop.f32.mrf.mxu1  ;;  %v5679_v52 = vpop.f32.mrf.mxu0 }
 0x1b5   : > { %5980 = vst [vmem:[#allocation11_spill] sm:$0xff] %v5677_v28  ;;  %v1814_v40 = vadd.f32 %v1771_v13, %v5587_v38  ;;  %v5682_v60 = vadd.f32 %v4246_v6, %v1816_v2 }
 0x1b6   : > { %v4199_v5 = vpop.f32.mrf.mxu1  ;;  %v5684_v31 = vpop.f32.mrf.mxu0 }
 0x1b7   : > { %5981 = vst [vmem:[#allocation12_spill] sm:$0xff] %v5682_v60  ;;  %v1817_v9 = vadd.f32 %v4199_v5, %v5590_v50  ;;  %v5687_v47 = vadd.f32 %v2077_v33, %v1814_v40 }
 0x1b8   : > { %v1774_v25 = vpop.f32.mrf.mxu1  ;;  %v5689_v3 = vpop.f32.mrf.mxu0 }
 0x1b9   : > { %5982 = vst [vmem:[#allocation13_spill] sm:$0xff] %v5687_v47  ;;  %v1815_v0 = vadd.f32 %v1774_v25, %v5593_v27  ;;  %v5692_v62 = vadd.f32 %v4247_v32, %v1817_v9 }
 0x1ba   : > { %v5694_v37 = vpop.f32.mrf.mxu1  ;;  %v5696_v38 = vpop.f32.mrf.mxu0 }
 0x1bb   : > { %5983 = vst [vmem:[#allocation14_spill] sm:$0xff] %v5692_v62  ;;  %v5698_v20 = vadd.f32 %v2080_v45, %v1815_v0 }
 0x1bc   : > { %v5700_v10 = vpop.f32.mrf.mxu1  ;;  %v5702_v23 = vpop.f32.mrf.mxu0 }
 0x1bd   : > { %5984 = vst [vmem:[#allocation15_spill] sm:$0xff] %v5698_v20 }
 0x1be   : > { %v5704_v50 = vpop.f32.mrf.mxu1  ;;  %v5706_v53 = vpop.f32.mrf.mxu0 }
 0x1c0   : > { %v5714_v27 = vpop.f32.mrf.mxu1  ;;  %v5716_v57 = vpop.f32.mrf.mxu0 }
 0x1c2   : > { %v5719_v12 = vpop.f32.mrf.mxu1  ;;  %v5721_v19 = vpop.f32.mrf.mxu0 }
 0x1c4   : > { %v5723_v49 = vpop.f32.mrf.mxu1  ;;  %v5725_v6 = vpop.f32.mrf.mxu0 }
 0x1c6   : > { %v5727_v26 = vpop.f32.mrf.mxu1  ;;  %v5729_v8 = vpop.f32.mrf.mxu0 }
 0x1c8   : > { %v5731_v33 = vpop.f32.mrf.mxu1  ;;  %v5733_v48 = vpop.f32.mrf.mxu0 }
 0x1ca   : > { %v5735_v56 = vpop.f32.mrf.mxu1  ;;  %v5737_v32 = vpop.f32.mrf.mxu0 }
 0x1cc   : > { %v5739_v24 = vpop.f32.mrf.mxu1  ;;  %v5741_v42 = vpop.f32.mrf.mxu0 }
 0x1ce   : > { %v5743_v45 = vpop.f32.mrf.mxu1  ;;  %v5745_v2 = vpop.f32.mrf.mxu0 }
 0x1d0   : > { %v5747_v13 = vpop.f32.mrf.mxu1  ;;  %v5749_v40 = vpop.f32.mrf.mxu0 }
 0x1d2   : > { %v5751_v5 = vpop.f32.mrf.mxu1  ;;  %v5753_v9 = vpop.f32.mrf.mxu0 }
 0x1d3   : > { %5985 = vst [vmem:[#allocation16_spill] sm:$0xff] %v5753_v9 }
 0x1d4   : > { %v5755_v25 = vpop.f32.mrf.mxu1  ;;  %v5757_v0 = vpop.f32.mrf.mxu0 }
 0x1d5   : > { %5986 = vst [vmem:[#allocation17_spill] sm:$0xff] %v5757_v0 }
 0x1d6   : > { %v5759_v35 = vpop.f32.mrf.mxu1  ;;  %v5761_v20 = vpop.f32.mrf.mxu0 }
 0x1d7   : > { %5987 = vst [vmem:[#allocation18_spill] sm:$0xff] %v5761_v20 }
 0x1d8   : > { %v5763_v62 = vpop.f32.mrf.mxu1  ;;  %v5765_v47 = vpop.f32.mrf.mxu0 }
 0x1d9   : > { %5988 = vst [vmem:[#allocation19_spill] sm:$0xff] %v5765_v47 }
 0x1da   : > { %v5767_v60 = vpop.f32.mrf.mxu1  ;;  %v5769_v28 = vpop.f32.mrf.mxu0 }
 0x1db   : > { %5989 = vst [vmem:[#allocation20_spill] sm:$0xff] %v5769_v28 }
 0x1dc   : > { %v5771_v58 = vpop.f32.mrf.mxu1  ;;  %v5773_v22 = vpop.f32.mrf.mxu0 }
 0x1dd   : > { %5990 = vst [vmem:[#allocation21_spill] sm:$0xff] %v5773_v22 }
 0x1de   : > { %v5775_v44 = vpop.f32.mrf.mxu1  ;;  %v5777_v55 = vpop.f32.mrf.mxu0 }
 0x1df   : > { %5991 = vst [vmem:[#allocation22_spill] sm:$0xff] %v5775_v44  ;;  %5992 = vst [vmem:[#allocation23_spill] sm:$0xff] %v5777_v55 }
 0x1e0   : > { %v5779_v46 = vpop.f32.mrf.mxu1  ;;  %v5781_v16 = vpop.f32.mrf.mxu0 }
 0x1e1   : > { %5993 = vst [vmem:[#allocation24_spill] sm:$0xff] %v5779_v46  ;;  %5994 = vst [vmem:[#allocation25_spill] sm:$0xff] %v5781_v16 }
 0x1e2   : > { %v5783_v59 = vpop.f32.mrf.mxu1  ;;  %v5785_v47 = vpop.f32.mrf.mxu0 }
 0x1e3   : > { %5995 = vst [vmem:[#allocation26_spill] sm:$0xff] %v5783_v59  ;;  %5996 = vst [vmem:[#allocation27_spill] sm:$0xff] %v5785_v47 }
 0x1e4   : > { %v5787_v20 = vpop.f32.mrf.mxu1  ;;  %v5789_v28 = vpop.f32.mrf.mxu0 }
 0x1e5   : > { %5997 = vst [vmem:[#allocation28_spill] sm:$0xff] %v5787_v20  ;;  %5998 = vst [vmem:[#allocation29_spill] sm:$0xff] %v5789_v28 }
 0x1e6   : > { %v5791_v30 = vpop.f32.mrf.mxu1  ;;  %v5793_v22 = vpop.f32.mrf.mxu0 }
 0x1e7   : > { %5999 = vst [vmem:[#allocation30_spill] sm:$0xff] %v5791_v30  ;;  %6000 = vst [vmem:[#allocation31_spill] sm:$0xff] %v5793_v22 }
 0x1e8   : > { %v5795_v0 = vpop.f32.mrf.mxu1  ;;  %v5797_v55 = vpop.f32.mrf.mxu0 }
 0x1e9   : > { %6001 = vst [vmem:[#allocation32_spill] sm:$0xff] %v5795_v0  ;;  %6002 = vst [vmem:[#allocation33_spill] sm:$0xff] %v5797_v55 }
 0x1ea   : > { %v5799_v46 = vpop.f32.mrf.mxu1  ;;  %v5801_v9 = vpop.f32.mrf.mxu0 }
 0x1eb   : > { %6003 = vst [vmem:[#allocation34_spill] sm:$0xff] %v5799_v46  ;;  %6004 = vst [vmem:[#allocation35_spill] sm:$0xff] %v5801_v9 }
 0x1ec   : > { %v5803_v16 = vpop.f32.mrf.mxu1  ;;  %v5805_v59 = vpop.f32.mrf.mxu0 }
 0x1ed   : > { %6005 = vst [vmem:[#allocation36_spill] sm:$0xff] %v5803_v16  ;;  %6006 = vst [vmem:[#allocation37_spill] sm:$0xff] %v5805_v59  ;;  %v2400_v59 = vadd.f32 %v5694_v37, %v5596_v54  ;;  %v2399_v54 = vadd.f32 %v5714_v27, %v5605_v15 }
 0x1ee   : > { %v5807_v47 = vpop.f32.mrf.mxu1  ;;  %v5809_v20 = vpop.f32.mrf.mxu0 }
 0x1ef   : > { %6007 = vst [vmem:[#allocation38_spill] sm:$0xff] %v5807_v47  ;;  %6008 = vst [vmem:[#allocation39_spill] sm:$0xff] %v5809_v20  ;;  %v2706_v27 = vadd.f32 %v5696_v38, %v2399_v54  ;;  %v2408_v54 = vadd.f32 %v5735_v56, %v5620_v34  ;;  %v2406_v56 = vadd.f32 %v5739_v24, %v5623_v11 }
 0x1f0   : > { %v5812_v28 = vpop.f32.mrf.mxu1  ;;  %v5814_v22 = vpop.f32.mrf.mxu0 }
 0x1f1   : > { %6009 = vst [vmem:[#allocation40_spill] sm:$0xff] %v5812_v28  ;;  %6010 = vst [vmem:[#allocation41_spill] sm:$0xff] %v5814_v22  ;;  %v2398_v28 = vadd.f32 %v5700_v10, %v5599_v18 }
 0x1f2   : > { %v5816_v0 = vpop.f32.mrf.mxu1  ;;  %v5818_v55 = vpop.f32.mrf.mxu0 }
 0x1f3   : > { %6011 = vst [vmem:[#allocation42_spill] sm:$0xff] %v5816_v0  ;;  %6012 = vst [vmem:[#allocation43_spill] sm:$0xff] %v5818_v55  ;;  %v2401_v0 = vadd.f32 %v5704_v50, %v5602_v1  ;;  %v2707_v55 = vadd.f32 %v5679_v52, %v2400_v59  ;;  %v2404_v59 = vadd.f32 %v5719_v12, %v5608_v14 }
 0x1f4   : > { %v5820_v46 = vpop.f32.mrf.mxu1  ;;  %v4410_v9 = vpop.f32.mrf.mxu0 }
 0x1f5   : > { %6013 = vst [vmem:[#allocation44_spill] sm:$0xff] %v5820_v46  ;;  %v2708_v50 = vadd.f32 %v5689_v3, %v2401_v0  ;;  %v2405_v3 = vadd.f32 %v5727_v26, %v5614_v51 }
 0x1f6   : > { %v5824_v47 = vpop.f32.mrf.mxu1  ;;  %v3190_v20 = vpop.f32.mrf.mxu0 }
 0x1f7   : > { %6014 = vst [vmem:[#allocation45_spill] sm:$0xff] %v5824_v47  ;;  %v2705_v47 = vadd.f32 %v5684_v31, %v2398_v28 }
 0x1f8   : > { %v5828_v16 = vpop.f32.mrf.mxu1  ;;  %v4411_v22 = vpop.f32.mrf.mxu0 }
 0x1f9   : > { %6015 = vst [vmem:[#allocation46_spill] sm:$0xff] %v5828_v16 }
 0x1fa   : > { %v4362_v46 = vpop.f32.mrf.mxu1  ;;  %v3193_v30 = vpop.f32.mrf.mxu0 }
 0x1fb   : > { %v3013_v37 = vadd.f32 %v4362_v46, %v2707_v55  ;;  %v2402_v55 = vadd.f32 %v5723_v49, %v5611_v39 }
 0x1fc   : > { %v2884_v18 = vpop.f32.mrf.mxu1  ;;  %v4414_v1 = vpop.f32.mrf.mxu0 }
 0x1fd   : > { %v3319_v52 = vadd.f32 %v4410_v9, %v3013_v37  ;;  %v3011_v10 = vadd.f32 %v2884_v18, %v2705_v47  ;;  %v2711_v47 = vadd.f32 %v5702_v23, %v2404_v59  ;;  %v2403_v9 = vadd.f32 %v5731_v33, %v5617_v29 }
 0x1fe   : > { %v4363_v15 = vpop.f32.mrf.mxu1  ;;  %v3206_v46 = vpop.f32.mrf.mxu0  ;;  %v2709_v38 = vadd.f32 %v5706_v53, %v2402_v55  ;;  %v2712_v29 = vadd.f32 %v5716_v57, %v2405_v3  ;;  %v2715_v57 = vadd.f32 %v5725_v6, %v2408_v54  ;;  %v2713_v6 = vadd.f32 %v5729_v8, %v2406_v56 }
 0x1ff   : > { %3351 = vst [vmem:[%s5839_s6 + $0x10] sm:$0xff] %v3319_v52  ;;  %v3317_v28 = vadd.f32 %v3190_v20, %v3011_v10  ;;  %v3014_v31 = vadd.f32 %v4363_v15, %v2708_v50  ;;  %v3422_v53 = vmul.f32 %v3319_v52, %v3319_v52  ;;  %v2409_v15 = vadd.f32 %v5743_v45, %v5626_v7 }
 0x200   : > { %v2887_v16 = vpop.f32.mrf.mxu1  ;;  %v4415_v44 = vpop.f32.mrf.mxu0 }
 0x201   : > { %3349 = vst [vmem:[%s5839_s6] sm:$0xff] %v3317_v28  ;;  %v3320_v14 = vadd.f32 %v4411_v22, %v3014_v31  ;;  %v3012_v12 = vadd.f32 %v2887_v16, %v2706_v27  ;;  %v3420_v16 = vmul.f32 %v3317_v28, %v3317_v28 }
 0x202   : > { %v4366_v39 = vpop.f32.mrf.mxu1  ;;  %v3209_v49 = vpop.f32.mrf.mxu0 }
 0x203   : > { %3352 = vst [vmem:[%s5839_s6 + $0x18] sm:$0xff] %v3320_v14  ;;  %v3318_v20 = vadd.f32 %v3193_v30, %v3012_v12  ;;  %v3017_v0 = vadd.f32 %v4366_v39, %v2711_v47  ;;  %v2710_v30 = vadd.f32 %v5721_v19, %v2403_v9  ;;  %v3423_v31 = vmul.f32 %v3320_v14, %v3320_v14 }
 0x204   : > { %v2900_v22 = vpop.f32.mrf.mxu1  ;;  %v4418_v23 = vpop.f32.mrf.mxu0 }
 0x205   : > { %3350 = vst [vmem:[%s5839_s6 + $0x8] sm:$0xff] %v3318_v20  ;;  %v3382_v37 = vadd.f32 %v3318_v20, %v3317_v28  ;;  %v3421_v51 = vmul.f32 %v3318_v20, %v3318_v20  ;;  %v3323_v26 = vadd.f32 %v4414_v1, %v3017_v0  ;;  %v3015_v18 = vadd.f32 %v2900_v22, %v2709_v38 }
 0x206   : > { %v4367_v33 = vpop.f32.mrf.mxu1  ;;  %v3222_v59 = vpop.f32.mrf.mxu0  ;;  %v2716_v20 = vadd.f32 %v5733_v48, %v2409_v15  ;;  %v2416_v15 = vadd.f32 %v5767_v60, %v5644_v61 }
 0x207   : > { %v3383_v10 = vadd.f32 %v3382_v37, %v3319_v52  ;;  %v3452_v50 = vadd.f32 %v3421_v51, %v3420_v16  ;;  %3355 = vst [vmem:[%s5839_s6 + $0x30] sm:$0xff] %v3323_v26  ;;  %v3321_v34 = vadd.f32 %v3206_v46, %v3015_v18  ;;  %v3018_v1 = vadd.f32 %v4367_v33, %v2712_v29 }
 0x208   : > { %v2903_v55 = vpop.f32.mrf.mxu1  ;;  %v4419_v28 = vpop.f32.mrf.mxu0  ;;  %v2407_v46 = vadd.f32 %v5747_v13, %v5629_v4  ;;  %v3426_v48 = vmul.f32 %v3323_v26, %v3323_v26 }
 0x209   : > { %v3453_v19 = vadd.f32 %v3452_v50, %v3422_v53  ;;  %3353 = vst [vmem:[%s5839_s6 + $0x20] sm:$0xff] %v3321_v34  ;;  %v3384_v27 = vadd.f32 %v3383_v10, %v3320_v14  ;;  %v3016_v52 = vadd.f32 %v2903_v55, %v2710_v30  ;;  %v3424_v12 = vmul.f32 %v3321_v34, %v3321_v34 }
 0x20a   : > { %v3324_v11 = vadd.f32 %v4415_v44, %v3018_v1  ;;  %v4370_v24 = vpop.f32.mrf.mxu1  ;;  %v3225_v47 = vpop.f32.mrf.mxu0  ;;  %v2412_v44 = vadd.f32 %v5751_v5, %v5632_v17  ;;  %v2714_v8 = vadd.f32 %v5737_v32, %v2407_v46 }
 0x20b   : > { %v3385_v7 = vadd.f32 %v3384_v27, %v3321_v34  ;;  %v3454_v45 = vadd.f32 %v3453_v19, %v3423_v31  ;;  %v3322_v3 = vadd.f32 %v3209_v49, %v3016_v52  ;;  %v3021_v9 = vadd.f32 %v4370_v24, %v2715_v57 }
 0x20c   : > { %3356 = vst [vmem:[%s5839_s6 + $0x38] sm:$0xff] %v3324_v11  ;;  %v2916_v39 = vpop.f32.mrf.mxu1  ;;  %v4422_v14 = vpop.f32.mrf.mxu0  ;;  %v2410_v49 = vadd.f32 %v5755_v25, %v5635_v43  ;;  %v3427_v29 = vmul.f32 %v3324_v11, %v3324_v11  ;;  %v2719_v32 = vadd.f32 %v5741_v42, %v2412_v44  ;;  %v2414_v27 = vadd.f32 %v5771_v58, %v5647_v41  ;;  %v6021_v44 = vld [vmem:[#allocation18_spill] sm:$0xff] }
 0x20d   : > { %v3455_v0 = vadd.f32 %v3454_v45, %v3424_v12  ;;  %3354 = vst [vmem:[%s5839_s6 + $0x28] sm:$0xff] %v3322_v3  ;;  %v3386_v38 = vadd.f32 %v3385_v7, %v3322_v3  ;;  %v3425_v4 = vmul.f32 %v3322_v3, %v3322_v3  ;;  %v3327_v13 = vadd.f32 %v4418_v23, %v3021_v9  ;;  %v6018_v3 = vld [vmem:[#allocation17_spill] sm:$0xff] }
 0x20e   : > { %v3019_v54 = vadd.f32 %v2916_v39, %v2713_v6  ;;  %v4371_v16 = vpop.f32.mrf.mxu1  ;;  %v3238_v22 = vpop.f32.mrf.mxu0  ;;  %v2413_v23 = vadd.f32 %v5759_v35, %v5638_v21  ;;  %v2717_v10 = vadd.f32 %v5745_v2, %v2410_v49  ;;  %v2723_v9 = vadd.f32 %v6018_v3, %v2416_v15  ;;  %v6028_v15 = vld [vmem:[#allocation6_spill] sm:$0xff] }
 0x20f   : > { %v3387_v37 = vadd.f32 %v3386_v38, %v3323_v26  ;;  %v3456_v51 = vadd.f32 %v3455_v0, %v3425_v4  ;;  %3359 = vst [vmem:[%s5839_s6 + $0x50] sm:$0xff] %v3327_v13  ;;  %v3022_v18 = vadd.f32 %v4371_v16, %v2716_v20  ;;  %v3430_v52 = vmul.f32 %v3327_v13, %v3327_v13  ;;  %v6020_v0 = vld [vmem:[#allocation24_spill] sm:$0xff] }
 0x210   : > { %v3325_v17 = vadd.f32 %v3222_v59, %v3019_v54  ;;  %v2919_v5 = vpop.f32.mrf.mxu1  ;;  %v4423_v33 = vpop.f32.mrf.mxu0  ;;  %v2411_v59 = vadd.f32 %v5763_v62, %v5641_v36  ;;  %v2720_v42 = vadd.f32 %v5749_v40, %v2413_v23  ;;  %v6016_v40 = vld [vmem:[#allocation22_spill] sm:$0xff] }
 0x211   : > { %v3457_v43 = vadd.f32 %v3456_v51, %v3426_v48  ;;  %v3388_v25 = vadd.f32 %v3387_v37, %v3324_v11  ;;  %v3328_v30 = vadd.f32 %v4419_v28, %v3022_v18  ;;  %v3020_v53 = vadd.f32 %v2919_v5, %v2714_v8  ;;  %v6022_v51 = vld [vmem:[#allocation19_spill] sm:$0xff] }
 0x212   : > { %3357 = vst [vmem:[%s5839_s6 + $0x40] sm:$0xff] %v3325_v17  ;;  %v4374_v26 = vpop.f32.mrf.mxu1  ;;  %v3241_v50 = vpop.f32.mrf.mxu0  ;;  %v3428_v56 = vmul.f32 %v3325_v17, %v3325_v17  ;;  %v2417_v24 = vadd.f32 %v6016_v40, %v5650_v63  ;;  %v2721_v63 = vadd.f32 %v6021_v44, %v2414_v27  ;;  %v6031_v40 = vld [vmem:[#allocation7_spill] sm:$0xff] }
 0x213   : > { %v3389_v34 = vadd.f32 %v3388_v25, %v3325_v17  ;;  %v3458_v21 = vadd.f32 %v3457_v43, %v3427_v29  ;;  %3360 = vst [vmem:[%s5839_s6 + $0x58] sm:$0xff] %v3328_v30  ;;  %v3326_v35 = vadd.f32 %v3225_v47, %v3020_v53  ;;  %v3025_v1 = vadd.f32 %v4374_v26, %v2719_v32  ;;  %v6017_v47 = vld [vmem:[#allocation16_spill] sm:$0xff]  ;;  %v6024_v17 = vld [vmem:[#allocation26_spill] sm:$0xff] }
 0x214   : > { %v2932_v55 = vpop.f32.mrf.mxu1  ;;  %v4426_v57 = vpop.f32.mrf.mxu0  ;;  %v2718_v7 = vadd.f32 %v6017_v47, %v2411_v59  ;;  %v3431_v58 = vmul.f32 %v3328_v30, %v3328_v30  ;;  %v2724_v18 = vadd.f32 %v6022_v51, %v2417_v24  ;;  %v6023_v29 = vld [vmem:[#allocation4_spill] sm:$0xff] }
 0x215   : > { %v3459_v28 = vadd.f32 %v3458_v21, %v3428_v56  ;;  %3358 = vst [vmem:[%s5839_s6 + $0x48] sm:$0xff] %v3326_v35  ;;  %v3390_v2 = vadd.f32 %v3389_v34, %v3326_v35  ;;  %v3429_v31 = vmul.f32 %v3326_v35, %v3326_v35  ;;  %v3023_v19 = vadd.f32 %v2932_v55, %v2717_v10  ;;  %v6025_v10 = vld [vmem:[#allocation5_spill] sm:$0xff]  ;;  %v6026_v34 = vld [vmem:[#allocation28_spill] sm:$0xff] }
 0x216   : > { %v3331_v36 = vadd.f32 %v4422_v14, %v3025_v1  ;;  %v4375_v62 = vpop.f32.mrf.mxu1  ;;  %v3254_v46 = vpop.f32.mrf.mxu0  ;;  %v6019_v14 = vld [vmem:[#allocation3_spill] sm:$0xff]  ;;  %v2420_v5 = vadd.f32 %v6024_v17, %v6023_v29  ;;  %v2418_v56 = vadd.f32 %v6026_v34, %v6025_v10  ;;  %v6027_v35 = vld [vmem:[#allocation20_spill] sm:$0xff]  ;;  %v6029_v1 = vld [vmem:[#allocation30_spill] sm:$0xff] }
 0x217   : > { %v3391_v61 = vadd.f32 %v3390_v2, %v3327_v13  ;;  %v3460_v60 = vadd.f32 %v3459_v28, %v3429_v31  ;;  %v3329_v12 = vadd.f32 %v3238_v22, %v3023_v19  ;;  %v3026_v11 = vadd.f32 %v4375_v62, %v2720_v42  ;;  %v6032_v24 = vld [vmem:[#allocation32_spill] sm:$0xff]  ;;  %v6039_v29 = vld [vmem:[#allocation27_spill] sm:$0xff] }
 0x218   : > { %3363 = vst [vmem:[%s5839_s6 + $0x70] sm:$0xff] %v3331_v36  ;;  %v2935_v45 = vpop.f32.mrf.mxu1  ;;  %v4427_v41 = vpop.f32.mrf.mxu0  ;;  %v2415_v38 = vadd.f32 %v6020_v0, %v6019_v14  ;;  %v2421_v55 = vadd.f32 %v6029_v1, %v6028_v15  ;;  %v3434_v42 = vmul.f32 %v3331_v36, %v3331_v36  ;;  %v2419_v47 = vadd.f32 %v6032_v24, %v6031_v40  ;;  %v6048_v40 = vld [vmem:[#allocation42_spill] sm:$0xff] }
 0x219   : > { %v3461_v6 = vadd.f32 %v3460_v60, %v3430_v52  ;;  %3361 = vst [vmem:[%s5839_s6 + $0x60] sm:$0xff] %v3329_v12  ;;  %v3392_v39 = vadd.f32 %v3391_v61, %v3328_v30  ;;  %v3332_v20 = vadd.f32 %v4423_v33, %v3026_v11  ;;  %v3024_v4 = vadd.f32 %v2935_v45, %v2718_v7  ;;  %v6030_v52 = vld [vmem:[#allocation21_spill] sm:$0xff]  ;;  %v6033_v45 = vld [vmem:[#allocation23_spill] sm:$0xff] }
 0x21a   : > { %v4378_v13 = vpop.f32.mrf.mxu1  ;;  %v3257_v49 = vpop.f32.mrf.mxu0  ;;  %v3432_v16 = vmul.f32 %v3329_v12, %v3329_v12  ;;  %v2722_v59 = vadd.f32 %v6027_v35, %v2415_v38  ;;  %v2727_v62 = vadd.f32 %v6030_v52, %v2420_v5  ;;  %v2725_v3 = vadd.f32 %v6033_v45, %v2418_v56  ;;  %v6035_v38 = vld [vmem:[#allocation8_spill] sm:$0xff]  ;;  %v6040_v5 = vld [vmem:[#allocation10_spill] sm:$0xff] }
 0x21b   : > { %v3393_v54 = vadd.f32 %v3392_v39, %v3329_v12  ;;  %v3462_v8 = vadd.f32 %v3461_v6, %v3431_v58  ;;  %3364 = vst [vmem:[%s5839_s6 + $0x78] sm:$0xff] %v3332_v20  ;;  %v3029_v22 = vadd.f32 %v4378_v13, %v2723_v9  ;;  %v3330_v48 = vadd.f32 %v3241_v50, %v3024_v4  ;;  %v6034_v39 = vld [vmem:[#allocation25_spill] sm:$0xff] }
 0x21c   : > { %v2948_v37 = vpop.f32.mrf.mxu1  ;;  %v4430_v23 = vpop.f32.mrf.mxu0  ;;  %v3435_v61 = vmul.f32 %v3332_v20, %v3332_v20  ;;  %v2728_v14 = vadd.f32 %v6034_v39, %v2421_v55  ;;  %v2726_v17 = vadd.f32 %v6039_v29, %v2419_v47  ;;  %v6043_v55 = vld [vmem:[#allocation11_spill] sm:$0xff] }
 0x21d   : > { %v3463_v33 = vadd.f32 %v3462_v8, %v3432_v16  ;;  %v3335_v43 = vadd.f32 %v4426_v57, %v3029_v22  ;;  %v3027_v25 = vadd.f32 %v2948_v37, %v2721_v63  ;;  %3362 = vst [vmem:[%s5839_s6 + $0x68] sm:$0xff] %v3330_v48  ;;  %v3394_v30 = vadd.f32 %v3393_v54, %v3330_v48  ;;  %v6037_v22 = vld [vmem:[#allocation9_spill] sm:$0xff] }
 0x21e   : > { %v3433_v53 = vmul.f32 %v3330_v48, %v3330_v48  ;;  %v4379_v32 = vpop.f32.mrf.mxu1  ;;  %v3270_v26 = vpop.f32.mrf.mxu0  ;;  %v6038_v48 = vld [vmem:[#allocation36_spill] sm:$0xff] }
 0x21f   : > { %3367 = vst [vmem:[%s5839_s6 + $0x90] sm:$0xff] %v3335_v43  ;;  %v3333_v50 = vadd.f32 %v3254_v46, %v3027_v25  ;;  %v3030_v21 = vadd.f32 %v4379_v32, %v2724_v18  ;;  %v3395_v57 = vadd.f32 %v3394_v30, %v3331_v36  ;;  %v2422_v37 = vadd.f32 %v6038_v48, %v6037_v22  ;;  %v6054_v48 = vld [vmem:[#allocation37_spill] sm:$0xff] }
 0x220   : > { %v3464_v28 = vadd.f32 %v3463_v33, %v3433_v53  ;;  %v2951_v2 = vpop.f32.mrf.mxu1  ;;  %v4431_v31 = vpop.f32.mrf.mxu0  ;;  %v6041_v33 = vld [vmem:[#allocation38_spill] sm:$0xff]  ;;  %v3438_v30 = vmul.f32 %v3335_v43, %v3335_v43 }
 0x221   : > { %3365 = vst [vmem:[%s5839_s6 + $0x80] sm:$0xff] %v3333_v50  ;;  %v3336_v19 = vadd.f32 %v4427_v41, %v3030_v21  ;;  %v3028_v27 = vadd.f32 %v2951_v2, %v2722_v59  ;;  %v3396_v46 = vadd.f32 %v3395_v57, %v3332_v20  ;;  %v3436_v41 = vmul.f32 %v3333_v50, %v3333_v50  ;;  %v6036_v20 = vld [vmem:[#allocation34_spill] sm:$0xff]  ;;  %v6045_v2 = vld [vmem:[#allocation31_spill] sm:$0xff] }
 0x222   : > { %v3465_v60 = vadd.f32 %v3464_v28, %v3434_v42  ;;  %v4382_v12 = vpop.f32.mrf.mxu1  ;;  %v3273_v11 = vpop.f32.mrf.mxu0  ;;  %v2424_v4 = vadd.f32 %v6036_v20, %v6035_v38  ;;  %v2425_v25 = vadd.f32 %v6041_v33, %v6040_v5  ;;  %v6044_v42 = vld [vmem:[#allocation40_spill] sm:$0xff]  ;;  %v6055_v5 = vld [vmem:[#allocation15_spill] sm:$0xff]  ;;  %v6056_v33 = vld [vmem:[#allocation46_spill] sm:$0xff] }
 0x223   : > { %3368 = vst [vmem:[%s5839_s6 + $0x98] sm:$0xff] %v3336_v19  ;;  %v3334_v7 = vadd.f32 %v3257_v49, %v3028_v27  ;;  %v3033_v36 = vadd.f32 %v4382_v12, %v2727_v62  ;;  %v3397_v9 = vadd.f32 %v3396_v46, %v3333_v50  ;;  %v6042_v50 = vld [vmem:[#allocation29_spill] sm:$0xff]  ;;  %v3439_v35 = vmul.f32 %v3336_v19, %v3336_v19  ;;  %v6047_v12 = vld [vmem:[#allocation12_spill] sm:$0xff] }
 0x224   : > { %v3466_v58 = vadd.f32 %v3465_v60, %v3435_v61  ;;  %v2964_v6 = vpop.f32.mrf.mxu1  ;;  %v4434_v0 = vpop.f32.mrf.mxu0  ;;  %v2731_v21 = vadd.f32 %v6042_v50, %v2424_v4  ;;  %v2423_v57 = vadd.f32 %v6044_v42, %v6043_v55  ;;  %v2729_v27 = vadd.f32 %v6045_v2, %v2422_v37  ;;  %v6046_v60 = vld [vmem:[#allocation33_spill] sm:$0xff] }
 0x225   : > { %3366 = vst [vmem:[%s5839_s6 + $0x88] sm:$0xff] %v3334_v7  ;;  %v3437_v13 = vmul.f32 %v3334_v7, %v3334_v7  ;;  %v3339_v44 = vadd.f32 %v4430_v23, %v3033_v36  ;;  %v3031_v63 = vadd.f32 %v2964_v6, %v2725_v3  ;;  %v3398_v54 = vadd.f32 %v3397_v9, %v3334_v7  ;;  %v6049_v9 = vld [vmem:[#allocation13_spill] sm:$0xff] }
 0x226   : > { %v3467_v49 = vadd.f32 %v3466_v58, %v3436_v41  ;;  %v4383_v16 = vpop.f32.mrf.mxu1  ;;  %v3286_v8 = vpop.f32.mrf.mxu0  ;;  %v2732_v46 = vadd.f32 %v6046_v60, %v2425_v25  ;;  %v6050_v41 = vld [vmem:[#allocation44_spill] sm:$0xff]  ;;  %v2427_v25 = vadd.f32 %v6056_v33, %v6055_v5 }
 0x227   : > { %3371 = vst [vmem:[%s5839_s6 + $0xb0] sm:$0xff] %v3339_v44  ;;  %v3337_v51 = vadd.f32 %v3270_v26, %v3031_v63  ;;  %v3034_v18 = vadd.f32 %v4383_v16, %v2728_v14  ;;  %v3399_v23 = vadd.f32 %v3398_v54, %v3335_v43  ;;  %v2426_v58 = vadd.f32 %v6050_v41, %v6049_v9  ;;  %v6051_v14 = vld [vmem:[#allocation35_spill] sm:$0xff] }
 0x228   : > { %v3468_v53 = vadd.f32 %v3467_v49, %v3437_v13  ;;  %v2967_v32 = vpop.f32.mrf.mxu1  ;;  %v4435_v10 = vpop.f32.mrf.mxu0  ;;  %v2730_v38 = vadd.f32 %v6051_v14, %v2423_v57  ;;  %v3442_v20 = vmul.f32 %v3339_v44, %v3339_v44  ;;  %v6053_v49 = vld [vmem:[#allocation45_spill] sm:$0xff] }
 0x229   : > { %3369 = vst [vmem:[%s5839_s6 + $0xa0] sm:$0xff] %v3337_v51  ;;  %v3340_v34 = vadd.f32 %v4431_v31, %v3034_v18  ;;  %v3032_v56 = vadd.f32 %v2967_v32, %v2726_v17  ;;  %v3400_v59 = vadd.f32 %v3399_v23, %v3336_v19  ;;  %v3440_v31 = vmul.f32 %v3337_v51, %v3337_v51  ;;  %v6057_v23 = vld [vmem:[#allocation39_spill] sm:$0xff] }
 0x22a   : > { %v3469_v26 = vadd.f32 %v3468_v53, %v3438_v30  ;;  %v4386_v15 = vpop.f32.mrf.mxu1  ;;  %v3289_v1 = vpop.f32.mrf.mxu0  ;;  %v2428_v19 = vadd.f32 %v6048_v40, %v6047_v12  ;;  %v2733_v53 = vadd.f32 %v6057_v23, %v2426_v58 }
 0x22b   : > { %3372 = vst [vmem:[%s5839_s6 + $0xb8] sm:$0xff] %v3340_v34  ;;  %v3338_v28 = vadd.f32 %v3273_v11, %v3032_v56  ;;  %v3037_v43 = vadd.f32 %v4386_v15, %v2731_v21  ;;  %v3401_v52 = vadd.f32 %v3400_v59, %v3337_v51  ;;  %v3443_v51 = vmul.f32 %v3340_v34, %v3340_v34 }
 0x22c   : > { %v3470_v62 = vadd.f32 %v3469_v26, %v3439_v35  ;;  %v2980_v61 = vpop.f32.mrf.mxu1  ;;  %v4438_v3 = vpop.f32.mrf.mxu0  ;;  %v2735_v37 = vadd.f32 %v6054_v48, %v2428_v19  ;;  %v6058_v26 = vld [vmem:[#allocation41_spill] sm:$0xff] }
 0x22d   : > { %3370 = vst [vmem:[%s5839_s6 + $0xa8] sm:$0xff] %v3338_v28  ;;  %v3441_v24 = vmul.f32 %v3338_v28, %v3338_v28  ;;  %v3343_v47 = vadd.f32 %v4434_v0, %v3037_v43  ;;  %v3035_v7 = vadd.f32 %v2980_v61, %v2729_v27  ;;  %v3402_v11 = vadd.f32 %v3401_v52, %v3338_v28  ;;  %v6052_v0 = vld [vmem:[#allocation14_spill] sm:$0xff]  ;;  %v6059_v43 = vld [vmem:[#allocation43_spill] sm:$0xff] }
 0x22e   : > { %v3471_v36 = vadd.f32 %v3470_v62, %v3440_v31  ;;  %v4387_v45 = vpop.f32.mrf.mxu1  ;;  %v2429_v54 = vadd.f32 %v6053_v49, %v6052_v0  ;;  %v3302_v17 = vpop.f32.mrf.mxu0  ;;  %v2734_v2 = vadd.f32 %v6059_v43, %v2427_v25 }
 0x22f   : > { %3375 = vst [vmem:[%s5839_s6 + $0xd0] sm:$0xff] %v3343_v47  ;;  %v3341_v6 = vadd.f32 %v3286_v8, %v3035_v7  ;;  %v3038_v39 = vadd.f32 %v4387_v45, %v2732_v46  ;;  %v3403_v4 = vadd.f32 %v3402_v11, %v3339_v44  ;;  %v3446_v27 = vmul.f32 %v3343_v47, %v3343_v47 }
 0x230   : > { %v3472_v13 = vadd.f32 %v3471_v36, %v3441_v24  ;;  %v2983_v63 = vpop.f32.mrf.mxu1  ;;  %v2736_v59 = vadd.f32 %v6058_v26, %v2429_v54  ;;  %v4439_v42 = vpop.f32.mrf.mxu0 }
 0x231   : > { %3373 = vst [vmem:[%s5839_s6 + $0xc0] sm:$0xff] %v3341_v6  ;;  %v3344_v16 = vadd.f32 %v4435_v10, %v3038_v39  ;;  %v3036_v22 = vadd.f32 %v2983_v63, %v2730_v38  ;;  %v3404_v8 = vadd.f32 %v3403_v4, %v3340_v34  ;;  %v3444_v10 = vmul.f32 %v3341_v6, %v3341_v6 }
 0x232   : > { %v3473_v18 = vadd.f32 %v3472_v13, %v3442_v20  ;;  %v4390_v29 = vpop.f32.mrf.mxu1  ;;  %v3305_v19 = vpop.f32.mrf.mxu0 }
 0x233   : > { %3376 = vst [vmem:[%s5839_s6 + $0xd8] sm:$0xff] %v3344_v16  ;;  %v3342_v44 = vadd.f32 %v3289_v1, %v3036_v22  ;;  %v3041_v30 = vadd.f32 %v4390_v29, %v2735_v37  ;;  %v3405_v32 = vadd.f32 %v3404_v8, %v3341_v6  ;;  %v3447_v46 = vmul.f32 %v3344_v16, %v3344_v16 }
 0x234   : > { %v3474_v56 = vadd.f32 %v3473_v18, %v3443_v51  ;;  %v2996_v50 = vpop.f32.mrf.mxu1 }
 0x235   : > { %3374 = vst [vmem:[%s5839_s6 + $0xc8] sm:$0xff] %v3342_v44  ;;  %v3445_v21 = vmul.f32 %v3342_v44, %v3342_v44  ;;  %v3347_v35 = vadd.f32 %v4438_v3, %v3041_v30  ;;  %v3039_v34 = vadd.f32 %v2996_v50, %v2733_v53  ;;  %v3406_v55 = vadd.f32 %v3405_v32, %v3342_v44 }
 0x236   : > { %v3475_v15 = vadd.f32 %v3474_v56, %v3444_v10  ;;  %v4391_v57 = vpop.f32.mrf.mxu1 }
 0x237   : > { %3379 = vst [vmem:[%s5839_s6 + $0xf0] sm:$0xff] %v3347_v35  ;;  %v3345_v1 = vadd.f32 %v3302_v17, %v3039_v34  ;;  %v3042_v28 = vadd.f32 %v4391_v57, %v2736_v59  ;;  %v3407_v52 = vadd.f32 %v3406_v55, %v3343_v47  ;;  %v3450_v41 = vmul.f32 %v3347_v35, %v3347_v35 }
 0x238   : > { %v3476_v31 = vadd.f32 %v3475_v15, %v3445_v21  ;;  %v2999_v62 = vpop.f32.mrf.mxu1 }
 0x239   : > { %3377 = vst [vmem:[%s5839_s6 + $0xe0] sm:$0xff] %v3345_v1  ;;  %v3348_v61 = vadd.f32 %v4439_v42, %v3042_v28  ;;  %v3040_v60 = vadd.f32 %v2999_v62, %v2734_v2  ;;  %v3408_v40 = vadd.f32 %v3407_v52, %v3344_v16  ;;  %v3448_v36 = vmul.f32 %v3345_v1, %v3345_v1 }
 0x23a   : > { %v3477_v12 = vadd.f32 %v3476_v31, %v3446_v27 }
 0x23b   : > { %3380 = vst [vmem:[%s5839_s6 + $0xf8] sm:$0xff] %v3348_v61  ;;  %v3346_v24 = vadd.f32 %v3305_v19, %v3040_v60  ;;  %v3409_v7 = vadd.f32 %v3408_v40, %v3345_v1  ;;  %v3451_v6 = vmul.f32 %v3348_v61, %v3348_v61 }
 0x23c   : > { %v3478_v11 = vadd.f32 %v3477_v12, %v3447_v46 }
 0x23d   : > { %3378 = vst [vmem:[%s5839_s6 + $0xe8] sm:$0xff] %v3346_v24  ;;  %v3449_v45 = vmul.f32 %v3346_v24, %v3346_v24  ;;  %v3410_v9 = vadd.f32 %v3409_v7, %v3346_v24 }
 0x23e   : > { %v3479_v3 = vadd.f32 %v3478_v11, %v3448_v36 }
 0x23f   : > { %v3411_v47 = vadd.f32 %v3410_v9, %v3347_v35 }
 0x240   : > { %v3480_v58 = vadd.f32 %v3479_v3, %v3449_v45 }
 0x241   : > { %v3412_v39 = vadd.f32 %v3411_v47, %v3348_v61 }
 0x242   : > { %v3481_v14 = vadd.f32 %v3480_v58, %v3450_v41 }
 0x243   : > { %v3413_v38 = vrot.slane %v3412_v39, 4 }
 0x244   : > { %v3482_v20 = vadd.f32 %v3481_v14, %v3451_v6 }
 0x245   : > { %v3414_v4 = vadd.f32 %v3413_v38, %v3412_v39 }
 0x246   : > { %v3483_v13 = vrot.slane %v3482_v20, 4 }
 0x247   : > { %v3415_v63 = vrot.slane %v3414_v4, 2 }
 0x248   : > { %v3484_v0 = vadd.f32 %v3483_v13, %v3482_v20 }
 0x249   : > { %v3416_v49 = vadd.f32 %v3415_v63, %v3414_v4 }
 0x24a   : > { %v3485_v54 = vrot.slane %v3484_v0, 2 }
 0x24b   : > { %v3417_v16 = vrot.slane %v3416_v49, 1 }
 0x24c   : > { %v3486_v22 = vadd.f32 %v3485_v54, %v3484_v0 }
 0x24d   : > { %v3418_v48 = vadd.f32 %v3417_v16, %v3416_v49 }
 0x24e   : > { %v3487_v37 = vrot.slane %v3486_v22, 1 }
 0x24f   : > { %3419 = vst [vmem:[%s5712_s27] sm:$0x1] %v3418_v48 }
 0x250   : > { %v3488_v51 = vadd.f32 %v3487_v37, %v3486_v22 }
 0x252   : > { %3489 = vst [vmem:[%s5712_s27 + $0x1] sm:$0x1] %v3488_v51 }
 0x253 PF: > { %s16_s18 = sadd.s32 1, %s4675_s18  }
 0x254   : > { %p13_p5 = scmp.ge.s32.totalorder %s16_s18, 4  }
 0x256   :  { %15 = sbr.rel (!%p13_p5) target bundleno = 1 (0x1), region = 88 }

</bundles_post_ra>
